<compile_context>
chip_gen: v6e
topology: v6e:2x2x1
jax: 0.10.0
libtpu: 0.0.40
codegen_flags: <defaults>
</compile_context>

<pallas_src>
import math

import numpy as np
import jax
import jax.numpy as jnp
from jax import lax
from jax.experimental import pallas as pl
from jax.experimental.pallas import tpu as pltpu

# ---------------------------------------------------------------------------
# G(3,0,1) algebra tables (built once with numpy, baked as Python-scalar terms).
# Basis order: 1, e0, e1, e2, e3, e01, e02, e03, e12, e13, e23,
#              e012, e013, e023, e123, e0123.     e0^2 = 0, e1^2=e2^2=e3^2 = +1
# ---------------------------------------------------------------------------
_BLADES = [(), (0,), (1,), (2,), (3,),
           (0, 1), (0, 2), (0, 3), (1, 2), (1, 3), (2, 3),
           (0, 1, 2), (0, 1, 3), (0, 2, 3), (1, 2, 3),
           (0, 1, 2, 3)]
_IDX = {b: i for i, b in enumerate(_BLADES)}
GRADE = [len(b) for b in _BLADES]
METRIC = [0.0 if 0 in b else 1.0 for b in _BLADES]   # invariant inner-product mask
METRIC_IDX = tuple(k for k in range(16) if METRIC[k] != 0.0)
NUM_METRIC = len(METRIC_IDX)
_SQ = {0: 0.0, 1: 1.0, 2: 1.0, 3: 1.0}
EPS = 1e-6

# contiguous per-grade index ranges (blade list is grade-ordered)
GRADE_SLICES = []
_s = 0
for _g in range(5):
    _cnt = GRADE.count(_g)
    GRADE_SLICES.append((_s, _s + _cnt))
    _s += _cnt
GRADE_SLICES = tuple(GRADE_SLICES)


def _mul_blades(a, b):
    arr = list(a) + list(b)
    sign = 1.0
    for i in range(1, len(arr)):
        j = i
        while j > 0 and arr[j - 1] > arr[j]:
            arr[j - 1], arr[j] = arr[j], arr[j - 1]
            sign = -sign
            j -= 1
    out, i, coeff = [], 0, sign
    while i < len(arr):
        if i + 1 < len(arr) and arr[i] == arr[i + 1]:
            coeff *= _SQ[arr[i]]
            i += 2
        else:
            out.append(arr[i])
            i += 1
    return coeff, tuple(out)


def _build_tables():
    gp = np.zeros((16, 16, 16), np.float64)
    wedge = np.zeros((16, 16, 16), np.float64)
    for p, bp in enumerate(_BLADES):
        for q, bq in enumerate(_BLADES):
            c, res = _mul_blades(bp, bq)
            if c != 0.0:
                gp[p, q, _IDX[res]] += c
            if not (set(bp) & set(bq)):
                cw, resw = _mul_blades(bp, bq)
                wedge[p, q, _IDX[resw]] += cw
    dual = np.zeros((16, 16), np.float64)     # right complement: e_i ^ dual(e_i) = e0123
    full = (0, 1, 2, 3)
    for i, b in enumerate(_BLADES):
        comp = tuple(sorted(set(full) - set(b)))
        sigma, res = _mul_blades(b, comp)
        assert res == full and sigma in (1.0, -1.0)
        dual[i, _IDX[comp]] = sigma
    undual = np.linalg.inv(dual)
    join = np.einsum('ip,jq,pqr,rk->ijk', dual, dual, wedge, undual)
    return np.rint(gp).astype(np.float32), np.rint(join).astype(np.float32)


GP_TABLE, JOIN_TABLE = _build_tables()


def _terms(tab):
    out = []
    for p in range(16):
        for q in range(16):
            for r in range(16):
                c = float(tab[p, q, r])
                if c != 0.0:
                    out.append((p, q, r, c))
    return out


GP_TERMS = _terms(GP_TABLE)       # sparse trilinear terms (Python scalars only)
JOIN_TERMS = _terms(JOIN_TABLE)


def _gelu_tanh(v):
    return 0.5 * v * (1.0 + jnp.tanh(0.7978845608028654 * (v + 0.044715 * v * v * v)))


# ---------------------------------------------------------------------------
# In-kernel helpers. Multivectors are held as a Python list of 16 (N, C) f32
# arrays, so every hot-path op is a plain 2-D matmul / elementwise op.
# ---------------------------------------------------------------------------
def _equi_norm(xs):
    sq = None
    for k in METRIC_IDX:
        t = xs[k] * xs[k]
        sq = t if sq is None else sq + t
    inv = lax.rsqrt(jnp.mean(sq, axis=-1, keepdims=True) + EPS)   # (N, 1)
    return [xs[k] * inv for k in range(16)]


def _equi_linear(xs, w_ref):
    # Grade-fused: components of one grade are stacked along the row (sublane) axis
    # and hit the MXU as a single (n_g*N, Cin) @ (Cin, Cout) bf16 matmul, f32 accumulate.
    n = xs[0].shape[0]
    out = []
    for g, (lo, hi) in enumerate(GRADE_SLICES):
        ng = hi - lo
        blk = xs[lo] if ng == 1 else jnp.concatenate(xs[lo:hi], axis=0)
        y = jnp.dot(blk.astype(jnp.bfloat16), w_ref[g],
                    preferred_element_type=jnp.float32)
        if ng == 1:
            out.append(y)
        else:
            out.extend(y[j * n:(j + 1) * n, :] for j in range(ng))
    return out


def _geometric_attention(qs, ks, vs, num_heads):
    # Per head: real channel slices (no masks -> no captured constants, no wasted FLOPs),
    # metric components stacked along the contraction axis (one QK^T dot),
    # all 16 value components stacked along lanes (one PV dot).
    n, c = qs[0].shape
    ch = c // num_heads
    scale = 1.0 / math.sqrt(ch * NUM_METRIC)
    out_chunks = [[] for _ in range(16)]
    for h in range(num_heads):
        sl = slice(h * ch, (h + 1) * ch)
        q_h = jnp.concatenate([qs[k][:, sl] for k in METRIC_IDX], axis=1).astype(jnp.bfloat16)
        k_h = jnp.concatenate([ks[k][:, sl] for k in METRIC_IDX], axis=1).astype(jnp.bfloat16)
        s = lax.dot_general(q_h, k_h, (((1,), (1,)), ((), ())),
                            preferred_element_type=jnp.float32) * scale      # (N, N)
        s = s - jnp.max(s, axis=-1, keepdims=True)
        p = jnp.exp(s)
        p = p / jnp.sum(p, axis=-1, keepdims=True)
        v_h = jnp.concatenate([vs[k][:, sl] for k in range(16)], axis=1).astype(jnp.bfloat16)
        o_h = jnp.dot(p.astype(jnp.bfloat16), v_h,
                      preferred_element_type=jnp.float32)                    # (N, 16*ch)
        for k in range(16):
            out_chunks[k].append(o_h[:, k * ch:(k + 1) * ch])
    if num_heads == 1:
        return [chunks[0] for chunks in out_chunks]
    return [jnp.concatenate(chunks, axis=1) for chunks in out_chunks]


def _mv_bilinear(a, b, terms):
    # TODO(synk): for large N this 190+81-term VALU workload should be evaluated on
    # N-tiles inside a fori_loop to bound live ranges / vreg pressure.
    out = [None] * 16
    for (p, q, r, coeff) in terms:
        t = a[p] * b[q]
        if coeff == -1.0:
            out[r] = (-t) if out[r] is None else out[r] - t
        elif coeff == 1.0:
            out[r] = t if out[r] is None else out[r] + t
        else:
            t = t * coeff
            out[r] = t if out[r] is None else out[r] + t
    return [o if o is not None else jnp.zeros_like(a[0]) for o in out]


def _gated_gelu(xs):
    gate = _gelu_tanh(xs[0])
    return [gate * xs[k] for k in range(16)]


def _make_kernel(num_heads, half):
    def kernel(x_ref, refps_ref,
               w_b1_l1, w_b1_l2, w_b2_l1, w_proj, w_out, w_b2_l2,
               o_ref):
        xs = [x_ref[k] for k in range(16)]          # 16 x (N, C) f32
        ref_ps = refps_ref[...]                     # (1, 1) e0123 coefficient of reference

        # ---- branch 1: norm -> linear -> geometric attention -> linear, residual
        h = _equi_norm(xs)
        h = _equi_linear(h, w_b1_l1)
        h = _geometric_attention(h, h, h, num_heads)
        h = _equi_linear(h, w_b1_l2)
        xs = [xs[k] + h[k] for k in range(16)]

        # ---- branch 2: norm -> linear -> geometric bilinear -> gated GELU -> linear, residual
        h = _equi_norm(xs)
        h = _equi_linear(h, w_b2_l1)
        proj = _equi_linear(h, w_proj)              # fused left|right|j1|j2: 16 x (N, 4*half)
        a_ = [proj[k][:, 0 * half:1 * half] for k in range(16)]
        b_ = [proj[k][:, 1 * half:2 * half] for k in range(16)]
        c_ = [proj[k][:, 2 * half:3 * half] for k in range(16)]
        d_ = [proj[k][:, 3 * half:4 * half] for k in range(16)]
        gp = _mv_bilinear(a_, b_, GP_TERMS)         # geometric product
        jn = _mv_bilinear(c_, d_, JOIN_TERMS)       # equivariant join
        cat = [jnp.concatenate([gp[k], ref_ps * jn[k]], axis=1) for k in range(16)]
        h = _equi_linear(cat, w_out)                # fused (gp-out ; join-out) projection
        h = _gated_gelu(h)
        h = _equi_linear(h, w_b2_l2)
        xs = [xs[k] + h[k] for k in range(16)]

        for k in range(16):
            o_ref[k] = xs[k]

    return kernel


# ---------------------------------------------------------------------------
# Wrapper: transpose glue, weight fusion/casting + pallas_call (grid over batch).
# ---------------------------------------------------------------------------
def gatr_block_forward(x, reference, params, num_heads):
    B, N, C, K = x.shape
    assert K == 16 and C % num_heads == 0 and C % 2 == 0
    half = C // 2
    (w_b1_l1, w_b1_l2, w_b2_l1, w_left, w_right, w_j1, w_j2,
     w_out_gp, w_out_jn, w_b2_l2) = params

    # Fuse bilinear projections / out-projections, cast all weights to bf16 once.
    w_proj = jnp.concatenate([w_left, w_right, w_j1, w_j2], axis=2)   # (5, C, 2C)
    w_out = jnp.concatenate([w_out_gp, w_out_jn], axis=1)             # (5, C, C)
    weights = [w.astype(jnp.bfloat16)
               for w in (w_b1_l1, w_b1_l2, w_b2_l1, w_proj, w_out, w_b2_l2)]

    x_t = jnp.transpose(x, (0, 3, 1, 2)).astype(jnp.float32)          # (B, 16, N, C)
    ref_ps = reference[:, :, :, 15].astype(jnp.float32)               # (B, 1, 1)

    kernel = _make_kernel(num_heads, half)
    w_specs = [pl.BlockSpec(w.shape, lambda b: (0, 0, 0)) for w in weights]
    out_t = pl.pallas_call(
        kernel,
        out_shape=jax.ShapeDtypeStruct((B, 16, N, C), jnp.float32),
        grid=(B,),
        in_specs=[pl.BlockSpec((None, 16, N, C), lambda b: (b, 0, 0, 0)),
                  pl.BlockSpec((None, 1, 1), lambda b: (b, 0, 0))] + w_specs,
        out_specs=pl.BlockSpec((None, 16, N, C), lambda b: (b, 0, 0, 0)),
        compiler_params=pltpu.CompilerParams(
            dimension_semantics=("parallel",)),       # batch iterations are independent
    )(x_t, ref_ps, *weights)
    return jnp.transpose(out_t, (0, 2, 3, 1))


# ---------------------------------------------------------------------------
# Deterministic parameter init (grade-shared equivariant weights, 5 maps each).
# ---------------------------------------------------------------------------
def init_params(key, hidden):
    half = hidden // 2
    shapes = [(hidden, hidden), (hidden, hidden),     # branch1 lin1, lin2
              (hidden, hidden),                       # branch2 lin1
              (hidden, half), (hidden, half),         # bilinear GP projections
              (hidden, half), (hidden, half),         # bilinear join projections
              (half, hidden), (half, hidden),         # bilinear out (gp part, join part)
              (hidden, hidden)]                       # branch2 lin2
    keys = jax.random.split(key, len(shapes))
    return [jax.random.normal(kk, (5, cin, cout), jnp.float32) / np.sqrt(cin)
            for kk, (cin, cout) in zip(keys, shapes)]


# ---------------------------------------------------------------------------
# Pure-JAX reference (same semantics, dense tables, f32-highest) for validation.
# ---------------------------------------------------------------------------
def ref_forward(x, reference, params, num_heads):
    grade = jnp.asarray(GRADE, jnp.int32)
    (w_b1_l1, w_b1_l2, w_b2_l1, w_left, w_right, w_j1, w_j2,
     w_out_gp, w_out_jn, w_b2_l2) = [p[grade] for p in params]   # expand to 16 components
    m = jnp.asarray(METRIC, jnp.float32)
    gp_t = jnp.asarray(GP_TABLE)
    join_t = jnp.asarray(JOIN_TABLE)
    B, N, C, _ = x.shape
    ch = C // num_heads
    hi = jax.lax.Precision.HIGHEST

    def norm(v):
        sq = jnp.sum(v * v * m, axis=-1)
        return v * lax.rsqrt(jnp.mean(sq, axis=-1, keepdims=True) + EPS)[..., None]

    def lin(v, w):
        return jnp.einsum('bnik,kio->bnok', v, w, precision=hi)

    def attention(v):
        q = v.reshape(B, N, num_heads, ch, 16)
        scale = 1.0 / math.sqrt(ch * NUM_METRIC)
        s = jnp.einsum('bihck,bjhck,k->bhij', q, q, m, precision=hi) * scale
        p = jax.nn.softmax(s, axis=-1)
        o = jnp.einsum('bhij,bjhck->bihck', p, q, precision=hi)
        return o.reshape(B, N, C, 16)

    def bilinear(v, ref_ps):
        a = lin(v, w_left); b = lin(v, w_right)
        g = jnp.einsum('bncp,bncq,pqr->bncr', a, b, gp_t, precision=hi)
        cc = lin(v, w_j1); d = lin(v, w_j2)
        j = jnp.einsum('bncp,bncq,pqr->bncr', cc, d, join_t, precision=hi) * ref_ps
        return lin(g, w_out_gp) + lin(j, w_out_jn)

    def gated_gelu(v):
        return _gelu_tanh(v[..., 0:1]) * v

    ref_ps = reference[..., 15:16]                    # (B, 1, 1, 1)

    h = norm(x); h = lin(h, w_b1_l1); h = attention(h); h = lin(h, w_b1_l2)
    x = x + h
    h = norm(x); h = lin(h, w_b2_l1); h = bilinear(h, ref_ps)
    h = gated_gelu(h); h = lin(h, w_b2_l2)
    return x + h


if __name__ == "__main__":
    B, N, HIDDEN, HEADS = 2, 8, 8, 2
    root = jax.random.PRNGKey(0)
    kx, kr, kp = jax.random.split(root, 3)
    x = jax.random.normal(kx, (B, N, HIDDEN, 16), jnp.float32)
    reference = jax.random.normal(kr, (B, 1, 1, 16), jnp.float32)
    params = init_params(kp, HIDDEN)

    out = gatr_block_forward(x, reference, params, num_heads=HEADS)
    out = jax.block_until_ready(out)

    want = jax.block_until_ready(ref_forward(x, reference, params, num_heads=HEADS))
    # bf16 MXU matmuls (f32 accumulation) vs. f32-highest reference.
    np.testing.assert_allclose(np.asarray(out), np.asarray(want), rtol=2e-2, atol=2e-2)

    print("KERNEL_OK")
</pallas_src>

<mosaic_0001>
module attributes {stable_mosaic.version = 11 : i64} {
  func.func @kernel(%arg0: i32, %arg1: memref<1x16x8x8xf32, #tpu.memory_space<vmem>>, %arg2: memref<1x1x1xf32, #tpu.memory_space<vmem>>, %arg3: memref<5x8x8xbf16, #tpu.memory_space<vmem>>, %arg4: memref<5x8x8xbf16, #tpu.memory_space<vmem>>, %arg5: memref<5x8x8xbf16, #tpu.memory_space<vmem>>, %arg6: memref<5x8x16xbf16, #tpu.memory_space<vmem>>, %arg7: memref<5x8x8xbf16, #tpu.memory_space<vmem>>, %arg8: memref<5x8x8xbf16, #tpu.memory_space<vmem>>, %arg9: memref<1x16x8x8xf32, #tpu.memory_space<vmem>>) attributes {dimension_semantics = [#tpu.dimension_semantics<parallel>], iteration_bounds = array<i64: 2>, scalar_prefetch = 0 : i64, scratch_operands = 0 : i64, tpu.core_type = #tpu.core_type<tc>, window_params = [{transform_indices = @transform_0, window_bounds = array<i64: 1, 16, 8, 8>}, {transform_indices = @transform_1, window_bounds = array<i64: 1, 1, 1>}, {pipeline_mode = #tpu.pipeline_mode<synchronous>, transform_indices = @transform_2, window_bounds = array<i64: 5, 8, 8>}, {pipeline_mode = #tpu.pipeline_mode<synchronous>, transform_indices = @transform_3, window_bounds = array<i64: 5, 8, 8>}, {pipeline_mode = #tpu.pipeline_mode<synchronous>, transform_indices = @transform_4, window_bounds = array<i64: 5, 8, 8>}, {pipeline_mode = #tpu.pipeline_mode<synchronous>, transform_indices = @transform_5, window_bounds = array<i64: 5, 8, 16>}, {pipeline_mode = #tpu.pipeline_mode<synchronous>, transform_indices = @transform_6, window_bounds = array<i64: 5, 8, 8>}, {pipeline_mode = #tpu.pipeline_mode<synchronous>, transform_indices = @transform_7, window_bounds = array<i64: 5, 8, 8>}, {transform_indices = @transform_8, window_bounds = array<i64: 1, 16, 8, 8>}]} {
    %c0 = arith.constant 0 : index
    %c0_0 = arith.constant 0 : index
    %c0_1 = arith.constant 0 : index
    %c0_2 = arith.constant 0 : index
    %0 = vector.load %arg1[%c0, %c0_0, %c0_1, %c0_2] : memref<1x16x8x8xf32, #tpu.memory_space<vmem>>, vector<1x1x8x8xf32>
    %1 = vector.shape_cast %0 : vector<1x1x8x8xf32> to vector<8x8xf32>
    %c0_3 = arith.constant 0 : index
    %c1 = arith.constant 1 : index
    %c0_4 = arith.constant 0 : index
    %c0_5 = arith.constant 0 : index
    %2 = vector.load %arg1[%c0_3, %c1, %c0_4, %c0_5] : memref<1x16x8x8xf32, #tpu.memory_space<vmem>>, vector<1x1x8x8xf32>
    %3 = vector.shape_cast %2 : vector<1x1x8x8xf32> to vector<8x8xf32>
    %c0_6 = arith.constant 0 : index
    %c2 = arith.constant 2 : index
    %c0_7 = arith.constant 0 : index
    %c0_8 = arith.constant 0 : index
    %4 = vector.load %arg1[%c0_6, %c2, %c0_7, %c0_8] : memref<1x16x8x8xf32, #tpu.memory_space<vmem>>, vector<1x1x8x8xf32>
    %5 = vector.shape_cast %4 : vector<1x1x8x8xf32> to vector<8x8xf32>
    %c0_9 = arith.constant 0 : index
    %c3 = arith.constant 3 : index
    %c0_10 = arith.constant 0 : index
    %c0_11 = arith.constant 0 : index
    %6 = vector.load %arg1[%c0_9, %c3, %c0_10, %c0_11] : memref<1x16x8x8xf32, #tpu.memory_space<vmem>>, vector<1x1x8x8xf32>
    %7 = vector.shape_cast %6 : vector<1x1x8x8xf32> to vector<8x8xf32>
    %c0_12 = arith.constant 0 : index
    %c4 = arith.constant 4 : index
    %c0_13 = arith.constant 0 : index
    %c0_14 = arith.constant 0 : index
    %8 = vector.load %arg1[%c0_12, %c4, %c0_13, %c0_14] : memref<1x16x8x8xf32, #tpu.memory_space<vmem>>, vector<1x1x8x8xf32>
    %9 = vector.shape_cast %8 : vector<1x1x8x8xf32> to vector<8x8xf32>
    %c0_15 = arith.constant 0 : index
    %c5 = arith.constant 5 : index
    %c0_16 = arith.constant 0 : index
    %c0_17 = arith.constant 0 : index
    %10 = vector.load %arg1[%c0_15, %c5, %c0_16, %c0_17] : memref<1x16x8x8xf32, #tpu.memory_space<vmem>>, vector<1x1x8x8xf32>
    %11 = vector.shape_cast %10 : vector<1x1x8x8xf32> to vector<8x8xf32>
    %c0_18 = arith.constant 0 : index
    %c6 = arith.constant 6 : index
    %c0_19 = arith.constant 0 : index
    %c0_20 = arith.constant 0 : index
    %12 = vector.load %arg1[%c0_18, %c6, %c0_19, %c0_20] : memref<1x16x8x8xf32, #tpu.memory_space<vmem>>, vector<1x1x8x8xf32>
    %13 = vector.shape_cast %12 : vector<1x1x8x8xf32> to vector<8x8xf32>
    %c0_21 = arith.constant 0 : index
    %c7 = arith.constant 7 : index
    %c0_22 = arith.constant 0 : index
    %c0_23 = arith.constant 0 : index
    %14 = vector.load %arg1[%c0_21, %c7, %c0_22, %c0_23] : memref<1x16x8x8xf32, #tpu.memory_space<vmem>>, vector<1x1x8x8xf32>
    %15 = vector.shape_cast %14 : vector<1x1x8x8xf32> to vector<8x8xf32>
    %c0_24 = arith.constant 0 : index
    %c8 = arith.constant 8 : index
    %c0_25 = arith.constant 0 : index
    %c0_26 = arith.constant 0 : index
    %16 = vector.load %arg1[%c0_24, %c8, %c0_25, %c0_26] : memref<1x16x8x8xf32, #tpu.memory_space<vmem>>, vector<1x1x8x8xf32>
    %17 = vector.shape_cast %16 : vector<1x1x8x8xf32> to vector<8x8xf32>
    %c0_27 = arith.constant 0 : index
    %c9 = arith.constant 9 : index
    %c0_28 = arith.constant 0 : index
    %c0_29 = arith.constant 0 : index
    %18 = vector.load %arg1[%c0_27, %c9, %c0_28, %c0_29] : memref<1x16x8x8xf32, #tpu.memory_space<vmem>>, vector<1x1x8x8xf32>
    %19 = vector.shape_cast %18 : vector<1x1x8x8xf32> to vector<8x8xf32>
    %c0_30 = arith.constant 0 : index
    %c10 = arith.constant 10 : index
    %c0_31 = arith.constant 0 : index
    %c0_32 = arith.constant 0 : index
    %20 = vector.load %arg1[%c0_30, %c10, %c0_31, %c0_32] : memref<1x16x8x8xf32, #tpu.memory_space<vmem>>, vector<1x1x8x8xf32>
    %21 = vector.shape_cast %20 : vector<1x1x8x8xf32> to vector<8x8xf32>
    %c0_33 = arith.constant 0 : index
    %c11 = arith.constant 11 : index
    %c0_34 = arith.constant 0 : index
    %c0_35 = arith.constant 0 : index
    %22 = vector.load %arg1[%c0_33, %c11, %c0_34, %c0_35] : memref<1x16x8x8xf32, #tpu.memory_space<vmem>>, vector<1x1x8x8xf32>
    %23 = vector.shape_cast %22 : vector<1x1x8x8xf32> to vector<8x8xf32>
    %c0_36 = arith.constant 0 : index
    %c12 = arith.constant 12 : index
    %c0_37 = arith.constant 0 : index
    %c0_38 = arith.constant 0 : index
    %24 = vector.load %arg1[%c0_36, %c12, %c0_37, %c0_38] : memref<1x16x8x8xf32, #tpu.memory_space<vmem>>, vector<1x1x8x8xf32>
    %25 = vector.shape_cast %24 : vector<1x1x8x8xf32> to vector<8x8xf32>
    %c0_39 = arith.constant 0 : index
    %c13 = arith.constant 13 : index
    %c0_40 = arith.constant 0 : index
    %c0_41 = arith.constant 0 : index
    %26 = vector.load %arg1[%c0_39, %c13, %c0_40, %c0_41] : memref<1x16x8x8xf32, #tpu.memory_space<vmem>>, vector<1x1x8x8xf32>
    %27 = vector.shape_cast %26 : vector<1x1x8x8xf32> to vector<8x8xf32>
    %c0_42 = arith.constant 0 : index
    %c14 = arith.constant 14 : index
    %c0_43 = arith.constant 0 : index
    %c0_44 = arith.constant 0 : index
    %28 = vector.load %arg1[%c0_42, %c14, %c0_43, %c0_44] : memref<1x16x8x8xf32, #tpu.memory_space<vmem>>, vector<1x1x8x8xf32>
    %29 = vector.shape_cast %28 : vector<1x1x8x8xf32> to vector<8x8xf32>
    %c0_45 = arith.constant 0 : index
    %c15 = arith.constant 15 : index
    %c0_46 = arith.constant 0 : index
    %c0_47 = arith.constant 0 : index
    %30 = vector.load %arg1[%c0_45, %c15, %c0_46, %c0_47] : memref<1x16x8x8xf32, #tpu.memory_space<vmem>>, vector<1x1x8x8xf32>
    %31 = vector.shape_cast %30 : vector<1x1x8x8xf32> to vector<8x8xf32>
    %c0_48 = arith.constant 0 : index
    %c0_49 = arith.constant 0 : index
    %c0_50 = arith.constant 0 : index
    %32 = vector.load %arg2[%c0_48, %c0_49, %c0_50] : memref<1x1x1xf32, #tpu.memory_space<vmem>>, vector<1x1x1xf32>
    %33 = vector.shape_cast %32 : vector<1x1x1xf32> to vector<1x1xf32>
    %34 = arith.mulf %1, %1 : vector<8x8xf32>
    %35 = arith.mulf %5, %5 : vector<8x8xf32>
    %36 = arith.addf %34, %35 : vector<8x8xf32>
    %37 = arith.mulf %7, %7 : vector<8x8xf32>
    %38 = arith.addf %36, %37 : vector<8x8xf32>
    %39 = arith.mulf %9, %9 : vector<8x8xf32>
    %40 = arith.addf %38, %39 : vector<8x8xf32>
    %41 = arith.mulf %17, %17 : vector<8x8xf32>
    %42 = arith.addf %40, %41 : vector<8x8xf32>
    %43 = arith.mulf %19, %19 : vector<8x8xf32>
    %44 = arith.addf %42, %43 : vector<8x8xf32>
    %45 = arith.mulf %21, %21 : vector<8x8xf32>
    %46 = arith.addf %44, %45 : vector<8x8xf32>
    %47 = arith.mulf %29, %29 : vector<8x8xf32>
    %48 = arith.addf %46, %47 : vector<8x8xf32>
    %cst = arith.constant dense<0.000000e+00> : vector<8xf32>
    %49 = vector.multi_reduction <add>, %48, %cst [1] : vector<8x8xf32> to vector<8xf32>
    %50 = vector.shape_cast %49 : vector<8xf32> to vector<8x1xf32>
    %cst_51 = arith.constant 8.000000e+00 : f32
    %51 = vector.broadcast %cst_51 : f32 to vector<8x1xf32>
    %52 = arith.divf %50, %51 : vector<8x1xf32>
    %cst_52 = arith.constant 9.99999997E-7 : f32
    %53 = vector.broadcast %cst_52 : f32 to vector<8x1xf32>
    %54 = arith.addf %52, %53 : vector<8x1xf32>
    %55 = math.rsqrt %54 : vector<8x1xf32>
    %56 = vector.broadcast %55 : vector<8x1xf32> to vector<8x8xf32>
    %57 = arith.mulf %1, %56 : vector<8x8xf32>
    %58 = vector.broadcast %55 : vector<8x1xf32> to vector<8x8xf32>
    %59 = arith.mulf %3, %58 : vector<8x8xf32>
    %60 = vector.broadcast %55 : vector<8x1xf32> to vector<8x8xf32>
    %61 = arith.mulf %5, %60 : vector<8x8xf32>
    %62 = vector.broadcast %55 : vector<8x1xf32> to vector<8x8xf32>
    %63 = arith.mulf %7, %62 : vector<8x8xf32>
    %64 = vector.broadcast %55 : vector<8x1xf32> to vector<8x8xf32>
    %65 = arith.mulf %9, %64 : vector<8x8xf32>
    %66 = vector.broadcast %55 : vector<8x1xf32> to vector<8x8xf32>
    %67 = arith.mulf %11, %66 : vector<8x8xf32>
    %68 = vector.broadcast %55 : vector<8x1xf32> to vector<8x8xf32>
    %69 = arith.mulf %13, %68 : vector<8x8xf32>
    %70 = vector.broadcast %55 : vector<8x1xf32> to vector<8x8xf32>
    %71 = arith.mulf %15, %70 : vector<8x8xf32>
    %72 = vector.broadcast %55 : vector<8x1xf32> to vector<8x8xf32>
    %73 = arith.mulf %17, %72 : vector<8x8xf32>
    %74 = vector.broadcast %55 : vector<8x1xf32> to vector<8x8xf32>
    %75 = arith.mulf %19, %74 : vector<8x8xf32>
    %76 = vector.broadcast %55 : vector<8x1xf32> to vector<8x8xf32>
    %77 = arith.mulf %21, %76 : vector<8x8xf32>
    %78 = vector.broadcast %55 : vector<8x1xf32> to vector<8x8xf32>
    %79 = arith.mulf %23, %78 : vector<8x8xf32>
    %80 = vector.broadcast %55 : vector<8x1xf32> to vector<8x8xf32>
    %81 = arith.mulf %25, %80 : vector<8x8xf32>
    %82 = vector.broadcast %55 : vector<8x1xf32> to vector<8x8xf32>
    %83 = arith.mulf %27, %82 : vector<8x8xf32>
    %84 = vector.broadcast %55 : vector<8x1xf32> to vector<8x8xf32>
    %85 = arith.mulf %29, %84 : vector<8x8xf32>
    %86 = vector.broadcast %55 : vector<8x1xf32> to vector<8x8xf32>
    %87 = arith.mulf %31, %86 : vector<8x8xf32>
    %88 = arith.truncf %57 : vector<8x8xf32> to vector<8x8xbf16>
    %c0_53 = arith.constant 0 : index
    %c0_54 = arith.constant 0 : index
    %c0_55 = arith.constant 0 : index
    %89 = vector.load %arg3[%c0_53, %c0_54, %c0_55] : memref<5x8x8xbf16, #tpu.memory_space<vmem>>, vector<1x8x8xbf16>
    %90 = vector.shape_cast %89 : vector<1x8x8xbf16> to vector<8x8xbf16>
    %cst_56 = arith.constant dense<0.000000e+00> : vector<8x8xf32>
    %91 = tpu.matmul %88, %90, %cst_56 {dimension_numbers = #tpu.dot_dimension_numbers<[1], [0], [0], [1], [0, 0, 1, 1], [], []>} : vector<8x8xbf16>, vector<8x8xbf16>, vector<8x8xf32> -> vector<8x8xf32>
    %92 = tpu.concatenate %59, %61, %63, %65 in 0 : vector<8x8xf32>, vector<8x8xf32>, vector<8x8xf32>, vector<8x8xf32> -> vector<32x8xf32>
    %93 = arith.truncf %92 : vector<32x8xf32> to vector<32x8xbf16>
    %c1_57 = arith.constant 1 : index
    %c0_58 = arith.constant 0 : index
    %c0_59 = arith.constant 0 : index
    %94 = vector.load %arg3[%c1_57, %c0_58, %c0_59] : memref<5x8x8xbf16, #tpu.memory_space<vmem>>, vector<1x8x8xbf16>
    %95 = vector.shape_cast %94 : vector<1x8x8xbf16> to vector<8x8xbf16>
    %cst_60 = arith.constant dense<0.000000e+00> : vector<32x8xf32>
    %96 = tpu.matmul %93, %95, %cst_60 {dimension_numbers = #tpu.dot_dimension_numbers<[1], [0], [0], [1], [0, 0, 1, 1], [], []>} : vector<32x8xbf16>, vector<8x8xbf16>, vector<32x8xf32> -> vector<32x8xf32>
    %97 = vector.extract_strided_slice %96 {offsets = [0, 0], sizes = [8, 8], strides = [1, 1]} : vector<32x8xf32> to vector<8x8xf32>
    %98 = vector.extract_strided_slice %96 {offsets = [8, 0], sizes = [8, 8], strides = [1, 1]} : vector<32x8xf32> to vector<8x8xf32>
    %99 = vector.extract_strided_slice %96 {offsets = [16, 0], sizes = [8, 8], strides = [1, 1]} : vector<32x8xf32> to vector<8x8xf32>
    %100 = vector.extract_strided_slice %96 {offsets = [24, 0], sizes = [8, 8], strides = [1, 1]} : vector<32x8xf32> to vector<8x8xf32>
    %101 = tpu.concatenate %67, %69, %71, %73, %75, %77 in 0 : vector<8x8xf32>, vector<8x8xf32>, vector<8x8xf32>, vector<8x8xf32>, vector<8x8xf32>, vector<8x8xf32> -> vector<48x8xf32>
    %102 = arith.truncf %101 : vector<48x8xf32> to vector<48x8xbf16>
    %c2_61 = arith.constant 2 : index
    %c0_62 = arith.constant 0 : index
    %c0_63 = arith.constant 0 : index
    %103 = vector.load %arg3[%c2_61, %c0_62, %c0_63] : memref<5x8x8xbf16, #tpu.memory_space<vmem>>, vector<1x8x8xbf16>
    %104 = vector.shape_cast %103 : vector<1x8x8xbf16> to vector<8x8xbf16>
    %cst_64 = arith.constant dense<0.000000e+00> : vector<48x8xf32>
    %105 = tpu.matmul %102, %104, %cst_64 {dimension_numbers = #tpu.dot_dimension_numbers<[1], [0], [0], [1], [0, 0, 1, 1], [], []>} : vector<48x8xbf16>, vector<8x8xbf16>, vector<48x8xf32> -> vector<48x8xf32>
    %106 = vector.extract_strided_slice %105 {offsets = [0, 0], sizes = [8, 8], strides = [1, 1]} : vector<48x8xf32> to vector<8x8xf32>
    %107 = vector.extract_strided_slice %105 {offsets = [8, 0], sizes = [8, 8], strides = [1, 1]} : vector<48x8xf32> to vector<8x8xf32>
    %108 = vector.extract_strided_slice %105 {offsets = [16, 0], sizes = [8, 8], strides = [1, 1]} : vector<48x8xf32> to vector<8x8xf32>
    %109 = vector.extract_strided_slice %105 {offsets = [24, 0], sizes = [8, 8], strides = [1, 1]} : vector<48x8xf32> to vector<8x8xf32>
    %110 = vector.extract_strided_slice %105 {offsets = [32, 0], sizes = [8, 8], strides = [1, 1]} : vector<48x8xf32> to vector<8x8xf32>
    %111 = vector.extract_strided_slice %105 {offsets = [40, 0], sizes = [8, 8], strides = [1, 1]} : vector<48x8xf32> to vector<8x8xf32>
    %112 = tpu.concatenate %79, %81, %83, %85 in 0 : vector<8x8xf32>, vector<8x8xf32>, vector<8x8xf32>, vector<8x8xf32> -> vector<32x8xf32>
    %113 = arith.truncf %112 : vector<32x8xf32> to vector<32x8xbf16>
    %c3_65 = arith.constant 3 : index
    %c0_66 = arith.constant 0 : index
    %c0_67 = arith.constant 0 : index
    %114 = vector.load %arg3[%c3_65, %c0_66, %c0_67] : memref<5x8x8xbf16, #tpu.memory_space<vmem>>, vector<1x8x8xbf16>
    %115 = vector.shape_cast %114 : vector<1x8x8xbf16> to vector<8x8xbf16>
    %cst_68 = arith.constant dense<0.000000e+00> : vector<32x8xf32>
    %116 = tpu.matmul %113, %115, %cst_68 {dimension_numbers = #tpu.dot_dimension_numbers<[1], [0], [0], [1], [0, 0, 1, 1], [], []>} : vector<32x8xbf16>, vector<8x8xbf16>, vector<32x8xf32> -> vector<32x8xf32>
    %117 = vector.extract_strided_slice %116 {offsets = [0, 0], sizes = [8, 8], strides = [1, 1]} : vector<32x8xf32> to vector<8x8xf32>
    %118 = vector.extract_strided_slice %116 {offsets = [8, 0], sizes = [8, 8], strides = [1, 1]} : vector<32x8xf32> to vector<8x8xf32>
    %119 = vector.extract_strided_slice %116 {offsets = [16, 0], sizes = [8, 8], strides = [1, 1]} : vector<32x8xf32> to vector<8x8xf32>
    %120 = vector.extract_strided_slice %116 {offsets = [24, 0], sizes = [8, 8], strides = [1, 1]} : vector<32x8xf32> to vector<8x8xf32>
    %121 = arith.truncf %87 : vector<8x8xf32> to vector<8x8xbf16>
    %c4_69 = arith.constant 4 : index
    %c0_70 = arith.constant 0 : index
    %c0_71 = arith.constant 0 : index
    %122 = vector.load %arg3[%c4_69, %c0_70, %c0_71] : memref<5x8x8xbf16, #tpu.memory_space<vmem>>, vector<1x8x8xbf16>
    %123 = vector.shape_cast %122 : vector<1x8x8xbf16> to vector<8x8xbf16>
    %cst_72 = arith.constant dense<0.000000e+00> : vector<8x8xf32>
    %124 = tpu.matmul %121, %123, %cst_72 {dimension_numbers = #tpu.dot_dimension_numbers<[1], [0], [0], [1], [0, 0, 1, 1], [], []>} : vector<8x8xbf16>, vector<8x8xbf16>, vector<8x8xf32> -> vector<8x8xf32>
    %125 = vector.extract_strided_slice %91 {offsets = [0, 0], sizes = [8, 4], strides = [1, 1]} : vector<8x8xf32> to vector<8x4xf32>
    %126 = vector.extract_strided_slice %98 {offsets = [0, 0], sizes = [8, 4], strides = [1, 1]} : vector<8x8xf32> to vector<8x4xf32>
    %127 = vector.extract_strided_slice %99 {offsets = [0, 0], sizes = [8, 4], strides = [1, 1]} : vector<8x8xf32> to vector<8x4xf32>
    %128 = vector.extract_strided_slice %100 {offsets = [0, 0], sizes = [8, 4], strides = [1, 1]} : vector<8x8xf32> to vector<8x4xf32>
    %129 = vector.extract_strided_slice %109 {offsets = [0, 0], sizes = [8, 4], strides = [1, 1]} : vector<8x8xf32> to vector<8x4xf32>
    %130 = vector.extract_strided_slice %110 {offsets = [0, 0], sizes = [8, 4], strides = [1, 1]} : vector<8x8xf32> to vector<8x4xf32>
    %131 = vector.extract_strided_slice %111 {offsets = [0, 0], sizes = [8, 4], strides = [1, 1]} : vector<8x8xf32> to vector<8x4xf32>
    %132 = vector.extract_strided_slice %120 {offsets = [0, 0], sizes = [8, 4], strides = [1, 1]} : vector<8x8xf32> to vector<8x4xf32>
    %133 = tpu.concatenate %125, %126, %127, %128, %129, %130, %131, %132 in 1 : vector<8x4xf32>, vector<8x4xf32>, vector<8x4xf32>, vector<8x4xf32>, vector<8x4xf32>, vector<8x4xf32>, vector<8x4xf32>, vector<8x4xf32> -> vector<8x32xf32>
    %134 = arith.truncf %133 : vector<8x32xf32> to vector<8x32xbf16>
    %135 = vector.extract_strided_slice %91 {offsets = [0, 0], sizes = [8, 4], strides = [1, 1]} : vector<8x8xf32> to vector<8x4xf32>
    %136 = vector.extract_strided_slice %98 {offsets = [0, 0], sizes = [8, 4], strides = [1, 1]} : vector<8x8xf32> to vector<8x4xf32>
    %137 = vector.extract_strided_slice %99 {offsets = [0, 0], sizes = [8, 4], strides = [1, 1]} : vector<8x8xf32> to vector<8x4xf32>
    %138 = vector.extract_strided_slice %100 {offsets = [0, 0], sizes = [8, 4], strides = [1, 1]} : vector<8x8xf32> to vector<8x4xf32>
    %139 = vector.extract_strided_slice %109 {offsets = [0, 0], sizes = [8, 4], strides = [1, 1]} : vector<8x8xf32> to vector<8x4xf32>
    %140 = vector.extract_strided_slice %110 {offsets = [0, 0], sizes = [8, 4], strides = [1, 1]} : vector<8x8xf32> to vector<8x4xf32>
    %141 = vector.extract_strided_slice %111 {offsets = [0, 0], sizes = [8, 4], strides = [1, 1]} : vector<8x8xf32> to vector<8x4xf32>
    %142 = vector.extract_strided_slice %120 {offsets = [0, 0], sizes = [8, 4], strides = [1, 1]} : vector<8x8xf32> to vector<8x4xf32>
    %143 = tpu.concatenate %135, %136, %137, %138, %139, %140, %141, %142 in 1 : vector<8x4xf32>, vector<8x4xf32>, vector<8x4xf32>, vector<8x4xf32>, vector<8x4xf32>, vector<8x4xf32>, vector<8x4xf32>, vector<8x4xf32> -> vector<8x32xf32>
    %144 = arith.truncf %143 : vector<8x32xf32> to vector<8x32xbf16>
    %cst_73 = arith.constant dense<0.000000e+00> : vector<8x8xf32>
    %145 = tpu.matmul %134, %144, %cst_73 {dimension_numbers = #tpu.dot_dimension_numbers<[1], [1], [0], [0], [0, 0, 1, 0], [], []>} : vector<8x32xbf16>, vector<8x32xbf16>, vector<8x8xf32> -> vector<8x8xf32>
    %cst_74 = arith.constant 0.176776692 : f32
    %146 = vector.broadcast %cst_74 : f32 to vector<8x8xf32>
    %147 = arith.mulf %145, %146 : vector<8x8xf32>
    %cst_75 = arith.constant dense<0xFF800000> : vector<8xf32>
    %148 = vector.multi_reduction <maximumf>, %147, %cst_75 [1] : vector<8x8xf32> to vector<8xf32>
    %149 = vector.shape_cast %148 : vector<8xf32> to vector<8x1xf32>
    %150 = vector.broadcast %149 : vector<8x1xf32> to vector<8x8xf32>
    %151 = arith.subf %147, %150 : vector<8x8xf32>
    %152 = math.exp %151 : vector<8x8xf32>
    %cst_76 = arith.constant dense<0.000000e+00> : vector<8xf32>
    %153 = vector.multi_reduction <add>, %152, %cst_76 [1] : vector<8x8xf32> to vector<8xf32>
    %154 = vector.shape_cast %153 : vector<8xf32> to vector<8x1xf32>
    %155 = vector.broadcast %154 : vector<8x1xf32> to vector<8x8xf32>
    %156 = arith.divf %152, %155 : vector<8x8xf32>
    %157 = vector.extract_strided_slice %91 {offsets = [0, 0], sizes = [8, 4], strides = [1, 1]} : vector<8x8xf32> to vector<8x4xf32>
    %158 = vector.extract_strided_slice %97 {offsets = [0, 0], sizes = [8, 4], strides = [1, 1]} : vector<8x8xf32> to vector<8x4xf32>
    %159 = vector.extract_strided_slice %98 {offsets = [0, 0], sizes = [8, 4], strides = [1, 1]} : vector<8x8xf32> to vector<8x4xf32>
    %160 = vector.extract_strided_slice %99 {offsets = [0, 0], sizes = [8, 4], strides = [1, 1]} : vector<8x8xf32> to vector<8x4xf32>
    %161 = vector.extract_strided_slice %100 {offsets = [0, 0], sizes = [8, 4], strides = [1, 1]} : vector<8x8xf32> to vector<8x4xf32>
    %162 = vector.extract_strided_slice %106 {offsets = [0, 0], sizes = [8, 4], strides = [1, 1]} : vector<8x8xf32> to vector<8x4xf32>
    %163 = vector.extract_strided_slice %107 {offsets = [0, 0], sizes = [8, 4], strides = [1, 1]} : vector<8x8xf32> to vector<8x4xf32>
    %164 = vector.extract_strided_slice %108 {offsets = [0, 0], sizes = [8, 4], strides = [1, 1]} : vector<8x8xf32> to vector<8x4xf32>
    %165 = vector.extract_strided_slice %109 {offsets = [0, 0], sizes = [8, 4], strides = [1, 1]} : vector<8x8xf32> to vector<8x4xf32>
    %166 = vector.extract_strided_slice %110 {offsets = [0, 0], sizes = [8, 4], strides = [1, 1]} : vector<8x8xf32> to vector<8x4xf32>
    %167 = vector.extract_strided_slice %111 {offsets = [0, 0], sizes = [8, 4], strides = [1, 1]} : vector<8x8xf32> to vector<8x4xf32>
    %168 = vector.extract_strided_slice %117 {offsets = [0, 0], sizes = [8, 4], strides = [1, 1]} : vector<8x8xf32> to vector<8x4xf32>
    %169 = vector.extract_strided_slice %118 {offsets = [0, 0], sizes = [8, 4], strides = [1, 1]} : vector<8x8xf32> to vector<8x4xf32>
    %170 = vector.extract_strided_slice %119 {offsets = [0, 0], sizes = [8, 4], strides = [1, 1]} : vector<8x8xf32> to vector<8x4xf32>
    %171 = vector.extract_strided_slice %120 {offsets = [0, 0], sizes = [8, 4], strides = [1, 1]} : vector<8x8xf32> to vector<8x4xf32>
    %172 = vector.extract_strided_slice %124 {offsets = [0, 0], sizes = [8, 4], strides = [1, 1]} : vector<8x8xf32> to vector<8x4xf32>
    %173 = tpu.concatenate %157, %158, %159, %160, %161, %162, %163, %164, %165, %166, %167, %168, %169, %170, %171, %172 in 1 : vector<8x4xf32>, vector<8x4xf32>, vector<8x4xf32>, vector<8x4xf32>, vector<8x4xf32>, vector<8x4xf32>, vector<8x4xf32>, vector<8x4xf32>, vector<8x4xf32>, vector<8x4xf32>, vector<8x4xf32>, vector<8x4xf32>, vector<8x4xf32>, vector<8x4xf32>, vector<8x4xf32>, vector<8x4xf32> -> vector<8x64xf32>
    %174 = arith.truncf %173 : vector<8x64xf32> to vector<8x64xbf16>
    %175 = arith.truncf %156 : vector<8x8xf32> to vector<8x8xbf16>
    %cst_77 = arith.constant dense<0.000000e+00> : vector<8x64xf32>
    %176 = tpu.matmul %175, %174, %cst_77 {dimension_numbers = #tpu.dot_dimension_numbers<[1], [0], [0], [1], [0, 0, 1, 1], [], []>} : vector<8x8xbf16>, vector<8x64xbf16>, vector<8x64xf32> -> vector<8x64xf32>
    %177 = vector.extract_strided_slice %176 {offsets = [0, 0], sizes = [8, 4], strides = [1, 1]} : vector<8x64xf32> to vector<8x4xf32>
    %178 = vector.extract_strided_slice %176 {offsets = [0, 4], sizes = [8, 4], strides = [1, 1]} : vector<8x64xf32> to vector<8x4xf32>
    %179 = vector.extract_strided_slice %176 {offsets = [0, 8], sizes = [8, 4], strides = [1, 1]} : vector<8x64xf32> to vector<8x4xf32>
    %180 = vector.extract_strided_slice %176 {offsets = [0, 12], sizes = [8, 4], strides = [1, 1]} : vector<8x64xf32> to vector<8x4xf32>
    %181 = vector.extract_strided_slice %176 {offsets = [0, 16], sizes = [8, 4], strides = [1, 1]} : vector<8x64xf32> to vector<8x4xf32>
    %182 = vector.extract_strided_slice %176 {offsets = [0, 20], sizes = [8, 4], strides = [1, 1]} : vector<8x64xf32> to vector<8x4xf32>
    %183 = vector.extract_strided_slice %176 {offsets = [0, 24], sizes = [8, 4], strides = [1, 1]} : vector<8x64xf32> to vector<8x4xf32>
    %184 = vector.extract_strided_slice %176 {offsets = [0, 28], sizes = [8, 4], strides = [1, 1]} : vector<8x64xf32> to vector<8x4xf32>
    %185 = vector.extract_strided_slice %176 {offsets = [0, 32], sizes = [8, 4], strides = [1, 1]} : vector<8x64xf32> to vector<8x4xf32>
    %186 = vector.extract_strided_slice %176 {offsets = [0, 36], sizes = [8, 4], strides = [1, 1]} : vector<8x64xf32> to vector<8x4xf32>
    %187 = vector.extract_strided_slice %176 {offsets = [0, 40], sizes = [8, 4], strides = [1, 1]} : vector<8x64xf32> to vector<8x4xf32>
    %188 = vector.extract_strided_slice %176 {offsets = [0, 44], sizes = [8, 4], strides = [1, 1]} : vector<8x64xf32> to vector<8x4xf32>
    %189 = vector.extract_strided_slice %176 {offsets = [0, 48], sizes = [8, 4], strides = [1, 1]} : vector<8x64xf32> to vector<8x4xf32>
    %190 = vector.extract_strided_slice %176 {offsets = [0, 52], sizes = [8, 4], strides = [1, 1]} : vector<8x64xf32> to vector<8x4xf32>
    %191 = vector.extract_strided_slice %176 {offsets = [0, 56], sizes = [8, 4], strides = [1, 1]} : vector<8x64xf32> to vector<8x4xf32>
    %192 = vector.extract_strided_slice %176 {offsets = [0, 60], sizes = [8, 4], strides = [1, 1]} : vector<8x64xf32> to vector<8x4xf32>
    %193 = vector.extract_strided_slice %91 {offsets = [0, 4], sizes = [8, 4], strides = [1, 1]} : vector<8x8xf32> to vector<8x4xf32>
    %194 = vector.extract_strided_slice %98 {offsets = [0, 4], sizes = [8, 4], strides = [1, 1]} : vector<8x8xf32> to vector<8x4xf32>
    %195 = vector.extract_strided_slice %99 {offsets = [0, 4], sizes = [8, 4], strides = [1, 1]} : vector<8x8xf32> to vector<8x4xf32>
    %196 = vector.extract_strided_slice %100 {offsets = [0, 4], sizes = [8, 4], strides = [1, 1]} : vector<8x8xf32> to vector<8x4xf32>
    %197 = vector.extract_strided_slice %109 {offsets = [0, 4], sizes = [8, 4], strides = [1, 1]} : vector<8x8xf32> to vector<8x4xf32>
    %198 = vector.extract_strided_slice %110 {offsets = [0, 4], sizes = [8, 4], strides = [1, 1]} : vector<8x8xf32> to vector<8x4xf32>
    %199 = vector.extract_strided_slice %111 {offsets = [0, 4], sizes = [8, 4], strides = [1, 1]} : vector<8x8xf32> to vector<8x4xf32>
    %200 = vector.extract_strided_slice %120 {offsets = [0, 4], sizes = [8, 4], strides = [1, 1]} : vector<8x8xf32> to vector<8x4xf32>
    %201 = tpu.concatenate %193, %194, %195, %196, %197, %198, %199, %200 in 1 : vector<8x4xf32>, vector<8x4xf32>, vector<8x4xf32>, vector<8x4xf32>, vector<8x4xf32>, vector<8x4xf32>, vector<8x4xf32>, vector<8x4xf32> -> vector<8x32xf32>
    %202 = arith.truncf %201 : vector<8x32xf32> to vector<8x32xbf16>
    %203 = vector.extract_strided_slice %91 {offsets = [0, 4], sizes = [8, 4], strides = [1, 1]} : vector<8x8xf32> to vector<8x4xf32>
    %204 = vector.extract_strided_slice %98 {offsets = [0, 4], sizes = [8, 4], strides = [1, 1]} : vector<8x8xf32> to vector<8x4xf32>
    %205 = vector.extract_strided_slice %99 {offsets = [0, 4], sizes = [8, 4], strides = [1, 1]} : vector<8x8xf32> to vector<8x4xf32>
    %206 = vector.extract_strided_slice %100 {offsets = [0, 4], sizes = [8, 4], strides = [1, 1]} : vector<8x8xf32> to vector<8x4xf32>
    %207 = vector.extract_strided_slice %109 {offsets = [0, 4], sizes = [8, 4], strides = [1, 1]} : vector<8x8xf32> to vector<8x4xf32>
    %208 = vector.extract_strided_slice %110 {offsets = [0, 4], sizes = [8, 4], strides = [1, 1]} : vector<8x8xf32> to vector<8x4xf32>
    %209 = vector.extract_strided_slice %111 {offsets = [0, 4], sizes = [8, 4], strides = [1, 1]} : vector<8x8xf32> to vector<8x4xf32>
    %210 = vector.extract_strided_slice %120 {offsets = [0, 4], sizes = [8, 4], strides = [1, 1]} : vector<8x8xf32> to vector<8x4xf32>
    %211 = tpu.concatenate %203, %204, %205, %206, %207, %208, %209, %210 in 1 : vector<8x4xf32>, vector<8x4xf32>, vector<8x4xf32>, vector<8x4xf32>, vector<8x4xf32>, vector<8x4xf32>, vector<8x4xf32>, vector<8x4xf32> -> vector<8x32xf32>
    %212 = arith.truncf %211 : vector<8x32xf32> to vector<8x32xbf16>
    %cst_78 = arith.constant dense<0.000000e+00> : vector<8x8xf32>
    %213 = tpu.matmul %202, %212, %cst_78 {dimension_numbers = #tpu.dot_dimension_numbers<[1], [1], [0], [0], [0, 0, 1, 0], [], []>} : vector<8x32xbf16>, vector<8x32xbf16>, vector<8x8xf32> -> vector<8x8xf32>
    %cst_79 = arith.constant 0.176776692 : f32
    %214 = vector.broadcast %cst_79 : f32 to vector<8x8xf32>
    %215 = arith.mulf %213, %214 : vector<8x8xf32>
    %cst_80 = arith.constant dense<0xFF800000> : vector<8xf32>
    %216 = vector.multi_reduction <maximumf>, %215, %cst_80 [1] : vector<8x8xf32> to vector<8xf32>
    %217 = vector.shape_cast %216 : vector<8xf32> to vector<8x1xf32>
    %218 = vector.broadcast %217 : vector<8x1xf32> to vector<8x8xf32>
    %219 = arith.subf %215, %218 : vector<8x8xf32>
    %220 = math.exp %219 : vector<8x8xf32>
    %cst_81 = arith.constant dense<0.000000e+00> : vector<8xf32>
    %221 = vector.multi_reduction <add>, %220, %cst_81 [1] : vector<8x8xf32> to vector<8xf32>
    %222 = vector.shape_cast %221 : vector<8xf32> to vector<8x1xf32>
    %223 = vector.broadcast %222 : vector<8x1xf32> to vector<8x8xf32>
    %224 = arith.divf %220, %223 : vector<8x8xf32>
    %225 = vector.extract_strided_slice %91 {offsets = [0, 4], sizes = [8, 4], strides = [1, 1]} : vector<8x8xf32> to vector<8x4xf32>
    %226 = vector.extract_strided_slice %97 {offsets = [0, 4], sizes = [8, 4], strides = [1, 1]} : vector<8x8xf32> to vector<8x4xf32>
    %227 = vector.extract_strided_slice %98 {offsets = [0, 4], sizes = [8, 4], strides = [1, 1]} : vector<8x8xf32> to vector<8x4xf32>
    %228 = vector.extract_strided_slice %99 {offsets = [0, 4], sizes = [8, 4], strides = [1, 1]} : vector<8x8xf32> to vector<8x4xf32>
    %229 = vector.extract_strided_slice %100 {offsets = [0, 4], sizes = [8, 4], strides = [1, 1]} : vector<8x8xf32> to vector<8x4xf32>
    %230 = vector.extract_strided_slice %106 {offsets = [0, 4], sizes = [8, 4], strides = [1, 1]} : vector<8x8xf32> to vector<8x4xf32>
    %231 = vector.extract_strided_slice %107 {offsets = [0, 4], sizes = [8, 4], strides = [1, 1]} : vector<8x8xf32> to vector<8x4xf32>
    %232 = vector.extract_strided_slice %108 {offsets = [0, 4], sizes = [8, 4], strides = [1, 1]} : vector<8x8xf32> to vector<8x4xf32>
    %233 = vector.extract_strided_slice %109 {offsets = [0, 4], sizes = [8, 4], strides = [1, 1]} : vector<8x8xf32> to vector<8x4xf32>
    %234 = vector.extract_strided_slice %110 {offsets = [0, 4], sizes = [8, 4], strides = [1, 1]} : vector<8x8xf32> to vector<8x4xf32>
    %235 = vector.extract_strided_slice %111 {offsets = [0, 4], sizes = [8, 4], strides = [1, 1]} : vector<8x8xf32> to vector<8x4xf32>
    %236 = vector.extract_strided_slice %117 {offsets = [0, 4], sizes = [8, 4], strides = [1, 1]} : vector<8x8xf32> to vector<8x4xf32>
    %237 = vector.extract_strided_slice %118 {offsets = [0, 4], sizes = [8, 4], strides = [1, 1]} : vector<8x8xf32> to vector<8x4xf32>
    %238 = vector.extract_strided_slice %119 {offsets = [0, 4], sizes = [8, 4], strides = [1, 1]} : vector<8x8xf32> to vector<8x4xf32>
    %239 = vector.extract_strided_slice %120 {offsets = [0, 4], sizes = [8, 4], strides = [1, 1]} : vector<8x8xf32> to vector<8x4xf32>
    %240 = vector.extract_strided_slice %124 {offsets = [0, 4], sizes = [8, 4], strides = [1, 1]} : vector<8x8xf32> to vector<8x4xf32>
    %241 = tpu.concatenate %225, %226, %227, %228, %229, %230, %231, %232, %233, %234, %235, %236, %237, %238, %239, %240 in 1 : vector<8x4xf32>, vector<8x4xf32>, vector<8x4xf32>, vector<8x4xf32>, vector<8x4xf32>, vector<8x4xf32>, vector<8x4xf32>, vector<8x4xf32>, vector<8x4xf32>, vector<8x4xf32>, vector<8x4xf32>, vector<8x4xf32>, vector<8x4xf32>, vector<8x4xf32>, vector<8x4xf32>, vector<8x4xf32> -> vector<8x64xf32>
    %242 = arith.truncf %241 : vector<8x64xf32> to vector<8x64xbf16>
    %243 = arith.truncf %224 : vector<8x8xf32> to vector<8x8xbf16>
    %cst_82 = arith.constant dense<0.000000e+00> : vector<8x64xf32>
    %244 = tpu.matmul %243, %242, %cst_82 {dimension_numbers = #tpu.dot_dimension_numbers<[1], [0], [0], [1], [0, 0, 1, 1], [], []>} : vector<8x8xbf16>, vector<8x64xbf16>, vector<8x64xf32> -> vector<8x64xf32>
    %245 = vector.extract_strided_slice %244 {offsets = [0, 0], sizes = [8, 4], strides = [1, 1]} : vector<8x64xf32> to vector<8x4xf32>
    %246 = vector.extract_strided_slice %244 {offsets = [0, 4], sizes = [8, 4], strides = [1, 1]} : vector<8x64xf32> to vector<8x4xf32>
    %247 = vector.extract_strided_slice %244 {offsets = [0, 8], sizes = [8, 4], strides = [1, 1]} : vector<8x64xf32> to vector<8x4xf32>
    %248 = vector.extract_strided_slice %244 {offsets = [0, 12], sizes = [8, 4], strides = [1, 1]} : vector<8x64xf32> to vector<8x4xf32>
    %249 = vector.extract_strided_slice %244 {offsets = [0, 16], sizes = [8, 4], strides = [1, 1]} : vector<8x64xf32> to vector<8x4xf32>
    %250 = vector.extract_strided_slice %244 {offsets = [0, 20], sizes = [8, 4], strides = [1, 1]} : vector<8x64xf32> to vector<8x4xf32>
    %251 = vector.extract_strided_slice %244 {offsets = [0, 24], sizes = [8, 4], strides = [1, 1]} : vector<8x64xf32> to vector<8x4xf32>
    %252 = vector.extract_strided_slice %244 {offsets = [0, 28], sizes = [8, 4], strides = [1, 1]} : vector<8x64xf32> to vector<8x4xf32>
    %253 = vector.extract_strided_slice %244 {offsets = [0, 32], sizes = [8, 4], strides = [1, 1]} : vector<8x64xf32> to vector<8x4xf32>
    %254 = vector.extract_strided_slice %244 {offsets = [0, 36], sizes = [8, 4], strides = [1, 1]} : vector<8x64xf32> to vector<8x4xf32>
    %255 = vector.extract_strided_slice %244 {offsets = [0, 40], sizes = [8, 4], strides = [1, 1]} : vector<8x64xf32> to vector<8x4xf32>
    %256 = vector.extract_strided_slice %244 {offsets = [0, 44], sizes = [8, 4], strides = [1, 1]} : vector<8x64xf32> to vector<8x4xf32>
    %257 = vector.extract_strided_slice %244 {offsets = [0, 48], sizes = [8, 4], strides = [1, 1]} : vector<8x64xf32> to vector<8x4xf32>
    %258 = vector.extract_strided_slice %244 {offsets = [0, 52], sizes = [8, 4], strides = [1, 1]} : vector<8x64xf32> to vector<8x4xf32>
    %259 = vector.extract_strided_slice %244 {offsets = [0, 56], sizes = [8, 4], strides = [1, 1]} : vector<8x64xf32> to vector<8x4xf32>
    %260 = vector.extract_strided_slice %244 {offsets = [0, 60], sizes = [8, 4], strides = [1, 1]} : vector<8x64xf32> to vector<8x4xf32>
    %261 = tpu.concatenate %177, %245 in 1 : vector<8x4xf32>, vector<8x4xf32> -> vector<8x8xf32>
    %262 = tpu.concatenate %178, %246 in 1 : vector<8x4xf32>, vector<8x4xf32> -> vector<8x8xf32>
    %263 = tpu.concatenate %179, %247 in 1 : vector<8x4xf32>, vector<8x4xf32> -> vector<8x8xf32>
    %264 = tpu.concatenate %180, %248 in 1 : vector<8x4xf32>, vector<8x4xf32> -> vector<8x8xf32>
    %265 = tpu.concatenate %181, %249 in 1 : vector<8x4xf32>, vector<8x4xf32> -> vector<8x8xf32>
    %266 = tpu.concatenate %182, %250 in 1 : vector<8x4xf32>, vector<8x4xf32> -> vector<8x8xf32>
    %267 = tpu.concatenate %183, %251 in 1 : vector<8x4xf32>, vector<8x4xf32> -> vector<8x8xf32>
    %268 = tpu.concatenate %184, %252 in 1 : vector<8x4xf32>, vector<8x4xf32> -> vector<8x8xf32>
    %269 = tpu.concatenate %185, %253 in 1 : vector<8x4xf32>, vector<8x4xf32> -> vector<8x8xf32>
    %270 = tpu.concatenate %186, %254 in 1 : vector<8x4xf32>, vector<8x4xf32> -> vector<8x8xf32>
    %271 = tpu.concatenate %187, %255 in 1 : vector<8x4xf32>, vector<8x4xf32> -> vector<8x8xf32>
    %272 = tpu.concatenate %188, %256 in 1 : vector<8x4xf32>, vector<8x4xf32> -> vector<8x8xf32>
    %273 = tpu.concatenate %189, %257 in 1 : vector<8x4xf32>, vector<8x4xf32> -> vector<8x8xf32>
    %274 = tpu.concatenate %190, %258 in 1 : vector<8x4xf32>, vector<8x4xf32> -> vector<8x8xf32>
    %275 = tpu.concatenate %191, %259 in 1 : vector<8x4xf32>, vector<8x4xf32> -> vector<8x8xf32>
    %276 = tpu.concatenate %192, %260 in 1 : vector<8x4xf32>, vector<8x4xf32> -> vector<8x8xf32>
    %277 = arith.truncf %261 : vector<8x8xf32> to vector<8x8xbf16>
    %c0_83 = arith.constant 0 : index
    %c0_84 = arith.constant 0 : index
    %c0_85 = arith.constant 0 : index
    %278 = vector.load %arg4[%c0_83, %c0_84, %c0_85] : memref<5x8x8xbf16, #tpu.memory_space<vmem>>, vector<1x8x8xbf16>
    %279 = vector.shape_cast %278 : vector<1x8x8xbf16> to vector<8x8xbf16>
    %cst_86 = arith.constant dense<0.000000e+00> : vector<8x8xf32>
    %280 = tpu.matmul %277, %279, %cst_86 {dimension_numbers = #tpu.dot_dimension_numbers<[1], [0], [0], [1], [0, 0, 1, 1], [], []>} : vector<8x8xbf16>, vector<8x8xbf16>, vector<8x8xf32> -> vector<8x8xf32>
    %281 = tpu.concatenate %262, %263, %264, %265 in 0 : vector<8x8xf32>, vector<8x8xf32>, vector<8x8xf32>, vector<8x8xf32> -> vector<32x8xf32>
    %282 = arith.truncf %281 : vector<32x8xf32> to vector<32x8xbf16>
    %c1_87 = arith.constant 1 : index
    %c0_88 = arith.constant 0 : index
    %c0_89 = arith.constant 0 : index
    %283 = vector.load %arg4[%c1_87, %c0_88, %c0_89] : memref<5x8x8xbf16, #tpu.memory_space<vmem>>, vector<1x8x8xbf16>
    %284 = vector.shape_cast %283 : vector<1x8x8xbf16> to vector<8x8xbf16>
    %cst_90 = arith.constant dense<0.000000e+00> : vector<32x8xf32>
    %285 = tpu.matmul %282, %284, %cst_90 {dimension_numbers = #tpu.dot_dimension_numbers<[1], [0], [0], [1], [0, 0, 1, 1], [], []>} : vector<32x8xbf16>, vector<8x8xbf16>, vector<32x8xf32> -> vector<32x8xf32>
    %286 = vector.extract_strided_slice %285 {offsets = [0, 0], sizes = [8, 8], strides = [1, 1]} : vector<32x8xf32> to vector<8x8xf32>
    %287 = vector.extract_strided_slice %285 {offsets = [8, 0], sizes = [8, 8], strides = [1, 1]} : vector<32x8xf32> to vector<8x8xf32>
    %288 = vector.extract_strided_slice %285 {offsets = [16, 0], sizes = [8, 8], strides = [1, 1]} : vector<32x8xf32> to vector<8x8xf32>
    %289 = vector.extract_strided_slice %285 {offsets = [24, 0], sizes = [8, 8], strides = [1, 1]} : vector<32x8xf32> to vector<8x8xf32>
    %290 = tpu.concatenate %266, %267, %268, %269, %270, %271 in 0 : vector<8x8xf32>, vector<8x8xf32>, vector<8x8xf32>, vector<8x8xf32>, vector<8x8xf32>, vector<8x8xf32> -> vector<48x8xf32>
    %291 = arith.truncf %290 : vector<48x8xf32> to vector<48x8xbf16>
    %c2_91 = arith.constant 2 : index
    %c0_92 = arith.constant 0 : index
    %c0_93 = arith.constant 0 : index
    %292 = vector.load %arg4[%c2_91, %c0_92, %c0_93] : memref<5x8x8xbf16, #tpu.memory_space<vmem>>, vector<1x8x8xbf16>
    %293 = vector.shape_cast %292 : vector<1x8x8xbf16> to vector<8x8xbf16>
    %cst_94 = arith.constant dense<0.000000e+00> : vector<48x8xf32>
    %294 = tpu.matmul %291, %293, %cst_94 {dimension_numbers = #tpu.dot_dimension_numbers<[1], [0], [0], [1], [0, 0, 1, 1], [], []>} : vector<48x8xbf16>, vector<8x8xbf16>, vector<48x8xf32> -> vector<48x8xf32>
    %295 = vector.extract_strided_slice %294 {offsets = [0, 0], sizes = [8, 8], strides = [1, 1]} : vector<48x8xf32> to vector<8x8xf32>
    %296 = vector.extract_strided_slice %294 {offsets = [8, 0], sizes = [8, 8], strides = [1, 1]} : vector<48x8xf32> to vector<8x8xf32>
    %297 = vector.extract_strided_slice %294 {offsets = [16, 0], sizes = [8, 8], strides = [1, 1]} : vector<48x8xf32> to vector<8x8xf32>
    %298 = vector.extract_strided_slice %294 {offsets = [24, 0], sizes = [8, 8], strides = [1, 1]} : vector<48x8xf32> to vector<8x8xf32>
    %299 = vector.extract_strided_slice %294 {offsets = [32, 0], sizes = [8, 8], strides = [1, 1]} : vector<48x8xf32> to vector<8x8xf32>
    %300 = vector.extract_strided_slice %294 {offsets = [40, 0], sizes = [8, 8], strides = [1, 1]} : vector<48x8xf32> to vector<8x8xf32>
    %301 = tpu.concatenate %272, %273, %274, %275 in 0 : vector<8x8xf32>, vector<8x8xf32>, vector<8x8xf32>, vector<8x8xf32> -> vector<32x8xf32>
    %302 = arith.truncf %301 : vector<32x8xf32> to vector<32x8xbf16>
    %c3_95 = arith.constant 3 : index
    %c0_96 = arith.constant 0 : index
    %c0_97 = arith.constant 0 : index
    %303 = vector.load %arg4[%c3_95, %c0_96, %c0_97] : memref<5x8x8xbf16, #tpu.memory_space<vmem>>, vector<1x8x8xbf16>
    %304 = vector.shape_cast %303 : vector<1x8x8xbf16> to vector<8x8xbf16>
    %cst_98 = arith.constant dense<0.000000e+00> : vector<32x8xf32>
    %305 = tpu.matmul %302, %304, %cst_98 {dimension_numbers = #tpu.dot_dimension_numbers<[1], [0], [0], [1], [0, 0, 1, 1], [], []>} : vector<32x8xbf16>, vector<8x8xbf16>, vector<32x8xf32> -> vector<32x8xf32>
    %306 = vector.extract_strided_slice %305 {offsets = [0, 0], sizes = [8, 8], strides = [1, 1]} : vector<32x8xf32> to vector<8x8xf32>
    %307 = vector.extract_strided_slice %305 {offsets = [8, 0], sizes = [8, 8], strides = [1, 1]} : vector<32x8xf32> to vector<8x8xf32>
    %308 = vector.extract_strided_slice %305 {offsets = [16, 0], sizes = [8, 8], strides = [1, 1]} : vector<32x8xf32> to vector<8x8xf32>
    %309 = vector.extract_strided_slice %305 {offsets = [24, 0], sizes = [8, 8], strides = [1, 1]} : vector<32x8xf32> to vector<8x8xf32>
    %310 = arith.truncf %276 : vector<8x8xf32> to vector<8x8xbf16>
    %c4_99 = arith.constant 4 : index
    %c0_100 = arith.constant 0 : index
    %c0_101 = arith.constant 0 : index
    %311 = vector.load %arg4[%c4_99, %c0_100, %c0_101] : memref<5x8x8xbf16, #tpu.memory_space<vmem>>, vector<1x8x8xbf16>
    %312 = vector.shape_cast %311 : vector<1x8x8xbf16> to vector<8x8xbf16>
    %cst_102 = arith.constant dense<0.000000e+00> : vector<8x8xf32>
    %313 = tpu.matmul %310, %312, %cst_102 {dimension_numbers = #tpu.dot_dimension_numbers<[1], [0], [0], [1], [0, 0, 1, 1], [], []>} : vector<8x8xbf16>, vector<8x8xbf16>, vector<8x8xf32> -> vector<8x8xf32>
    %314 = arith.addf %1, %280 : vector<8x8xf32>
    %315 = arith.addf %3, %286 : vector<8x8xf32>
    %316 = arith.addf %5, %287 : vector<8x8xf32>
    %317 = arith.addf %7, %288 : vector<8x8xf32>
    %318 = arith.addf %9, %289 : vector<8x8xf32>
    %319 = arith.addf %11, %295 : vector<8x8xf32>
    %320 = arith.addf %13, %296 : vector<8x8xf32>
    %321 = arith.addf %15, %297 : vector<8x8xf32>
    %322 = arith.addf %17, %298 : vector<8x8xf32>
    %323 = arith.addf %19, %299 : vector<8x8xf32>
    %324 = arith.addf %21, %300 : vector<8x8xf32>
    %325 = arith.addf %23, %306 : vector<8x8xf32>
    %326 = arith.addf %25, %307 : vector<8x8xf32>
    %327 = arith.addf %27, %308 : vector<8x8xf32>
    %328 = arith.addf %29, %309 : vector<8x8xf32>
    %329 = arith.addf %31, %313 : vector<8x8xf32>
    %330 = arith.mulf %314, %314 : vector<8x8xf32>
    %331 = arith.mulf %316, %316 : vector<8x8xf32>
    %332 = arith.addf %330, %331 : vector<8x8xf32>
    %333 = arith.mulf %317, %317 : vector<8x8xf32>
    %334 = arith.addf %332, %333 : vector<8x8xf32>
    %335 = arith.mulf %318, %318 : vector<8x8xf32>
    %336 = arith.addf %334, %335 : vector<8x8xf32>
    %337 = arith.mulf %322, %322 : vector<8x8xf32>
    %338 = arith.addf %336, %337 : vector<8x8xf32>
    %339 = arith.mulf %323, %323 : vector<8x8xf32>
    %340 = arith.addf %338, %339 : vector<8x8xf32>
    %341 = arith.mulf %324, %324 : vector<8x8xf32>
    %342 = arith.addf %340, %341 : vector<8x8xf32>
    %343 = arith.mulf %328, %328 : vector<8x8xf32>
    %344 = arith.addf %342, %343 : vector<8x8xf32>
    %cst_103 = arith.constant dense<0.000000e+00> : vector<8xf32>
    %345 = vector.multi_reduction <add>, %344, %cst_103 [1] : vector<8x8xf32> to vector<8xf32>
    %346 = vector.shape_cast %345 : vector<8xf32> to vector<8x1xf32>
    %cst_104 = arith.constant 8.000000e+00 : f32
    %347 = vector.broadcast %cst_104 : f32 to vector<8x1xf32>
    %348 = arith.divf %346, %347 : vector<8x1xf32>
    %cst_105 = arith.constant 9.99999997E-7 : f32
    %349 = vector.broadcast %cst_105 : f32 to vector<8x1xf32>
    %350 = arith.addf %348, %349 : vector<8x1xf32>
    %351 = math.rsqrt %350 : vector<8x1xf32>
    %352 = vector.broadcast %351 : vector<8x1xf32> to vector<8x8xf32>
    %353 = arith.mulf %314, %352 : vector<8x8xf32>
    %354 = vector.broadcast %351 : vector<8x1xf32> to vector<8x8xf32>
    %355 = arith.mulf %315, %354 : vector<8x8xf32>
    %356 = vector.broadcast %351 : vector<8x1xf32> to vector<8x8xf32>
    %357 = arith.mulf %316, %356 : vector<8x8xf32>
    %358 = vector.broadcast %351 : vector<8x1xf32> to vector<8x8xf32>
    %359 = arith.mulf %317, %358 : vector<8x8xf32>
    %360 = vector.broadcast %351 : vector<8x1xf32> to vector<8x8xf32>
    %361 = arith.mulf %318, %360 : vector<8x8xf32>
    %362 = vector.broadcast %351 : vector<8x1xf32> to vector<8x8xf32>
    %363 = arith.mulf %319, %362 : vector<8x8xf32>
    %364 = vector.broadcast %351 : vector<8x1xf32> to vector<8x8xf32>
    %365 = arith.mulf %320, %364 : vector<8x8xf32>
    %366 = vector.broadcast %351 : vector<8x1xf32> to vector<8x8xf32>
    %367 = arith.mulf %321, %366 : vector<8x8xf32>
    %368 = vector.broadcast %351 : vector<8x1xf32> to vector<8x8xf32>
    %369 = arith.mulf %322, %368 : vector<8x8xf32>
    %370 = vector.broadcast %351 : vector<8x1xf32> to vector<8x8xf32>
    %371 = arith.mulf %323, %370 : vector<8x8xf32>
    %372 = vector.broadcast %351 : vector<8x1xf32> to vector<8x8xf32>
    %373 = arith.mulf %324, %372 : vector<8x8xf32>
    %374 = vector.broadcast %351 : vector<8x1xf32> to vector<8x8xf32>
    %375 = arith.mulf %325, %374 : vector<8x8xf32>
    %376 = vector.broadcast %351 : vector<8x1xf32> to vector<8x8xf32>
    %377 = arith.mulf %326, %376 : vector<8x8xf32>
    %378 = vector.broadcast %351 : vector<8x1xf32> to vector<8x8xf32>
    %379 = arith.mulf %327, %378 : vector<8x8xf32>
    %380 = vector.broadcast %351 : vector<8x1xf32> to vector<8x8xf32>
    %381 = arith.mulf %328, %380 : vector<8x8xf32>
    %382 = vector.broadcast %351 : vector<8x1xf32> to vector<8x8xf32>
    %383 = arith.mulf %329, %382 : vector<8x8xf32>
    %384 = arith.truncf %353 : vector<8x8xf32> to vector<8x8xbf16>
    %c0_106 = arith.constant 0 : index
    %c0_107 = arith.constant 0 : index
    %c0_108 = arith.constant 0 : index
    %385 = vector.load %arg5[%c0_106, %c0_107, %c0_108] : memref<5x8x8xbf16, #tpu.memory_space<vmem>>, vector<1x8x8xbf16>
    %386 = vector.shape_cast %385 : vector<1x8x8xbf16> to vector<8x8xbf16>
    %cst_109 = arith.constant dense<0.000000e+00> : vector<8x8xf32>
    %387 = tpu.matmul %384, %386, %cst_109 {dimension_numbers = #tpu.dot_dimension_numbers<[1], [0], [0], [1], [0, 0, 1, 1], [], []>} : vector<8x8xbf16>, vector<8x8xbf16>, vector<8x8xf32> -> vector<8x8xf32>
    %388 = tpu.concatenate %355, %357, %359, %361 in 0 : vector<8x8xf32>, vector<8x8xf32>, vector<8x8xf32>, vector<8x8xf32> -> vector<32x8xf32>
    %389 = arith.truncf %388 : vector<32x8xf32> to vector<32x8xbf16>
    %c1_110 = arith.constant 1 : index
    %c0_111 = arith.constant 0 : index
    %c0_112 = arith.constant 0 : index
    %390 = vector.load %arg5[%c1_110, %c0_111, %c0_112] : memref<5x8x8xbf16, #tpu.memory_space<vmem>>, vector<1x8x8xbf16>
    %391 = vector.shape_cast %390 : vector<1x8x8xbf16> to vector<8x8xbf16>
    %cst_113 = arith.constant dense<0.000000e+00> : vector<32x8xf32>
    %392 = tpu.matmul %389, %391, %cst_113 {dimension_numbers = #tpu.dot_dimension_numbers<[1], [0], [0], [1], [0, 0, 1, 1], [], []>} : vector<32x8xbf16>, vector<8x8xbf16>, vector<32x8xf32> -> vector<32x8xf32>
    %393 = vector.extract_strided_slice %392 {offsets = [0, 0], sizes = [8, 8], strides = [1, 1]} : vector<32x8xf32> to vector<8x8xf32>
    %394 = vector.extract_strided_slice %392 {offsets = [8, 0], sizes = [8, 8], strides = [1, 1]} : vector<32x8xf32> to vector<8x8xf32>
    %395 = vector.extract_strided_slice %392 {offsets = [16, 0], sizes = [8, 8], strides = [1, 1]} : vector<32x8xf32> to vector<8x8xf32>
    %396 = vector.extract_strided_slice %392 {offsets = [24, 0], sizes = [8, 8], strides = [1, 1]} : vector<32x8xf32> to vector<8x8xf32>
    %397 = tpu.concatenate %363, %365, %367, %369, %371, %373 in 0 : vector<8x8xf32>, vector<8x8xf32>, vector<8x8xf32>, vector<8x8xf32>, vector<8x8xf32>, vector<8x8xf32> -> vector<48x8xf32>
    %398 = arith.truncf %397 : vector<48x8xf32> to vector<48x8xbf16>
    %c2_114 = arith.constant 2 : index
    %c0_115 = arith.constant 0 : index
    %c0_116 = arith.constant 0 : index
    %399 = vector.load %arg5[%c2_114, %c0_115, %c0_116] : memref<5x8x8xbf16, #tpu.memory_space<vmem>>, vector<1x8x8xbf16>
    %400 = vector.shape_cast %399 : vector<1x8x8xbf16> to vector<8x8xbf16>
    %cst_117 = arith.constant dense<0.000000e+00> : vector<48x8xf32>
    %401 = tpu.matmul %398, %400, %cst_117 {dimension_numbers = #tpu.dot_dimension_numbers<[1], [0], [0], [1], [0, 0, 1, 1], [], []>} : vector<48x8xbf16>, vector<8x8xbf16>, vector<48x8xf32> -> vector<48x8xf32>
    %402 = vector.extract_strided_slice %401 {offsets = [0, 0], sizes = [8, 8], strides = [1, 1]} : vector<48x8xf32> to vector<8x8xf32>
    %403 = vector.extract_strided_slice %401 {offsets = [8, 0], sizes = [8, 8], strides = [1, 1]} : vector<48x8xf32> to vector<8x8xf32>
    %404 = vector.extract_strided_slice %401 {offsets = [16, 0], sizes = [8, 8], strides = [1, 1]} : vector<48x8xf32> to vector<8x8xf32>
    %405 = vector.extract_strided_slice %401 {offsets = [24, 0], sizes = [8, 8], strides = [1, 1]} : vector<48x8xf32> to vector<8x8xf32>
    %406 = vector.extract_strided_slice %401 {offsets = [32, 0], sizes = [8, 8], strides = [1, 1]} : vector<48x8xf32> to vector<8x8xf32>
    %407 = vector.extract_strided_slice %401 {offsets = [40, 0], sizes = [8, 8], strides = [1, 1]} : vector<48x8xf32> to vector<8x8xf32>
    %408 = tpu.concatenate %375, %377, %379, %381 in 0 : vector<8x8xf32>, vector<8x8xf32>, vector<8x8xf32>, vector<8x8xf32> -> vector<32x8xf32>
    %409 = arith.truncf %408 : vector<32x8xf32> to vector<32x8xbf16>
    %c3_118 = arith.constant 3 : index
    %c0_119 = arith.constant 0 : index
    %c0_120 = arith.constant 0 : index
    %410 = vector.load %arg5[%c3_118, %c0_119, %c0_120] : memref<5x8x8xbf16, #tpu.memory_space<vmem>>, vector<1x8x8xbf16>
    %411 = vector.shape_cast %410 : vector<1x8x8xbf16> to vector<8x8xbf16>
    %cst_121 = arith.constant dense<0.000000e+00> : vector<32x8xf32>
    %412 = tpu.matmul %409, %411, %cst_121 {dimension_numbers = #tpu.dot_dimension_numbers<[1], [0], [0], [1], [0, 0, 1, 1], [], []>} : vector<32x8xbf16>, vector<8x8xbf16>, vector<32x8xf32> -> vector<32x8xf32>
    %413 = vector.extract_strided_slice %412 {offsets = [0, 0], sizes = [8, 8], strides = [1, 1]} : vector<32x8xf32> to vector<8x8xf32>
    %414 = vector.extract_strided_slice %412 {offsets = [8, 0], sizes = [8, 8], strides = [1, 1]} : vector<32x8xf32> to vector<8x8xf32>
    %415 = vector.extract_strided_slice %412 {offsets = [16, 0], sizes = [8, 8], strides = [1, 1]} : vector<32x8xf32> to vector<8x8xf32>
    %416 = vector.extract_strided_slice %412 {offsets = [24, 0], sizes = [8, 8], strides = [1, 1]} : vector<32x8xf32> to vector<8x8xf32>
    %417 = arith.truncf %383 : vector<8x8xf32> to vector<8x8xbf16>
    %c4_122 = arith.constant 4 : index
    %c0_123 = arith.constant 0 : index
    %c0_124 = arith.constant 0 : index
    %418 = vector.load %arg5[%c4_122, %c0_123, %c0_124] : memref<5x8x8xbf16, #tpu.memory_space<vmem>>, vector<1x8x8xbf16>
    %419 = vector.shape_cast %418 : vector<1x8x8xbf16> to vector<8x8xbf16>
    %cst_125 = arith.constant dense<0.000000e+00> : vector<8x8xf32>
    %420 = tpu.matmul %417, %419, %cst_125 {dimension_numbers = #tpu.dot_dimension_numbers<[1], [0], [0], [1], [0, 0, 1, 1], [], []>} : vector<8x8xbf16>, vector<8x8xbf16>, vector<8x8xf32> -> vector<8x8xf32>
    %421 = arith.truncf %387 : vector<8x8xf32> to vector<8x8xbf16>
    %c0_126 = arith.constant 0 : index
    %c0_127 = arith.constant 0 : index
    %c0_128 = arith.constant 0 : index
    %422 = vector.load %arg6[%c0_126, %c0_127, %c0_128] : memref<5x8x16xbf16, #tpu.memory_space<vmem>>, vector<1x8x16xbf16>
    %423 = vector.shape_cast %422 : vector<1x8x16xbf16> to vector<8x16xbf16>
    %cst_129 = arith.constant dense<0.000000e+00> : vector<8x16xf32>
    %424 = tpu.matmul %421, %423, %cst_129 {dimension_numbers = #tpu.dot_dimension_numbers<[1], [0], [0], [1], [0, 0, 1, 1], [], []>} : vector<8x8xbf16>, vector<8x16xbf16>, vector<8x16xf32> -> vector<8x16xf32>
    %425 = tpu.concatenate %393, %394, %395, %396 in 0 : vector<8x8xf32>, vector<8x8xf32>, vector<8x8xf32>, vector<8x8xf32> -> vector<32x8xf32>
    %426 = arith.truncf %425 : vector<32x8xf32> to vector<32x8xbf16>
    %c1_130 = arith.constant 1 : index
    %c0_131 = arith.constant 0 : index
    %c0_132 = arith.constant 0 : index
    %427 = vector.load %arg6[%c1_130, %c0_131, %c0_132] : memref<5x8x16xbf16, #tpu.memory_space<vmem>>, vector<1x8x16xbf16>
    %428 = vector.shape_cast %427 : vector<1x8x16xbf16> to vector<8x16xbf16>
    %cst_133 = arith.constant dense<0.000000e+00> : vector<32x16xf32>
    %429 = tpu.matmul %426, %428, %cst_133 {dimension_numbers = #tpu.dot_dimension_numbers<[1], [0], [0], [1], [0, 0, 1, 1], [], []>} : vector<32x8xbf16>, vector<8x16xbf16>, vector<32x16xf32> -> vector<32x16xf32>
    %430 = vector.extract_strided_slice %429 {offsets = [0, 0], sizes = [8, 16], strides = [1, 1]} : vector<32x16xf32> to vector<8x16xf32>
    %431 = vector.extract_strided_slice %429 {offsets = [8, 0], sizes = [8, 16], strides = [1, 1]} : vector<32x16xf32> to vector<8x16xf32>
    %432 = vector.extract_strided_slice %429 {offsets = [16, 0], sizes = [8, 16], strides = [1, 1]} : vector<32x16xf32> to vector<8x16xf32>
    %433 = vector.extract_strided_slice %429 {offsets = [24, 0], sizes = [8, 16], strides = [1, 1]} : vector<32x16xf32> to vector<8x16xf32>
    %434 = tpu.concatenate %402, %403, %404, %405, %406, %407 in 0 : vector<8x8xf32>, vector<8x8xf32>, vector<8x8xf32>, vector<8x8xf32>, vector<8x8xf32>, vector<8x8xf32> -> vector<48x8xf32>
    %435 = arith.truncf %434 : vector<48x8xf32> to vector<48x8xbf16>
    %c2_134 = arith.constant 2 : index
    %c0_135 = arith.constant 0 : index
    %c0_136 = arith.constant 0 : index
    %436 = vector.load %arg6[%c2_134, %c0_135, %c0_136] : memref<5x8x16xbf16, #tpu.memory_space<vmem>>, vector<1x8x16xbf16>
    %437 = vector.shape_cast %436 : vector<1x8x16xbf16> to vector<8x16xbf16>
    %cst_137 = arith.constant dense<0.000000e+00> : vector<48x16xf32>
    %438 = tpu.matmul %435, %437, %cst_137 {dimension_numbers = #tpu.dot_dimension_numbers<[1], [0], [0], [1], [0, 0, 1, 1], [], []>} : vector<48x8xbf16>, vector<8x16xbf16>, vector<48x16xf32> -> vector<48x16xf32>
    %439 = vector.extract_strided_slice %438 {offsets = [0, 0], sizes = [8, 16], strides = [1, 1]} : vector<48x16xf32> to vector<8x16xf32>
    %440 = vector.extract_strided_slice %438 {offsets = [8, 0], sizes = [8, 16], strides = [1, 1]} : vector<48x16xf32> to vector<8x16xf32>
    %441 = vector.extract_strided_slice %438 {offsets = [16, 0], sizes = [8, 16], strides = [1, 1]} : vector<48x16xf32> to vector<8x16xf32>
    %442 = vector.extract_strided_slice %438 {offsets = [24, 0], sizes = [8, 16], strides = [1, 1]} : vector<48x16xf32> to vector<8x16xf32>
    %443 = vector.extract_strided_slice %438 {offsets = [32, 0], sizes = [8, 16], strides = [1, 1]} : vector<48x16xf32> to vector<8x16xf32>
    %444 = vector.extract_strided_slice %438 {offsets = [40, 0], sizes = [8, 16], strides = [1, 1]} : vector<48x16xf32> to vector<8x16xf32>
    %445 = tpu.concatenate %413, %414, %415, %416 in 0 : vector<8x8xf32>, vector<8x8xf32>, vector<8x8xf32>, vector<8x8xf32> -> vector<32x8xf32>
    %446 = arith.truncf %445 : vector<32x8xf32> to vector<32x8xbf16>
    %c3_138 = arith.constant 3 : index
    %c0_139 = arith.constant 0 : index
    %c0_140 = arith.constant 0 : index
    %447 = vector.load %arg6[%c3_138, %c0_139, %c0_140] : memref<5x8x16xbf16, #tpu.memory_space<vmem>>, vector<1x8x16xbf16>
    %448 = vector.shape_cast %447 : vector<1x8x16xbf16> to vector<8x16xbf16>
    %cst_141 = arith.constant dense<0.000000e+00> : vector<32x16xf32>
    %449 = tpu.matmul %446, %448, %cst_141 {dimension_numbers = #tpu.dot_dimension_numbers<[1], [0], [0], [1], [0, 0, 1, 1], [], []>} : vector<32x8xbf16>, vector<8x16xbf16>, vector<32x16xf32> -> vector<32x16xf32>
    %450 = vector.extract_strided_slice %449 {offsets = [0, 0], sizes = [8, 16], strides = [1, 1]} : vector<32x16xf32> to vector<8x16xf32>
    %451 = vector.extract_strided_slice %449 {offsets = [8, 0], sizes = [8, 16], strides = [1, 1]} : vector<32x16xf32> to vector<8x16xf32>
    %452 = vector.extract_strided_slice %449 {offsets = [16, 0], sizes = [8, 16], strides = [1, 1]} : vector<32x16xf32> to vector<8x16xf32>
    %453 = vector.extract_strided_slice %449 {offsets = [24, 0], sizes = [8, 16], strides = [1, 1]} : vector<32x16xf32> to vector<8x16xf32>
    %454 = arith.truncf %420 : vector<8x8xf32> to vector<8x8xbf16>
    %c4_142 = arith.constant 4 : index
    %c0_143 = arith.constant 0 : index
    %c0_144 = arith.constant 0 : index
    %455 = vector.load %arg6[%c4_142, %c0_143, %c0_144] : memref<5x8x16xbf16, #tpu.memory_space<vmem>>, vector<1x8x16xbf16>
    %456 = vector.shape_cast %455 : vector<1x8x16xbf16> to vector<8x16xbf16>
    %cst_145 = arith.constant dense<0.000000e+00> : vector<8x16xf32>
    %457 = tpu.matmul %454, %456, %cst_145 {dimension_numbers = #tpu.dot_dimension_numbers<[1], [0], [0], [1], [0, 0, 1, 1], [], []>} : vector<8x8xbf16>, vector<8x16xbf16>, vector<8x16xf32> -> vector<8x16xf32>
    %458 = vector.extract_strided_slice %424 {offsets = [0, 0], sizes = [8, 4], strides = [1, 1]} : vector<8x16xf32> to vector<8x4xf32>
    %459 = vector.extract_strided_slice %430 {offsets = [0, 0], sizes = [8, 4], strides = [1, 1]} : vector<8x16xf32> to vector<8x4xf32>
    %460 = vector.extract_strided_slice %431 {offsets = [0, 0], sizes = [8, 4], strides = [1, 1]} : vector<8x16xf32> to vector<8x4xf32>
    %461 = vector.extract_strided_slice %432 {offsets = [0, 0], sizes = [8, 4], strides = [1, 1]} : vector<8x16xf32> to vector<8x4xf32>
    %462 = vector.extract_strided_slice %433 {offsets = [0, 0], sizes = [8, 4], strides = [1, 1]} : vector<8x16xf32> to vector<8x4xf32>
    %463 = vector.extract_strided_slice %439 {offsets = [0, 0], sizes = [8, 4], strides = [1, 1]} : vector<8x16xf32> to vector<8x4xf32>
    %464 = vector.extract_strided_slice %440 {offsets = [0, 0], sizes = [8, 4], strides = [1, 1]} : vector<8x16xf32> to vector<8x4xf32>
    %465 = vector.extract_strided_slice %441 {offsets = [0, 0], sizes = [8, 4], strides = [1, 1]} : vector<8x16xf32> to vector<8x4xf32>
    %466 = vector.extract_strided_slice %442 {offsets = [0, 0], sizes = [8, 4], strides = [1, 1]} : vector<8x16xf32> to vector<8x4xf32>
    %467 = vector.extract_strided_slice %443 {offsets = [0, 0], sizes = [8, 4], strides = [1, 1]} : vector<8x16xf32> to vector<8x4xf32>
    %468 = vector.extract_strided_slice %444 {offsets = [0, 0], sizes = [8, 4], strides = [1, 1]} : vector<8x16xf32> to vector<8x4xf32>
    %469 = vector.extract_strided_slice %450 {offsets = [0, 0], sizes = [8, 4], strides = [1, 1]} : vector<8x16xf32> to vector<8x4xf32>
    %470 = vector.extract_strided_slice %451 {offsets = [0, 0], sizes = [8, 4], strides = [1, 1]} : vector<8x16xf32> to vector<8x4xf32>
    %471 = vector.extract_strided_slice %452 {offsets = [0, 0], sizes = [8, 4], strides = [1, 1]} : vector<8x16xf32> to vector<8x4xf32>
    %472 = vector.extract_strided_slice %453 {offsets = [0, 0], sizes = [8, 4], strides = [1, 1]} : vector<8x16xf32> to vector<8x4xf32>
    %473 = vector.extract_strided_slice %457 {offsets = [0, 0], sizes = [8, 4], strides = [1, 1]} : vector<8x16xf32> to vector<8x4xf32>
    %474 = vector.extract_strided_slice %424 {offsets = [0, 4], sizes = [8, 4], strides = [1, 1]} : vector<8x16xf32> to vector<8x4xf32>
    %475 = vector.extract_strided_slice %430 {offsets = [0, 4], sizes = [8, 4], strides = [1, 1]} : vector<8x16xf32> to vector<8x4xf32>
    %476 = vector.extract_strided_slice %431 {offsets = [0, 4], sizes = [8, 4], strides = [1, 1]} : vector<8x16xf32> to vector<8x4xf32>
    %477 = vector.extract_strided_slice %432 {offsets = [0, 4], sizes = [8, 4], strides = [1, 1]} : vector<8x16xf32> to vector<8x4xf32>
    %478 = vector.extract_strided_slice %433 {offsets = [0, 4], sizes = [8, 4], strides = [1, 1]} : vector<8x16xf32> to vector<8x4xf32>
    %479 = vector.extract_strided_slice %439 {offsets = [0, 4], sizes = [8, 4], strides = [1, 1]} : vector<8x16xf32> to vector<8x4xf32>
    %480 = vector.extract_strided_slice %440 {offsets = [0, 4], sizes = [8, 4], strides = [1, 1]} : vector<8x16xf32> to vector<8x4xf32>
    %481 = vector.extract_strided_slice %441 {offsets = [0, 4], sizes = [8, 4], strides = [1, 1]} : vector<8x16xf32> to vector<8x4xf32>
    %482 = vector.extract_strided_slice %442 {offsets = [0, 4], sizes = [8, 4], strides = [1, 1]} : vector<8x16xf32> to vector<8x4xf32>
    %483 = vector.extract_strided_slice %443 {offsets = [0, 4], sizes = [8, 4], strides = [1, 1]} : vector<8x16xf32> to vector<8x4xf32>
    %484 = vector.extract_strided_slice %444 {offsets = [0, 4], sizes = [8, 4], strides = [1, 1]} : vector<8x16xf32> to vector<8x4xf32>
    %485 = vector.extract_strided_slice %450 {offsets = [0, 4], sizes = [8, 4], strides = [1, 1]} : vector<8x16xf32> to vector<8x4xf32>
    %486 = vector.extract_strided_slice %451 {offsets = [0, 4], sizes = [8, 4], strides = [1, 1]} : vector<8x16xf32> to vector<8x4xf32>
    %487 = vector.extract_strided_slice %452 {offsets = [0, 4], sizes = [8, 4], strides = [1, 1]} : vector<8x16xf32> to vector<8x4xf32>
    %488 = vector.extract_strided_slice %453 {offsets = [0, 4], sizes = [8, 4], strides = [1, 1]} : vector<8x16xf32> to vector<8x4xf32>
    %489 = vector.extract_strided_slice %457 {offsets = [0, 4], sizes = [8, 4], strides = [1, 1]} : vector<8x16xf32> to vector<8x4xf32>
    %490 = vector.extract_strided_slice %424 {offsets = [0, 8], sizes = [8, 4], strides = [1, 1]} : vector<8x16xf32> to vector<8x4xf32>
    %491 = vector.extract_strided_slice %430 {offsets = [0, 8], sizes = [8, 4], strides = [1, 1]} : vector<8x16xf32> to vector<8x4xf32>
    %492 = vector.extract_strided_slice %431 {offsets = [0, 8], sizes = [8, 4], strides = [1, 1]} : vector<8x16xf32> to vector<8x4xf32>
    %493 = vector.extract_strided_slice %432 {offsets = [0, 8], sizes = [8, 4], strides = [1, 1]} : vector<8x16xf32> to vector<8x4xf32>
    %494 = vector.extract_strided_slice %433 {offsets = [0, 8], sizes = [8, 4], strides = [1, 1]} : vector<8x16xf32> to vector<8x4xf32>
    %495 = vector.extract_strided_slice %439 {offsets = [0, 8], sizes = [8, 4], strides = [1, 1]} : vector<8x16xf32> to vector<8x4xf32>
    %496 = vector.extract_strided_slice %440 {offsets = [0, 8], sizes = [8, 4], strides = [1, 1]} : vector<8x16xf32> to vector<8x4xf32>
    %497 = vector.extract_strided_slice %441 {offsets = [0, 8], sizes = [8, 4], strides = [1, 1]} : vector<8x16xf32> to vector<8x4xf32>
    %498 = vector.extract_strided_slice %442 {offsets = [0, 8], sizes = [8, 4], strides = [1, 1]} : vector<8x16xf32> to vector<8x4xf32>
    %499 = vector.extract_strided_slice %443 {offsets = [0, 8], sizes = [8, 4], strides = [1, 1]} : vector<8x16xf32> to vector<8x4xf32>
    %500 = vector.extract_strided_slice %444 {offsets = [0, 8], sizes = [8, 4], strides = [1, 1]} : vector<8x16xf32> to vector<8x4xf32>
    %501 = vector.extract_strided_slice %450 {offsets = [0, 8], sizes = [8, 4], strides = [1, 1]} : vector<8x16xf32> to vector<8x4xf32>
    %502 = vector.extract_strided_slice %451 {offsets = [0, 8], sizes = [8, 4], strides = [1, 1]} : vector<8x16xf32> to vector<8x4xf32>
    %503 = vector.extract_strided_slice %452 {offsets = [0, 8], sizes = [8, 4], strides = [1, 1]} : vector<8x16xf32> to vector<8x4xf32>
    %504 = vector.extract_strided_slice %453 {offsets = [0, 8], sizes = [8, 4], strides = [1, 1]} : vector<8x16xf32> to vector<8x4xf32>
    %505 = vector.extract_strided_slice %457 {offsets = [0, 8], sizes = [8, 4], strides = [1, 1]} : vector<8x16xf32> to vector<8x4xf32>
    %506 = vector.extract_strided_slice %424 {offsets = [0, 12], sizes = [8, 4], strides = [1, 1]} : vector<8x16xf32> to vector<8x4xf32>
    %507 = vector.extract_strided_slice %430 {offsets = [0, 12], sizes = [8, 4], strides = [1, 1]} : vector<8x16xf32> to vector<8x4xf32>
    %508 = vector.extract_strided_slice %431 {offsets = [0, 12], sizes = [8, 4], strides = [1, 1]} : vector<8x16xf32> to vector<8x4xf32>
    %509 = vector.extract_strided_slice %432 {offsets = [0, 12], sizes = [8, 4], strides = [1, 1]} : vector<8x16xf32> to vector<8x4xf32>
    %510 = vector.extract_strided_slice %433 {offsets = [0, 12], sizes = [8, 4], strides = [1, 1]} : vector<8x16xf32> to vector<8x4xf32>
    %511 = vector.extract_strided_slice %439 {offsets = [0, 12], sizes = [8, 4], strides = [1, 1]} : vector<8x16xf32> to vector<8x4xf32>
    %512 = vector.extract_strided_slice %440 {offsets = [0, 12], sizes = [8, 4], strides = [1, 1]} : vector<8x16xf32> to vector<8x4xf32>
    %513 = vector.extract_strided_slice %441 {offsets = [0, 12], sizes = [8, 4], strides = [1, 1]} : vector<8x16xf32> to vector<8x4xf32>
    %514 = vector.extract_strided_slice %442 {offsets = [0, 12], sizes = [8, 4], strides = [1, 1]} : vector<8x16xf32> to vector<8x4xf32>
    %515 = vector.extract_strided_slice %443 {offsets = [0, 12], sizes = [8, 4], strides = [1, 1]} : vector<8x16xf32> to vector<8x4xf32>
    %516 = vector.extract_strided_slice %444 {offsets = [0, 12], sizes = [8, 4], strides = [1, 1]} : vector<8x16xf32> to vector<8x4xf32>
    %517 = vector.extract_strided_slice %450 {offsets = [0, 12], sizes = [8, 4], strides = [1, 1]} : vector<8x16xf32> to vector<8x4xf32>
    %518 = vector.extract_strided_slice %451 {offsets = [0, 12], sizes = [8, 4], strides = [1, 1]} : vector<8x16xf32> to vector<8x4xf32>
    %519 = vector.extract_strided_slice %452 {offsets = [0, 12], sizes = [8, 4], strides = [1, 1]} : vector<8x16xf32> to vector<8x4xf32>
    %520 = vector.extract_strided_slice %453 {offsets = [0, 12], sizes = [8, 4], strides = [1, 1]} : vector<8x16xf32> to vector<8x4xf32>
    %521 = vector.extract_strided_slice %457 {offsets = [0, 12], sizes = [8, 4], strides = [1, 1]} : vector<8x16xf32> to vector<8x4xf32>
    %522 = arith.mulf %458, %474 : vector<8x4xf32>
    %523 = arith.mulf %458, %475 : vector<8x4xf32>
    %524 = arith.mulf %458, %476 : vector<8x4xf32>
    %525 = arith.mulf %458, %477 : vector<8x4xf32>
    %526 = arith.mulf %458, %478 : vector<8x4xf32>
    %527 = arith.mulf %458, %479 : vector<8x4xf32>
    %528 = arith.mulf %458, %480 : vector<8x4xf32>
    %529 = arith.mulf %458, %481 : vector<8x4xf32>
    %530 = arith.mulf %458, %482 : vector<8x4xf32>
    %531 = arith.mulf %458, %483 : vector<8x4xf32>
    %532 = arith.mulf %458, %484 : vector<8x4xf32>
    %533 = arith.mulf %458, %485 : vector<8x4xf32>
    %534 = arith.mulf %458, %486 : vector<8x4xf32>
    %535 = arith.mulf %458, %487 : vector<8x4xf32>
    %536 = arith.mulf %458, %488 : vector<8x4xf32>
    %537 = arith.mulf %458, %489 : vector<8x4xf32>
    %538 = arith.mulf %459, %474 : vector<8x4xf32>
    %539 = arith.addf %523, %538 : vector<8x4xf32>
    %540 = arith.mulf %459, %476 : vector<8x4xf32>
    %541 = arith.addf %527, %540 : vector<8x4xf32>
    %542 = arith.mulf %459, %477 : vector<8x4xf32>
    %543 = arith.addf %528, %542 : vector<8x4xf32>
    %544 = arith.mulf %459, %478 : vector<8x4xf32>
    %545 = arith.addf %529, %544 : vector<8x4xf32>
    %546 = arith.mulf %459, %482 : vector<8x4xf32>
    %547 = arith.addf %533, %546 : vector<8x4xf32>
    %548 = arith.mulf %459, %483 : vector<8x4xf32>
    %549 = arith.addf %534, %548 : vector<8x4xf32>
    %550 = arith.mulf %459, %484 : vector<8x4xf32>
    %551 = arith.addf %535, %550 : vector<8x4xf32>
    %552 = arith.mulf %459, %488 : vector<8x4xf32>
    %553 = arith.addf %537, %552 : vector<8x4xf32>
    %554 = arith.mulf %460, %474 : vector<8x4xf32>
    %555 = arith.addf %524, %554 : vector<8x4xf32>
    %556 = arith.mulf %460, %475 : vector<8x4xf32>
    %557 = arith.subf %541, %556 : vector<8x4xf32>
    %558 = arith.mulf %460, %476 : vector<8x4xf32>
    %559 = arith.addf %522, %558 : vector<8x4xf32>
    %560 = arith.mulf %460, %477 : vector<8x4xf32>
    %561 = arith.addf %530, %560 : vector<8x4xf32>
    %562 = arith.mulf %460, %478 : vector<8x4xf32>
    %563 = arith.addf %531, %562 : vector<8x4xf32>
    %564 = arith.mulf %460, %479 : vector<8x4xf32>
    %565 = arith.subf %539, %564 : vector<8x4xf32>
    %566 = arith.mulf %460, %480 : vector<8x4xf32>
    %567 = arith.subf %547, %566 : vector<8x4xf32>
    %568 = arith.mulf %460, %481 : vector<8x4xf32>
    %569 = arith.subf %549, %568 : vector<8x4xf32>
    %570 = arith.mulf %460, %482 : vector<8x4xf32>
    %571 = arith.addf %525, %570 : vector<8x4xf32>
    %572 = arith.mulf %460, %483 : vector<8x4xf32>
    %573 = arith.addf %526, %572 : vector<8x4xf32>
    %574 = arith.mulf %460, %484 : vector<8x4xf32>
    %575 = arith.addf %536, %574 : vector<8x4xf32>
    %576 = arith.mulf %460, %485 : vector<8x4xf32>
    %577 = arith.subf %543, %576 : vector<8x4xf32>
    %578 = arith.mulf %460, %486 : vector<8x4xf32>
    %579 = arith.subf %545, %578 : vector<8x4xf32>
    %580 = arith.mulf %460, %487 : vector<8x4xf32>
    %581 = arith.subf %553, %580 : vector<8x4xf32>
    %582 = arith.mulf %460, %488 : vector<8x4xf32>
    %583 = arith.addf %532, %582 : vector<8x4xf32>
    %584 = arith.mulf %460, %489 : vector<8x4xf32>
    %585 = arith.subf %551, %584 : vector<8x4xf32>
    %586 = arith.mulf %461, %474 : vector<8x4xf32>
    %587 = arith.addf %571, %586 : vector<8x4xf32>
    %588 = arith.mulf %461, %475 : vector<8x4xf32>
    %589 = arith.subf %577, %588 : vector<8x4xf32>
    %590 = arith.mulf %461, %476 : vector<8x4xf32>
    %591 = arith.subf %561, %590 : vector<8x4xf32>
    %592 = arith.mulf %461, %477 : vector<8x4xf32>
    %593 = arith.addf %559, %592 : vector<8x4xf32>
    %594 = arith.mulf %461, %478 : vector<8x4xf32>
    %595 = arith.addf %583, %594 : vector<8x4xf32>
    %596 = arith.mulf %461, %479 : vector<8x4xf32>
    %597 = arith.addf %567, %596 : vector<8x4xf32>
    %598 = arith.mulf %461, %480 : vector<8x4xf32>
    %599 = arith.subf %565, %598 : vector<8x4xf32>
    %600 = arith.mulf %461, %481 : vector<8x4xf32>
    %601 = arith.subf %585, %600 : vector<8x4xf32>
    %602 = arith.mulf %461, %482 : vector<8x4xf32>
    %603 = arith.subf %555, %602 : vector<8x4xf32>
    %604 = arith.mulf %461, %483 : vector<8x4xf32>
    %605 = arith.subf %575, %604 : vector<8x4xf32>
    %606 = arith.mulf %461, %484 : vector<8x4xf32>
    %607 = arith.addf %573, %606 : vector<8x4xf32>
    %608 = arith.mulf %461, %485 : vector<8x4xf32>
    %609 = arith.addf %557, %608 : vector<8x4xf32>
    %610 = arith.mulf %461, %486 : vector<8x4xf32>
    %611 = arith.addf %581, %610 : vector<8x4xf32>
    %612 = arith.mulf %461, %487 : vector<8x4xf32>
    %613 = arith.subf %579, %612 : vector<8x4xf32>
    %614 = arith.mulf %461, %488 : vector<8x4xf32>
    %615 = arith.subf %563, %614 : vector<8x4xf32>
    %616 = arith.mulf %461, %489 : vector<8x4xf32>
    %617 = arith.addf %569, %616 : vector<8x4xf32>
    %618 = arith.mulf %462, %474 : vector<8x4xf32>
    %619 = arith.addf %607, %618 : vector<8x4xf32>
    %620 = arith.mulf %462, %475 : vector<8x4xf32>
    %621 = arith.subf %613, %620 : vector<8x4xf32>
    %622 = arith.mulf %462, %476 : vector<8x4xf32>
    %623 = arith.subf %615, %622 : vector<8x4xf32>
    %624 = arith.mulf %462, %477 : vector<8x4xf32>
    %625 = arith.subf %595, %624 : vector<8x4xf32>
    %626 = arith.mulf %462, %478 : vector<8x4xf32>
    %627 = arith.addf %593, %626 : vector<8x4xf32>
    %628 = arith.mulf %462, %479 : vector<8x4xf32>
    %629 = arith.addf %617, %628 : vector<8x4xf32>
    %630 = arith.mulf %462, %480 : vector<8x4xf32>
    %631 = arith.addf %601, %630 : vector<8x4xf32>
    %632 = arith.mulf %462, %481 : vector<8x4xf32>
    %633 = arith.subf %599, %632 : vector<8x4xf32>
    %634 = arith.mulf %462, %482 : vector<8x4xf32>
    %635 = arith.addf %605, %634 : vector<8x4xf32>
    %636 = arith.mulf %462, %483 : vector<8x4xf32>
    %637 = arith.subf %603, %636 : vector<8x4xf32>
    %638 = arith.mulf %462, %484 : vector<8x4xf32>
    %639 = arith.subf %587, %638 : vector<8x4xf32>
    %640 = arith.mulf %462, %485 : vector<8x4xf32>
    %641 = arith.subf %611, %640 : vector<8x4xf32>
    %642 = arith.mulf %462, %486 : vector<8x4xf32>
    %643 = arith.addf %609, %642 : vector<8x4xf32>
    %644 = arith.mulf %462, %487 : vector<8x4xf32>
    %645 = arith.addf %589, %644 : vector<8x4xf32>
    %646 = arith.mulf %462, %488 : vector<8x4xf32>
    %647 = arith.addf %591, %646 : vector<8x4xf32>
    %648 = arith.mulf %462, %489 : vector<8x4xf32>
    %649 = arith.subf %597, %648 : vector<8x4xf32>
    %650 = arith.mulf %463, %474 : vector<8x4xf32>
    %651 = arith.addf %643, %650 : vector<8x4xf32>
    %652 = arith.mulf %463, %476 : vector<8x4xf32>
    %653 = arith.addf %633, %652 : vector<8x4xf32>
    %654 = arith.mulf %463, %477 : vector<8x4xf32>
    %655 = arith.addf %649, %654 : vector<8x4xf32>
    %656 = arith.mulf %463, %478 : vector<8x4xf32>
    %657 = arith.addf %629, %656 : vector<8x4xf32>
    %658 = arith.mulf %463, %482 : vector<8x4xf32>
    %659 = arith.addf %645, %658 : vector<8x4xf32>
    %660 = arith.mulf %463, %483 : vector<8x4xf32>
    %661 = arith.addf %621, %660 : vector<8x4xf32>
    %662 = arith.mulf %463, %484 : vector<8x4xf32>
    %663 = arith.addf %641, %662 : vector<8x4xf32>
    %664 = arith.mulf %463, %488 : vector<8x4xf32>
    %665 = arith.addf %631, %664 : vector<8x4xf32>
    %666 = arith.mulf %464, %474 : vector<8x4xf32>
    %667 = arith.addf %659, %666 : vector<8x4xf32>
    %668 = arith.mulf %464, %476 : vector<8x4xf32>
    %669 = arith.subf %655, %668 : vector<8x4xf32>
    %670 = arith.mulf %464, %477 : vector<8x4xf32>
    %671 = arith.addf %653, %670 : vector<8x4xf32>
    %672 = arith.mulf %464, %478 : vector<8x4xf32>
    %673 = arith.addf %665, %672 : vector<8x4xf32>
    %674 = arith.mulf %464, %482 : vector<8x4xf32>
    %675 = arith.subf %651, %674 : vector<8x4xf32>
    %676 = arith.mulf %464, %483 : vector<8x4xf32>
    %677 = arith.subf %663, %676 : vector<8x4xf32>
    %678 = arith.mulf %464, %484 : vector<8x4xf32>
    %679 = arith.addf %661, %678 : vector<8x4xf32>
    %680 = arith.mulf %464, %488 : vector<8x4xf32>
    %681 = arith.subf %657, %680 : vector<8x4xf32>
    %682 = arith.mulf %465, %474 : vector<8x4xf32>
    %683 = arith.addf %679, %682 : vector<8x4xf32>
    %684 = arith.mulf %465, %476 : vector<8x4xf32>
    %685 = arith.subf %681, %684 : vector<8x4xf32>
    %686 = arith.mulf %465, %477 : vector<8x4xf32>
    %687 = arith.subf %673, %686 : vector<8x4xf32>
    %688 = arith.mulf %465, %478 : vector<8x4xf32>
    %689 = arith.addf %671, %688 : vector<8x4xf32>
    %690 = arith.mulf %465, %482 : vector<8x4xf32>
    %691 = arith.addf %677, %690 : vector<8x4xf32>
    %692 = arith.mulf %465, %483 : vector<8x4xf32>
    %693 = arith.subf %675, %692 : vector<8x4xf32>
    %694 = arith.mulf %465, %484 : vector<8x4xf32>
    %695 = arith.subf %667, %694 : vector<8x4xf32>
    %696 = arith.mulf %465, %488 : vector<8x4xf32>
    %697 = arith.addf %669, %696 : vector<8x4xf32>
    %698 = arith.mulf %466, %474 : vector<8x4xf32>
    %699 = arith.addf %647, %698 : vector<8x4xf32>
    %700 = arith.mulf %466, %475 : vector<8x4xf32>
    %701 = arith.addf %697, %700 : vector<8x4xf32>
    %702 = arith.mulf %466, %476 : vector<8x4xf32>
    %703 = arith.subf %639, %702 : vector<8x4xf32>
    %704 = arith.mulf %466, %477 : vector<8x4xf32>
    %705 = arith.addf %637, %704 : vector<8x4xf32>
    %706 = arith.mulf %466, %478 : vector<8x4xf32>
    %707 = arith.addf %635, %706 : vector<8x4xf32>
    %708 = arith.mulf %466, %479 : vector<8x4xf32>
    %709 = arith.subf %695, %708 : vector<8x4xf32>
    %710 = arith.mulf %466, %480 : vector<8x4xf32>
    %711 = arith.addf %693, %710 : vector<8x4xf32>
    %712 = arith.mulf %466, %481 : vector<8x4xf32>
    %713 = arith.addf %691, %712 : vector<8x4xf32>
    %714 = arith.mulf %466, %482 : vector<8x4xf32>
    %715 = arith.subf %627, %714 : vector<8x4xf32>
    %716 = arith.mulf %466, %483 : vector<8x4xf32>
    %717 = arith.subf %625, %716 : vector<8x4xf32>
    %718 = arith.mulf %466, %484 : vector<8x4xf32>
    %719 = arith.addf %623, %718 : vector<8x4xf32>
    %720 = arith.mulf %466, %485 : vector<8x4xf32>
    %721 = arith.subf %689, %720 : vector<8x4xf32>
    %722 = arith.mulf %466, %486 : vector<8x4xf32>
    %723 = arith.subf %687, %722 : vector<8x4xf32>
    %724 = arith.mulf %466, %487 : vector<8x4xf32>
    %725 = arith.addf %685, %724 : vector<8x4xf32>
    %726 = arith.mulf %466, %488 : vector<8x4xf32>
    %727 = arith.subf %619, %726 : vector<8x4xf32>
    %728 = arith.mulf %466, %489 : vector<8x4xf32>
    %729 = arith.subf %683, %728 : vector<8x4xf32>
    %730 = arith.mulf %467, %474 : vector<8x4xf32>
    %731 = arith.addf %719, %730 : vector<8x4xf32>
    %732 = arith.mulf %467, %475 : vector<8x4xf32>
    %733 = arith.addf %725, %732 : vector<8x4xf32>
    %734 = arith.mulf %467, %476 : vector<8x4xf32>
    %735 = arith.subf %727, %734 : vector<8x4xf32>
    %736 = arith.mulf %467, %477 : vector<8x4xf32>
    %737 = arith.subf %707, %736 : vector<8x4xf32>
    %738 = arith.mulf %467, %478 : vector<8x4xf32>
    %739 = arith.addf %705, %738 : vector<8x4xf32>
    %740 = arith.mulf %467, %479 : vector<8x4xf32>
    %741 = arith.subf %729, %740 : vector<8x4xf32>
    %742 = arith.mulf %467, %480 : vector<8x4xf32>
    %743 = arith.subf %713, %742 : vector<8x4xf32>
    %744 = arith.mulf %467, %481 : vector<8x4xf32>
    %745 = arith.addf %711, %744 : vector<8x4xf32>
    %746 = arith.mulf %467, %482 : vector<8x4xf32>
    %747 = arith.addf %717, %746 : vector<8x4xf32>
    %748 = arith.mulf %467, %483 : vector<8x4xf32>
    %749 = arith.subf %715, %748 : vector<8x4xf32>
    %750 = arith.mulf %467, %484 : vector<8x4xf32>
    %751 = arith.subf %699, %750 : vector<8x4xf32>
    %752 = arith.mulf %467, %485 : vector<8x4xf32>
    %753 = arith.addf %723, %752 : vector<8x4xf32>
    %754 = arith.mulf %467, %486 : vector<8x4xf32>
    %755 = arith.subf %721, %754 : vector<8x4xf32>
    %756 = arith.mulf %467, %487 : vector<8x4xf32>
    %757 = arith.subf %701, %756 : vector<8x4xf32>
    %758 = arith.mulf %467, %488 : vector<8x4xf32>
    %759 = arith.addf %703, %758 : vector<8x4xf32>
    %760 = arith.mulf %467, %489 : vector<8x4xf32>
    %761 = arith.addf %709, %760 : vector<8x4xf32>
    %762 = arith.mulf %468, %474 : vector<8x4xf32>
    %763 = arith.addf %747, %762 : vector<8x4xf32>
    %764 = arith.mulf %468, %475 : vector<8x4xf32>
    %765 = arith.addf %753, %764 : vector<8x4xf32>
    %766 = arith.mulf %468, %476 : vector<8x4xf32>
    %767 = arith.addf %737, %766 : vector<8x4xf32>
    %768 = arith.mulf %468, %477 : vector<8x4xf32>
    %769 = arith.subf %735, %768 : vector<8x4xf32>
    %770 = arith.mulf %468, %478 : vector<8x4xf32>
    %771 = arith.addf %759, %770 : vector<8x4xf32>
    %772 = arith.mulf %468, %479 : vector<8x4xf32>
    %773 = arith.addf %743, %772 : vector<8x4xf32>
    %774 = arith.mulf %468, %480 : vector<8x4xf32>
    %775 = arith.subf %741, %774 : vector<8x4xf32>
    %776 = arith.mulf %468, %481 : vector<8x4xf32>
    %777 = arith.addf %761, %776 : vector<8x4xf32>
    %778 = arith.mulf %468, %482 : vector<8x4xf32>
    %779 = arith.subf %731, %778 : vector<8x4xf32>
    %780 = arith.mulf %468, %483 : vector<8x4xf32>
    %781 = arith.addf %751, %780 : vector<8x4xf32>
    %782 = arith.mulf %468, %484 : vector<8x4xf32>
    %783 = arith.subf %749, %782 : vector<8x4xf32>
    %784 = arith.mulf %468, %485 : vector<8x4xf32>
    %785 = arith.subf %733, %784 : vector<8x4xf32>
    %786 = arith.mulf %468, %486 : vector<8x4xf32>
    %787 = arith.addf %757, %786 : vector<8x4xf32>
    %788 = arith.mulf %468, %487 : vector<8x4xf32>
    %789 = arith.subf %755, %788 : vector<8x4xf32>
    %790 = arith.mulf %468, %488 : vector<8x4xf32>
    %791 = arith.subf %739, %790 : vector<8x4xf32>
    %792 = arith.mulf %468, %489 : vector<8x4xf32>
    %793 = arith.subf %745, %792 : vector<8x4xf32>
    %794 = arith.mulf %469, %474 : vector<8x4xf32>
    %795 = arith.addf %787, %794 : vector<8x4xf32>
    %796 = arith.mulf %469, %476 : vector<8x4xf32>
    %797 = arith.subf %777, %796 : vector<8x4xf32>
    %798 = arith.mulf %469, %477 : vector<8x4xf32>
    %799 = arith.addf %793, %798 : vector<8x4xf32>
    %800 = arith.mulf %469, %478 : vector<8x4xf32>
    %801 = arith.addf %773, %800 : vector<8x4xf32>
    %802 = arith.mulf %469, %482 : vector<8x4xf32>
    %803 = arith.subf %789, %802 : vector<8x4xf32>
    %804 = arith.mulf %469, %483 : vector<8x4xf32>
    %805 = arith.subf %765, %804 : vector<8x4xf32>
    %806 = arith.mulf %469, %484 : vector<8x4xf32>
    %807 = arith.addf %785, %806 : vector<8x4xf32>
    %808 = arith.mulf %469, %488 : vector<8x4xf32>
    %809 = arith.subf %775, %808 : vector<8x4xf32>
    %810 = arith.mulf %470, %474 : vector<8x4xf32>
    %811 = arith.addf %807, %810 : vector<8x4xf32>
    %812 = arith.mulf %470, %476 : vector<8x4xf32>
    %813 = arith.subf %809, %812 : vector<8x4xf32>
    %814 = arith.mulf %470, %477 : vector<8x4xf32>
    %815 = arith.subf %801, %814 : vector<8x4xf32>
    %816 = arith.mulf %470, %478 : vector<8x4xf32>
    %817 = arith.addf %799, %816 : vector<8x4xf32>
    %818 = arith.mulf %470, %482 : vector<8x4xf32>
    %819 = arith.addf %805, %818 : vector<8x4xf32>
    %820 = arith.mulf %470, %483 : vector<8x4xf32>
    %821 = arith.subf %803, %820 : vector<8x4xf32>
    %822 = arith.mulf %470, %484 : vector<8x4xf32>
    %823 = arith.subf %795, %822 : vector<8x4xf32>
    %824 = arith.mulf %470, %488 : vector<8x4xf32>
    %825 = arith.addf %797, %824 : vector<8x4xf32>
    %826 = arith.mulf %471, %474 : vector<8x4xf32>
    %827 = arith.addf %819, %826 : vector<8x4xf32>
    %828 = arith.mulf %471, %476 : vector<8x4xf32>
    %829 = arith.addf %815, %828 : vector<8x4xf32>
    %830 = arith.mulf %471, %477 : vector<8x4xf32>
    %831 = arith.subf %813, %830 : vector<8x4xf32>
    %832 = arith.mulf %471, %478 : vector<8x4xf32>
    %833 = arith.addf %825, %832 : vector<8x4xf32>
    %834 = arith.mulf %471, %482 : vector<8x4xf32>
    %835 = arith.subf %811, %834 : vector<8x4xf32>
    %836 = arith.mulf %471, %483 : vector<8x4xf32>
    %837 = arith.addf %823, %836 : vector<8x4xf32>
    %838 = arith.mulf %471, %484 : vector<8x4xf32>
    %839 = arith.subf %821, %838 : vector<8x4xf32>
    %840 = arith.mulf %471, %488 : vector<8x4xf32>
    %841 = arith.subf %817, %840 : vector<8x4xf32>
    %842 = arith.mulf %472, %474 : vector<8x4xf32>
    %843 = arith.addf %767, %842 : vector<8x4xf32>
    %844 = arith.mulf %472, %475 : vector<8x4xf32>
    %845 = arith.subf %829, %844 : vector<8x4xf32>
    %846 = arith.mulf %472, %476 : vector<8x4xf32>
    %847 = arith.addf %763, %846 : vector<8x4xf32>
    %848 = arith.mulf %472, %477 : vector<8x4xf32>
    %849 = arith.subf %779, %848 : vector<8x4xf32>
    %850 = arith.mulf %472, %478 : vector<8x4xf32>
    %851 = arith.addf %781, %850 : vector<8x4xf32>
    %852 = arith.mulf %472, %479 : vector<8x4xf32>
    %853 = arith.subf %827, %852 : vector<8x4xf32>
    %854 = arith.mulf %472, %480 : vector<8x4xf32>
    %855 = arith.addf %835, %854 : vector<8x4xf32>
    %856 = arith.mulf %472, %481 : vector<8x4xf32>
    %857 = arith.subf %837, %856 : vector<8x4xf32>
    %858 = arith.mulf %472, %482 : vector<8x4xf32>
    %859 = arith.subf %769, %858 : vector<8x4xf32>
    %860 = arith.mulf %472, %483 : vector<8x4xf32>
    %861 = arith.addf %771, %860 : vector<8x4xf32>
    %862 = arith.mulf %472, %484 : vector<8x4xf32>
    %863 = arith.subf %791, %862 : vector<8x4xf32>
    %864 = arith.mulf %472, %485 : vector<8x4xf32>
    %865 = arith.addf %831, %864 : vector<8x4xf32>
    %866 = arith.mulf %472, %486 : vector<8x4xf32>
    %867 = arith.subf %833, %866 : vector<8x4xf32>
    %868 = arith.mulf %472, %487 : vector<8x4xf32>
    %869 = arith.addf %841, %868 : vector<8x4xf32>
    %870 = arith.mulf %472, %488 : vector<8x4xf32>
    %871 = arith.subf %783, %870 : vector<8x4xf32>
    %872 = arith.mulf %472, %489 : vector<8x4xf32>
    %873 = arith.addf %839, %872 : vector<8x4xf32>
    %874 = arith.mulf %473, %474 : vector<8x4xf32>
    %875 = arith.addf %845, %874 : vector<8x4xf32>
    %876 = arith.mulf %473, %476 : vector<8x4xf32>
    %877 = arith.addf %853, %876 : vector<8x4xf32>
    %878 = arith.mulf %473, %477 : vector<8x4xf32>
    %879 = arith.subf %855, %878 : vector<8x4xf32>
    %880 = arith.mulf %473, %478 : vector<8x4xf32>
    %881 = arith.addf %857, %880 : vector<8x4xf32>
    %882 = arith.mulf %473, %482 : vector<8x4xf32>
    %883 = arith.subf %865, %882 : vector<8x4xf32>
    %884 = arith.mulf %473, %483 : vector<8x4xf32>
    %885 = arith.addf %867, %884 : vector<8x4xf32>
    %886 = arith.mulf %473, %484 : vector<8x4xf32>
    %887 = arith.subf %869, %886 : vector<8x4xf32>
    %888 = arith.mulf %473, %488 : vector<8x4xf32>
    %889 = arith.subf %873, %888 : vector<8x4xf32>
    %890 = arith.mulf %490, %521 : vector<8x4xf32>
    %891 = arith.mulf %491, %520 : vector<8x4xf32>
    %892 = arith.addf %890, %891 : vector<8x4xf32>
    %893 = arith.mulf %491, %521 : vector<8x4xf32>
    %894 = arith.mulf %492, %519 : vector<8x4xf32>
    %895 = arith.subf %892, %894 : vector<8x4xf32>
    %896 = arith.mulf %492, %521 : vector<8x4xf32>
    %897 = arith.mulf %493, %518 : vector<8x4xf32>
    %898 = arith.addf %895, %897 : vector<8x4xf32>
    %899 = arith.mulf %493, %521 : vector<8x4xf32>
    %900 = arith.mulf %494, %517 : vector<8x4xf32>
    %901 = arith.subf %898, %900 : vector<8x4xf32>
    %902 = arith.mulf %494, %521 : vector<8x4xf32>
    %903 = arith.mulf %495, %516 : vector<8x4xf32>
    %904 = arith.addf %901, %903 : vector<8x4xf32>
    %905 = arith.mulf %495, %519 : vector<8x4xf32>
    %906 = arith.addf %893, %905 : vector<8x4xf32>
    %907 = arith.mulf %495, %520 : vector<8x4xf32>
    %908 = arith.addf %896, %907 : vector<8x4xf32>
    %909 = arith.mulf %495, %521 : vector<8x4xf32>
    %910 = arith.mulf %496, %515 : vector<8x4xf32>
    %911 = arith.subf %904, %910 : vector<8x4xf32>
    %912 = arith.mulf %496, %518 : vector<8x4xf32>
    %913 = arith.subf %906, %912 : vector<8x4xf32>
    %914 = arith.mulf %496, %520 : vector<8x4xf32>
    %915 = arith.addf %899, %914 : vector<8x4xf32>
    %916 = arith.mulf %496, %521 : vector<8x4xf32>
    %917 = arith.mulf %497, %514 : vector<8x4xf32>
    %918 = arith.addf %911, %917 : vector<8x4xf32>
    %919 = arith.mulf %497, %517 : vector<8x4xf32>
    %920 = arith.addf %913, %919 : vector<8x4xf32>
    %921 = arith.mulf %497, %520 : vector<8x4xf32>
    %922 = arith.addf %902, %921 : vector<8x4xf32>
    %923 = arith.mulf %497, %521 : vector<8x4xf32>
    %924 = arith.mulf %498, %513 : vector<8x4xf32>
    %925 = arith.addf %918, %924 : vector<8x4xf32>
    %926 = arith.mulf %498, %518 : vector<8x4xf32>
    %927 = arith.subf %908, %926 : vector<8x4xf32>
    %928 = arith.mulf %498, %519 : vector<8x4xf32>
    %929 = arith.subf %915, %928 : vector<8x4xf32>
    %930 = arith.mulf %498, %521 : vector<8x4xf32>
    %931 = arith.mulf %499, %512 : vector<8x4xf32>
    %932 = arith.subf %925, %931 : vector<8x4xf32>
    %933 = arith.mulf %499, %517 : vector<8x4xf32>
    %934 = arith.addf %927, %933 : vector<8x4xf32>
    %935 = arith.mulf %499, %519 : vector<8x4xf32>
    %936 = arith.subf %922, %935 : vector<8x4xf32>
    %937 = arith.mulf %499, %521 : vector<8x4xf32>
    %938 = arith.mulf %500, %511 : vector<8x4xf32>
    %939 = arith.addf %932, %938 : vector<8x4xf32>
    %940 = arith.mulf %500, %517 : vector<8x4xf32>
    %941 = arith.addf %929, %940 : vector<8x4xf32>
    %942 = arith.mulf %500, %518 : vector<8x4xf32>
    %943 = arith.addf %936, %942 : vector<8x4xf32>
    %944 = arith.mulf %500, %521 : vector<8x4xf32>
    %945 = arith.mulf %501, %510 : vector<8x4xf32>
    %946 = arith.addf %939, %945 : vector<8x4xf32>
    %947 = arith.mulf %501, %513 : vector<8x4xf32>
    %948 = arith.addf %920, %947 : vector<8x4xf32>
    %949 = arith.mulf %501, %515 : vector<8x4xf32>
    %950 = arith.addf %934, %949 : vector<8x4xf32>
    %951 = arith.mulf %501, %516 : vector<8x4xf32>
    %952 = arith.addf %941, %951 : vector<8x4xf32>
    %953 = arith.mulf %501, %518 : vector<8x4xf32>
    %954 = arith.addf %909, %953 : vector<8x4xf32>
    %955 = arith.mulf %501, %519 : vector<8x4xf32>
    %956 = arith.addf %916, %955 : vector<8x4xf32>
    %957 = arith.mulf %501, %520 : vector<8x4xf32>
    %958 = arith.addf %930, %957 : vector<8x4xf32>
    %959 = arith.mulf %501, %521 : vector<8x4xf32>
    %960 = arith.mulf %502, %509 : vector<8x4xf32>
    %961 = arith.subf %946, %960 : vector<8x4xf32>
    %962 = arith.mulf %502, %512 : vector<8x4xf32>
    %963 = arith.subf %948, %962 : vector<8x4xf32>
    %964 = arith.mulf %502, %514 : vector<8x4xf32>
    %965 = arith.subf %950, %964 : vector<8x4xf32>
    %966 = arith.mulf %502, %516 : vector<8x4xf32>
    %967 = arith.addf %943, %966 : vector<8x4xf32>
    %968 = arith.mulf %502, %517 : vector<8x4xf32>
    %969 = arith.subf %954, %968 : vector<8x4xf32>
    %970 = arith.mulf %502, %519 : vector<8x4xf32>
    %971 = arith.addf %923, %970 : vector<8x4xf32>
    %972 = arith.mulf %502, %520 : vector<8x4xf32>
    %973 = arith.addf %937, %972 : vector<8x4xf32>
    %974 = arith.mulf %502, %521 : vector<8x4xf32>
    %975 = arith.mulf %503, %508 : vector<8x4xf32>
    %976 = arith.addf %961, %975 : vector<8x4xf32>
    %977 = arith.mulf %503, %511 : vector<8x4xf32>
    %978 = arith.addf %963, %977 : vector<8x4xf32>
    %979 = arith.mulf %503, %514 : vector<8x4xf32>
    %980 = arith.subf %952, %979 : vector<8x4xf32>
    %981 = arith.mulf %503, %515 : vector<8x4xf32>
    %982 = arith.subf %967, %981 : vector<8x4xf32>
    %983 = arith.mulf %503, %517 : vector<8x4xf32>
    %984 = arith.subf %956, %983 : vector<8x4xf32>
    %985 = arith.mulf %503, %518 : vector<8x4xf32>
    %986 = arith.subf %971, %985 : vector<8x4xf32>
    %987 = arith.mulf %503, %520 : vector<8x4xf32>
    %988 = arith.addf %944, %987 : vector<8x4xf32>
    %989 = arith.mulf %503, %521 : vector<8x4xf32>
    %990 = arith.mulf %504, %507 : vector<8x4xf32>
    %991 = arith.subf %976, %990 : vector<8x4xf32>
    %992 = arith.mulf %504, %511 : vector<8x4xf32>
    %993 = arith.addf %965, %992 : vector<8x4xf32>
    %994 = arith.mulf %504, %512 : vector<8x4xf32>
    %995 = arith.addf %980, %994 : vector<8x4xf32>
    %996 = arith.mulf %504, %513 : vector<8x4xf32>
    %997 = arith.addf %982, %996 : vector<8x4xf32>
    %998 = arith.mulf %504, %517 : vector<8x4xf32>
    %999 = arith.subf %958, %998 : vector<8x4xf32>
    %1000 = arith.mulf %504, %518 : vector<8x4xf32>
    %1001 = arith.subf %973, %1000 : vector<8x4xf32>
    %1002 = arith.mulf %504, %519 : vector<8x4xf32>
    %1003 = arith.subf %988, %1002 : vector<8x4xf32>
    %1004 = arith.mulf %504, %521 : vector<8x4xf32>
    %1005 = arith.mulf %505, %506 : vector<8x4xf32>
    %1006 = arith.addf %991, %1005 : vector<8x4xf32>
    %1007 = arith.mulf %505, %507 : vector<8x4xf32>
    %1008 = arith.addf %978, %1007 : vector<8x4xf32>
    %1009 = arith.mulf %505, %508 : vector<8x4xf32>
    %1010 = arith.addf %993, %1009 : vector<8x4xf32>
    %1011 = arith.mulf %505, %509 : vector<8x4xf32>
    %1012 = arith.addf %995, %1011 : vector<8x4xf32>
    %1013 = arith.mulf %505, %510 : vector<8x4xf32>
    %1014 = arith.addf %997, %1013 : vector<8x4xf32>
    %1015 = arith.mulf %505, %511 : vector<8x4xf32>
    %1016 = arith.addf %969, %1015 : vector<8x4xf32>
    %1017 = arith.mulf %505, %512 : vector<8x4xf32>
    %1018 = arith.addf %984, %1017 : vector<8x4xf32>
    %1019 = arith.mulf %505, %513 : vector<8x4xf32>
    %1020 = arith.addf %986, %1019 : vector<8x4xf32>
    %1021 = arith.mulf %505, %514 : vector<8x4xf32>
    %1022 = arith.addf %999, %1021 : vector<8x4xf32>
    %1023 = arith.mulf %505, %515 : vector<8x4xf32>
    %1024 = arith.addf %1001, %1023 : vector<8x4xf32>
    %1025 = arith.mulf %505, %516 : vector<8x4xf32>
    %1026 = arith.addf %1003, %1025 : vector<8x4xf32>
    %1027 = arith.mulf %505, %517 : vector<8x4xf32>
    %1028 = arith.addf %959, %1027 : vector<8x4xf32>
    %1029 = arith.mulf %505, %518 : vector<8x4xf32>
    %1030 = arith.addf %974, %1029 : vector<8x4xf32>
    %1031 = arith.mulf %505, %519 : vector<8x4xf32>
    %1032 = arith.addf %989, %1031 : vector<8x4xf32>
    %1033 = arith.mulf %505, %520 : vector<8x4xf32>
    %1034 = arith.addf %1004, %1033 : vector<8x4xf32>
    %1035 = arith.mulf %505, %521 : vector<8x4xf32>
    %1036 = vector.broadcast %33 : vector<1x1xf32> to vector<8x4xf32>
    %1037 = arith.mulf %1036, %1006 : vector<8x4xf32>
    %1038 = tpu.concatenate %871, %1037 in 1 : vector<8x4xf32>, vector<8x4xf32> -> vector<8x8xf32>
    %1039 = vector.broadcast %33 : vector<1x1xf32> to vector<8x4xf32>
    %1040 = arith.mulf %1039, %1008 : vector<8x4xf32>
    %1041 = tpu.concatenate %889, %1040 in 1 : vector<8x4xf32>, vector<8x4xf32> -> vector<8x8xf32>
    %1042 = vector.broadcast %33 : vector<1x1xf32> to vector<8x4xf32>
    %1043 = arith.mulf %1042, %1010 : vector<8x4xf32>
    %1044 = tpu.concatenate %863, %1043 in 1 : vector<8x4xf32>, vector<8x4xf32> -> vector<8x8xf32>
    %1045 = vector.broadcast %33 : vector<1x1xf32> to vector<8x4xf32>
    %1046 = arith.mulf %1045, %1012 : vector<8x4xf32>
    %1047 = tpu.concatenate %861, %1046 in 1 : vector<8x4xf32>, vector<8x4xf32> -> vector<8x8xf32>
    %1048 = vector.broadcast %33 : vector<1x1xf32> to vector<8x4xf32>
    %1049 = arith.mulf %1048, %1014 : vector<8x4xf32>
    %1050 = tpu.concatenate %859, %1049 in 1 : vector<8x4xf32>, vector<8x4xf32> -> vector<8x8xf32>
    %1051 = vector.broadcast %33 : vector<1x1xf32> to vector<8x4xf32>
    %1052 = arith.mulf %1051, %1016 : vector<8x4xf32>
    %1053 = tpu.concatenate %887, %1052 in 1 : vector<8x4xf32>, vector<8x4xf32> -> vector<8x8xf32>
    %1054 = vector.broadcast %33 : vector<1x1xf32> to vector<8x4xf32>
    %1055 = arith.mulf %1054, %1018 : vector<8x4xf32>
    %1056 = tpu.concatenate %885, %1055 in 1 : vector<8x4xf32>, vector<8x4xf32> -> vector<8x8xf32>
    %1057 = vector.broadcast %33 : vector<1x1xf32> to vector<8x4xf32>
    %1058 = arith.mulf %1057, %1020 : vector<8x4xf32>
    %1059 = tpu.concatenate %883, %1058 in 1 : vector<8x4xf32>, vector<8x4xf32> -> vector<8x8xf32>
    %1060 = vector.broadcast %33 : vector<1x1xf32> to vector<8x4xf32>
    %1061 = arith.mulf %1060, %1022 : vector<8x4xf32>
    %1062 = tpu.concatenate %851, %1061 in 1 : vector<8x4xf32>, vector<8x4xf32> -> vector<8x8xf32>
    %1063 = vector.broadcast %33 : vector<1x1xf32> to vector<8x4xf32>
    %1064 = arith.mulf %1063, %1024 : vector<8x4xf32>
    %1065 = tpu.concatenate %849, %1064 in 1 : vector<8x4xf32>, vector<8x4xf32> -> vector<8x8xf32>
    %1066 = vector.broadcast %33 : vector<1x1xf32> to vector<8x4xf32>
    %1067 = arith.mulf %1066, %1026 : vector<8x4xf32>
    %1068 = tpu.concatenate %847, %1067 in 1 : vector<8x4xf32>, vector<8x4xf32> -> vector<8x8xf32>
    %1069 = vector.broadcast %33 : vector<1x1xf32> to vector<8x4xf32>
    %1070 = arith.mulf %1069, %1028 : vector<8x4xf32>
    %1071 = tpu.concatenate %881, %1070 in 1 : vector<8x4xf32>, vector<8x4xf32> -> vector<8x8xf32>
    %1072 = vector.broadcast %33 : vector<1x1xf32> to vector<8x4xf32>
    %1073 = arith.mulf %1072, %1030 : vector<8x4xf32>
    %1074 = tpu.concatenate %879, %1073 in 1 : vector<8x4xf32>, vector<8x4xf32> -> vector<8x8xf32>
    %1075 = vector.broadcast %33 : vector<1x1xf32> to vector<8x4xf32>
    %1076 = arith.mulf %1075, %1032 : vector<8x4xf32>
    %1077 = tpu.concatenate %877, %1076 in 1 : vector<8x4xf32>, vector<8x4xf32> -> vector<8x8xf32>
    %1078 = vector.broadcast %33 : vector<1x1xf32> to vector<8x4xf32>
    %1079 = arith.mulf %1078, %1034 : vector<8x4xf32>
    %1080 = tpu.concatenate %843, %1079 in 1 : vector<8x4xf32>, vector<8x4xf32> -> vector<8x8xf32>
    %1081 = vector.broadcast %33 : vector<1x1xf32> to vector<8x4xf32>
    %1082 = arith.mulf %1081, %1035 : vector<8x4xf32>
    %1083 = tpu.concatenate %875, %1082 in 1 : vector<8x4xf32>, vector<8x4xf32> -> vector<8x8xf32>
    %1084 = arith.truncf %1038 : vector<8x8xf32> to vector<8x8xbf16>
    %c0_146 = arith.constant 0 : index
    %c0_147 = arith.constant 0 : index
    %c0_148 = arith.constant 0 : index
    %1085 = vector.load %arg7[%c0_146, %c0_147, %c0_148] : memref<5x8x8xbf16, #tpu.memory_space<vmem>>, vector<1x8x8xbf16>
    %1086 = vector.shape_cast %1085 : vector<1x8x8xbf16> to vector<8x8xbf16>
    %cst_149 = arith.constant dense<0.000000e+00> : vector<8x8xf32>
    %1087 = tpu.matmul %1084, %1086, %cst_149 {dimension_numbers = #tpu.dot_dimension_numbers<[1], [0], [0], [1], [0, 0, 1, 1], [], []>} : vector<8x8xbf16>, vector<8x8xbf16>, vector<8x8xf32> -> vector<8x8xf32>
    %1088 = tpu.concatenate %1041, %1044, %1047, %1050 in 0 : vector<8x8xf32>, vector<8x8xf32>, vector<8x8xf32>, vector<8x8xf32> -> vector<32x8xf32>
    %1089 = arith.truncf %1088 : vector<32x8xf32> to vector<32x8xbf16>
    %c1_150 = arith.constant 1 : index
    %c0_151 = arith.constant 0 : index
    %c0_152 = arith.constant 0 : index
    %1090 = vector.load %arg7[%c1_150, %c0_151, %c0_152] : memref<5x8x8xbf16, #tpu.memory_space<vmem>>, vector<1x8x8xbf16>
    %1091 = vector.shape_cast %1090 : vector<1x8x8xbf16> to vector<8x8xbf16>
    %cst_153 = arith.constant dense<0.000000e+00> : vector<32x8xf32>
    %1092 = tpu.matmul %1089, %1091, %cst_153 {dimension_numbers = #tpu.dot_dimension_numbers<[1], [0], [0], [1], [0, 0, 1, 1], [], []>} : vector<32x8xbf16>, vector<8x8xbf16>, vector<32x8xf32> -> vector<32x8xf32>
    %1093 = vector.extract_strided_slice %1092 {offsets = [0, 0], sizes = [8, 8], strides = [1, 1]} : vector<32x8xf32> to vector<8x8xf32>
    %1094 = vector.extract_strided_slice %1092 {offsets = [8, 0], sizes = [8, 8], strides = [1, 1]} : vector<32x8xf32> to vector<8x8xf32>
    %1095 = vector.extract_strided_slice %1092 {offsets = [16, 0], sizes = [8, 8], strides = [1, 1]} : vector<32x8xf32> to vector<8x8xf32>
    %1096 = vector.extract_strided_slice %1092 {offsets = [24, 0], sizes = [8, 8], strides = [1, 1]} : vector<32x8xf32> to vector<8x8xf32>
    %1097 = tpu.concatenate %1053, %1056, %1059, %1062, %1065, %1068 in 0 : vector<8x8xf32>, vector<8x8xf32>, vector<8x8xf32>, vector<8x8xf32>, vector<8x8xf32>, vector<8x8xf32> -> vector<48x8xf32>
    %1098 = arith.truncf %1097 : vector<48x8xf32> to vector<48x8xbf16>
    %c2_154 = arith.constant 2 : index
    %c0_155 = arith.constant 0 : index
    %c0_156 = arith.constant 0 : index
    %1099 = vector.load %arg7[%c2_154, %c0_155, %c0_156] : memref<5x8x8xbf16, #tpu.memory_space<vmem>>, vector<1x8x8xbf16>
    %1100 = vector.shape_cast %1099 : vector<1x8x8xbf16> to vector<8x8xbf16>
    %cst_157 = arith.constant dense<0.000000e+00> : vector<48x8xf32>
    %1101 = tpu.matmul %1098, %1100, %cst_157 {dimension_numbers = #tpu.dot_dimension_numbers<[1], [0], [0], [1], [0, 0, 1, 1], [], []>} : vector<48x8xbf16>, vector<8x8xbf16>, vector<48x8xf32> -> vector<48x8xf32>
    %1102 = vector.extract_strided_slice %1101 {offsets = [0, 0], sizes = [8, 8], strides = [1, 1]} : vector<48x8xf32> to vector<8x8xf32>
    %1103 = vector.extract_strided_slice %1101 {offsets = [8, 0], sizes = [8, 8], strides = [1, 1]} : vector<48x8xf32> to vector<8x8xf32>
    %1104 = vector.extract_strided_slice %1101 {offsets = [16, 0], sizes = [8, 8], strides = [1, 1]} : vector<48x8xf32> to vector<8x8xf32>
    %1105 = vector.extract_strided_slice %1101 {offsets = [24, 0], sizes = [8, 8], strides = [1, 1]} : vector<48x8xf32> to vector<8x8xf32>
    %1106 = vector.extract_strided_slice %1101 {offsets = [32, 0], sizes = [8, 8], strides = [1, 1]} : vector<48x8xf32> to vector<8x8xf32>
    %1107 = vector.extract_strided_slice %1101 {offsets = [40, 0], sizes = [8, 8], strides = [1, 1]} : vector<48x8xf32> to vector<8x8xf32>
    %1108 = tpu.concatenate %1071, %1074, %1077, %1080 in 0 : vector<8x8xf32>, vector<8x8xf32>, vector<8x8xf32>, vector<8x8xf32> -> vector<32x8xf32>
    %1109 = arith.truncf %1108 : vector<32x8xf32> to vector<32x8xbf16>
    %c3_158 = arith.constant 3 : index
    %c0_159 = arith.constant 0 : index
    %c0_160 = arith.constant 0 : index
    %1110 = vector.load %arg7[%c3_158, %c0_159, %c0_160] : memref<5x8x8xbf16, #tpu.memory_space<vmem>>, vector<1x8x8xbf16>
    %1111 = vector.shape_cast %1110 : vector<1x8x8xbf16> to vector<8x8xbf16>
    %cst_161 = arith.constant dense<0.000000e+00> : vector<32x8xf32>
    %1112 = tpu.matmul %1109, %1111, %cst_161 {dimension_numbers = #tpu.dot_dimension_numbers<[1], [0], [0], [1], [0, 0, 1, 1], [], []>} : vector<32x8xbf16>, vector<8x8xbf16>, vector<32x8xf32> -> vector<32x8xf32>
    %1113 = vector.extract_strided_slice %1112 {offsets = [0, 0], sizes = [8, 8], strides = [1, 1]} : vector<32x8xf32> to vector<8x8xf32>
    %1114 = vector.extract_strided_slice %1112 {offsets = [8, 0], sizes = [8, 8], strides = [1, 1]} : vector<32x8xf32> to vector<8x8xf32>
    %1115 = vector.extract_strided_slice %1112 {offsets = [16, 0], sizes = [8, 8], strides = [1, 1]} : vector<32x8xf32> to vector<8x8xf32>
    %1116 = vector.extract_strided_slice %1112 {offsets = [24, 0], sizes = [8, 8], strides = [1, 1]} : vector<32x8xf32> to vector<8x8xf32>
    %1117 = arith.truncf %1083 : vector<8x8xf32> to vector<8x8xbf16>
    %c4_162 = arith.constant 4 : index
    %c0_163 = arith.constant 0 : index
    %c0_164 = arith.constant 0 : index
    %1118 = vector.load %arg7[%c4_162, %c0_163, %c0_164] : memref<5x8x8xbf16, #tpu.memory_space<vmem>>, vector<1x8x8xbf16>
    %1119 = vector.shape_cast %1118 : vector<1x8x8xbf16> to vector<8x8xbf16>
    %cst_165 = arith.constant dense<0.000000e+00> : vector<8x8xf32>
    %1120 = tpu.matmul %1117, %1119, %cst_165 {dimension_numbers = #tpu.dot_dimension_numbers<[1], [0], [0], [1], [0, 0, 1, 1], [], []>} : vector<8x8xbf16>, vector<8x8xbf16>, vector<8x8xf32> -> vector<8x8xf32>
    %cst_166 = arith.constant 5.000000e-01 : f32
    %1121 = vector.broadcast %cst_166 : f32 to vector<8x8xf32>
    %1122 = arith.mulf %1121, %1087 : vector<8x8xf32>
    %cst_167 = arith.constant 4.471500e-02 : f32
    %1123 = vector.broadcast %cst_167 : f32 to vector<8x8xf32>
    %1124 = arith.mulf %1123, %1087 : vector<8x8xf32>
    %1125 = arith.mulf %1124, %1087 : vector<8x8xf32>
    %1126 = arith.mulf %1125, %1087 : vector<8x8xf32>
    %1127 = arith.addf %1087, %1126 : vector<8x8xf32>
    %cst_168 = arith.constant 0.797884583 : f32
    %1128 = vector.broadcast %cst_168 : f32 to vector<8x8xf32>
    %1129 = arith.mulf %1128, %1127 : vector<8x8xf32>
    %1130 = math.tanh %1129 : vector<8x8xf32>
    %cst_169 = arith.constant 1.000000e+00 : f32
    %1131 = vector.broadcast %cst_169 : f32 to vector<8x8xf32>
    %1132 = arith.addf %1131, %1130 : vector<8x8xf32>
    %1133 = arith.mulf %1122, %1132 : vector<8x8xf32>
    %1134 = arith.mulf %1133, %1087 : vector<8x8xf32>
    %1135 = arith.mulf %1133, %1093 : vector<8x8xf32>
    %1136 = arith.mulf %1133, %1094 : vector<8x8xf32>
    %1137 = arith.mulf %1133, %1095 : vector<8x8xf32>
    %1138 = arith.mulf %1133, %1096 : vector<8x8xf32>
    %1139 = arith.mulf %1133, %1102 : vector<8x8xf32>
    %1140 = arith.mulf %1133, %1103 : vector<8x8xf32>
    %1141 = arith.mulf %1133, %1104 : vector<8x8xf32>
    %1142 = arith.mulf %1133, %1105 : vector<8x8xf32>
    %1143 = arith.mulf %1133, %1106 : vector<8x8xf32>
    %1144 = arith.mulf %1133, %1107 : vector<8x8xf32>
    %1145 = arith.mulf %1133, %1113 : vector<8x8xf32>
    %1146 = arith.mulf %1133, %1114 : vector<8x8xf32>
    %1147 = arith.mulf %1133, %1115 : vector<8x8xf32>
    %1148 = arith.mulf %1133, %1116 : vector<8x8xf32>
    %1149 = arith.mulf %1133, %1120 : vector<8x8xf32>
    %1150 = arith.truncf %1134 : vector<8x8xf32> to vector<8x8xbf16>
    %c0_170 = arith.constant 0 : index
    %c0_171 = arith.constant 0 : index
    %c0_172 = arith.constant 0 : index
    %1151 = vector.load %arg8[%c0_170, %c0_171, %c0_172] : memref<5x8x8xbf16, #tpu.memory_space<vmem>>, vector<1x8x8xbf16>
    %1152 = vector.shape_cast %1151 : vector<1x8x8xbf16> to vector<8x8xbf16>
    %cst_173 = arith.constant dense<0.000000e+00> : vector<8x8xf32>
    %1153 = tpu.matmul %1150, %1152, %cst_173 {dimension_numbers = #tpu.dot_dimension_numbers<[1], [0], [0], [1], [0, 0, 1, 1], [], []>} : vector<8x8xbf16>, vector<8x8xbf16>, vector<8x8xf32> -> vector<8x8xf32>
    %1154 = tpu.concatenate %1135, %1136, %1137, %1138 in 0 : vector<8x8xf32>, vector<8x8xf32>, vector<8x8xf32>, vector<8x8xf32> -> vector<32x8xf32>
    %1155 = arith.truncf %1154 : vector<32x8xf32> to vector<32x8xbf16>
    %c1_174 = arith.constant 1 : index
    %c0_175 = arith.constant 0 : index
    %c0_176 = arith.constant 0 : index
    %1156 = vector.load %arg8[%c1_174, %c0_175, %c0_176] : memref<5x8x8xbf16, #tpu.memory_space<vmem>>, vector<1x8x8xbf16>
    %1157 = vector.shape_cast %1156 : vector<1x8x8xbf16> to vector<8x8xbf16>
    %cst_177 = arith.constant dense<0.000000e+00> : vector<32x8xf32>
    %1158 = tpu.matmul %1155, %1157, %cst_177 {dimension_numbers = #tpu.dot_dimension_numbers<[1], [0], [0], [1], [0, 0, 1, 1], [], []>} : vector<32x8xbf16>, vector<8x8xbf16>, vector<32x8xf32> -> vector<32x8xf32>
    %1159 = vector.extract_strided_slice %1158 {offsets = [0, 0], sizes = [8, 8], strides = [1, 1]} : vector<32x8xf32> to vector<8x8xf32>
    %1160 = vector.extract_strided_slice %1158 {offsets = [8, 0], sizes = [8, 8], strides = [1, 1]} : vector<32x8xf32> to vector<8x8xf32>
    %1161 = vector.extract_strided_slice %1158 {offsets = [16, 0], sizes = [8, 8], strides = [1, 1]} : vector<32x8xf32> to vector<8x8xf32>
    %1162 = vector.extract_strided_slice %1158 {offsets = [24, 0], sizes = [8, 8], strides = [1, 1]} : vector<32x8xf32> to vector<8x8xf32>
    %1163 = tpu.concatenate %1139, %1140, %1141, %1142, %1143, %1144 in 0 : vector<8x8xf32>, vector<8x8xf32>, vector<8x8xf32>, vector<8x8xf32>, vector<8x8xf32>, vector<8x8xf32> -> vector<48x8xf32>
    %1164 = arith.truncf %1163 : vector<48x8xf32> to vector<48x8xbf16>
    %c2_178 = arith.constant 2 : index
    %c0_179 = arith.constant 0 : index
    %c0_180 = arith.constant 0 : index
    %1165 = vector.load %arg8[%c2_178, %c0_179, %c0_180] : memref<5x8x8xbf16, #tpu.memory_space<vmem>>, vector<1x8x8xbf16>
    %1166 = vector.shape_cast %1165 : vector<1x8x8xbf16> to vector<8x8xbf16>
    %cst_181 = arith.constant dense<0.000000e+00> : vector<48x8xf32>
    %1167 = tpu.matmul %1164, %1166, %cst_181 {dimension_numbers = #tpu.dot_dimension_numbers<[1], [0], [0], [1], [0, 0, 1, 1], [], []>} : vector<48x8xbf16>, vector<8x8xbf16>, vector<48x8xf32> -> vector<48x8xf32>
    %1168 = vector.extract_strided_slice %1167 {offsets = [0, 0], sizes = [8, 8], strides = [1, 1]} : vector<48x8xf32> to vector<8x8xf32>
    %1169 = vector.extract_strided_slice %1167 {offsets = [8, 0], sizes = [8, 8], strides = [1, 1]} : vector<48x8xf32> to vector<8x8xf32>
    %1170 = vector.extract_strided_slice %1167 {offsets = [16, 0], sizes = [8, 8], strides = [1, 1]} : vector<48x8xf32> to vector<8x8xf32>
    %1171 = vector.extract_strided_slice %1167 {offsets = [24, 0], sizes = [8, 8], strides = [1, 1]} : vector<48x8xf32> to vector<8x8xf32>
    %1172 = vector.extract_strided_slice %1167 {offsets = [32, 0], sizes = [8, 8], strides = [1, 1]} : vector<48x8xf32> to vector<8x8xf32>
    %1173 = vector.extract_strided_slice %1167 {offsets = [40, 0], sizes = [8, 8], strides = [1, 1]} : vector<48x8xf32> to vector<8x8xf32>
    %1174 = tpu.concatenate %1145, %1146, %1147, %1148 in 0 : vector<8x8xf32>, vector<8x8xf32>, vector<8x8xf32>, vector<8x8xf32> -> vector<32x8xf32>
    %1175 = arith.truncf %1174 : vector<32x8xf32> to vector<32x8xbf16>
    %c3_182 = arith.constant 3 : index
    %c0_183 = arith.constant 0 : index
    %c0_184 = arith.constant 0 : index
    %1176 = vector.load %arg8[%c3_182, %c0_183, %c0_184] : memref<5x8x8xbf16, #tpu.memory_space<vmem>>, vector<1x8x8xbf16>
    %1177 = vector.shape_cast %1176 : vector<1x8x8xbf16> to vector<8x8xbf16>
    %cst_185 = arith.constant dense<0.000000e+00> : vector<32x8xf32>
    %1178 = tpu.matmul %1175, %1177, %cst_185 {dimension_numbers = #tpu.dot_dimension_numbers<[1], [0], [0], [1], [0, 0, 1, 1], [], []>} : vector<32x8xbf16>, vector<8x8xbf16>, vector<32x8xf32> -> vector<32x8xf32>
    %1179 = vector.extract_strided_slice %1178 {offsets = [0, 0], sizes = [8, 8], strides = [1, 1]} : vector<32x8xf32> to vector<8x8xf32>
    %1180 = vector.extract_strided_slice %1178 {offsets = [8, 0], sizes = [8, 8], strides = [1, 1]} : vector<32x8xf32> to vector<8x8xf32>
    %1181 = vector.extract_strided_slice %1178 {offsets = [16, 0], sizes = [8, 8], strides = [1, 1]} : vector<32x8xf32> to vector<8x8xf32>
    %1182 = vector.extract_strided_slice %1178 {offsets = [24, 0], sizes = [8, 8], strides = [1, 1]} : vector<32x8xf32> to vector<8x8xf32>
    %1183 = arith.truncf %1149 : vector<8x8xf32> to vector<8x8xbf16>
    %c4_186 = arith.constant 4 : index
    %c0_187 = arith.constant 0 : index
    %c0_188 = arith.constant 0 : index
    %1184 = vector.load %arg8[%c4_186, %c0_187, %c0_188] : memref<5x8x8xbf16, #tpu.memory_space<vmem>>, vector<1x8x8xbf16>
    %1185 = vector.shape_cast %1184 : vector<1x8x8xbf16> to vector<8x8xbf16>
    %cst_189 = arith.constant dense<0.000000e+00> : vector<8x8xf32>
    %1186 = tpu.matmul %1183, %1185, %cst_189 {dimension_numbers = #tpu.dot_dimension_numbers<[1], [0], [0], [1], [0, 0, 1, 1], [], []>} : vector<8x8xbf16>, vector<8x8xbf16>, vector<8x8xf32> -> vector<8x8xf32>
    %1187 = arith.addf %314, %1153 : vector<8x8xf32>
    %1188 = arith.addf %315, %1159 : vector<8x8xf32>
    %1189 = arith.addf %316, %1160 : vector<8x8xf32>
    %1190 = arith.addf %317, %1161 : vector<8x8xf32>
    %1191 = arith.addf %318, %1162 : vector<8x8xf32>
    %1192 = arith.addf %319, %1168 : vector<8x8xf32>
    %1193 = arith.addf %320, %1169 : vector<8x8xf32>
    %1194 = arith.addf %321, %1170 : vector<8x8xf32>
    %1195 = arith.addf %322, %1171 : vector<8x8xf32>
    %1196 = arith.addf %323, %1172 : vector<8x8xf32>
    %1197 = arith.addf %324, %1173 : vector<8x8xf32>
    %1198 = arith.addf %325, %1179 : vector<8x8xf32>
    %1199 = arith.addf %326, %1180 : vector<8x8xf32>
    %1200 = arith.addf %327, %1181 : vector<8x8xf32>
    %1201 = arith.addf %328, %1182 : vector<8x8xf32>
    %1202 = arith.addf %329, %1186 : vector<8x8xf32>
    %c0_190 = arith.constant 0 : index
    %c0_191 = arith.constant 0 : index
    %c0_192 = arith.constant 0 : index
    %c0_193 = arith.constant 0 : index
    %1203 = vector.load %arg9[%c0_190, %c0_191, %c0_192, %c0_193] : memref<1x16x8x8xf32, #tpu.memory_space<vmem>>, vector<1x1x8x8xf32>
    %1204 = vector.shape_cast %1203 : vector<1x1x8x8xf32> to vector<8x8xf32>
    %1205 = vector.shape_cast %1187 : vector<8x8xf32> to vector<1x1x8x8xf32>
    tpu.vector_store %arg9[%c0_190, %c0_191, %c0_192, %c0_193], %1205 {strides = array<i32>} : memref<1x16x8x8xf32, #tpu.memory_space<vmem>>, vector<1x1x8x8xf32>,
    %c0_194 = arith.constant 0 : index
    %c1_195 = arith.constant 1 : index
    %c0_196 = arith.constant 0 : index
    %c0_197 = arith.constant 0 : index
    %1206 = vector.load %arg9[%c0_194, %c1_195, %c0_196, %c0_197] : memref<1x16x8x8xf32, #tpu.memory_space<vmem>>, vector<1x1x8x8xf32>
    %1207 = vector.shape_cast %1206 : vector<1x1x8x8xf32> to vector<8x8xf32>
    %1208 = vector.shape_cast %1188 : vector<8x8xf32> to vector<1x1x8x8xf32>
    tpu.vector_store %arg9[%c0_194, %c1_195, %c0_196, %c0_197], %1208 {strides = array<i32>} : memref<1x16x8x8xf32, #tpu.memory_space<vmem>>, vector<1x1x8x8xf32>,
    %c0_198 = arith.constant 0 : index
    %c2_199 = arith.constant 2 : index
    %c0_200 = arith.constant 0 : index
    %c0_201 = arith.constant 0 : index
    %1209 = vector.load %arg9[%c0_198, %c2_199, %c0_200, %c0_201] : memref<1x16x8x8xf32, #tpu.memory_space<vmem>>, vector<1x1x8x8xf32>
    %1210 = vector.shape_cast %1209 : vector<1x1x8x8xf32> to vector<8x8xf32>
    %1211 = vector.shape_cast %1189 : vector<8x8xf32> to vector<1x1x8x8xf32>
    tpu.vector_store %arg9[%c0_198, %c2_199, %c0_200, %c0_201], %1211 {strides = array<i32>} : memref<1x16x8x8xf32, #tpu.memory_space<vmem>>, vector<1x1x8x8xf32>,
    %c0_202 = arith.constant 0 : index
    %c3_203 = arith.constant 3 : index
    %c0_204 = arith.constant 0 : index
    %c0_205 = arith.constant 0 : index
    %1212 = vector.load %arg9[%c0_202, %c3_203, %c0_204, %c0_205] : memref<1x16x8x8xf32, #tpu.memory_space<vmem>>, vector<1x1x8x8xf32>
    %1213 = vector.shape_cast %1212 : vector<1x1x8x8xf32> to vector<8x8xf32>
    %1214 = vector.shape_cast %1190 : vector<8x8xf32> to vector<1x1x8x8xf32>
    tpu.vector_store %arg9[%c0_202, %c3_203, %c0_204, %c0_205], %1214 {strides = array<i32>} : memref<1x16x8x8xf32, #tpu.memory_space<vmem>>, vector<1x1x8x8xf32>,
    %c0_206 = arith.constant 0 : index
    %c4_207 = arith.constant 4 : index
    %c0_208 = arith.constant 0 : index
    %c0_209 = arith.constant 0 : index
    %1215 = vector.load %arg9[%c0_206, %c4_207, %c0_208, %c0_209] : memref<1x16x8x8xf32, #tpu.memory_space<vmem>>, vector<1x1x8x8xf32>
    %1216 = vector.shape_cast %1215 : vector<1x1x8x8xf32> to vector<8x8xf32>
    %1217 = vector.shape_cast %1191 : vector<8x8xf32> to vector<1x1x8x8xf32>
    tpu.vector_store %arg9[%c0_206, %c4_207, %c0_208, %c0_209], %1217 {strides = array<i32>} : memref<1x16x8x8xf32, #tpu.memory_space<vmem>>, vector<1x1x8x8xf32>,
    %c0_210 = arith.constant 0 : index
    %c5_211 = arith.constant 5 : index
    %c0_212 = arith.constant 0 : index
    %c0_213 = arith.constant 0 : index
    %1218 = vector.load %arg9[%c0_210, %c5_211, %c0_212, %c0_213] : memref<1x16x8x8xf32, #tpu.memory_space<vmem>>, vector<1x1x8x8xf32>
    %1219 = vector.shape_cast %1218 : vector<1x1x8x8xf32> to vector<8x8xf32>
    %1220 = vector.shape_cast %1192 : vector<8x8xf32> to vector<1x1x8x8xf32>
    tpu.vector_store %arg9[%c0_210, %c5_211, %c0_212, %c0_213], %1220 {strides = array<i32>} : memref<1x16x8x8xf32, #tpu.memory_space<vmem>>, vector<1x1x8x8xf32>,
    %c0_214 = arith.constant 0 : index
    %c6_215 = arith.constant 6 : index
    %c0_216 = arith.constant 0 : index
    %c0_217 = arith.constant 0 : index
    %1221 = vector.load %arg9[%c0_214, %c6_215, %c0_216, %c0_217] : memref<1x16x8x8xf32, #tpu.memory_space<vmem>>, vector<1x1x8x8xf32>
    %1222 = vector.shape_cast %1221 : vector<1x1x8x8xf32> to vector<8x8xf32>
    %1223 = vector.shape_cast %1193 : vector<8x8xf32> to vector<1x1x8x8xf32>
    tpu.vector_store %arg9[%c0_214, %c6_215, %c0_216, %c0_217], %1223 {strides = array<i32>} : memref<1x16x8x8xf32, #tpu.memory_space<vmem>>, vector<1x1x8x8xf32>,
    %c0_218 = arith.constant 0 : index
    %c7_219 = arith.constant 7 : index
    %c0_220 = arith.constant 0 : index
    %c0_221 = arith.constant 0 : index
    %1224 = vector.load %arg9[%c0_218, %c7_219, %c0_220, %c0_221] : memref<1x16x8x8xf32, #tpu.memory_space<vmem>>, vector<1x1x8x8xf32>
    %1225 = vector.shape_cast %1224 : vector<1x1x8x8xf32> to vector<8x8xf32>
    %1226 = vector.shape_cast %1194 : vector<8x8xf32> to vector<1x1x8x8xf32>
    tpu.vector_store %arg9[%c0_218, %c7_219, %c0_220, %c0_221], %1226 {strides = array<i32>} : memref<1x16x8x8xf32, #tpu.memory_space<vmem>>, vector<1x1x8x8xf32>,
    %c0_222 = arith.constant 0 : index
    %c8_223 = arith.constant 8 : index
    %c0_224 = arith.constant 0 : index
    %c0_225 = arith.constant 0 : index
    %1227 = vector.load %arg9[%c0_222, %c8_223, %c0_224, %c0_225] : memref<1x16x8x8xf32, #tpu.memory_space<vmem>>, vector<1x1x8x8xf32>
    %1228 = vector.shape_cast %1227 : vector<1x1x8x8xf32> to vector<8x8xf32>
    %1229 = vector.shape_cast %1195 : vector<8x8xf32> to vector<1x1x8x8xf32>
    tpu.vector_store %arg9[%c0_222, %c8_223, %c0_224, %c0_225], %1229 {strides = array<i32>} : memref<1x16x8x8xf32, #tpu.memory_space<vmem>>, vector<1x1x8x8xf32>,
    %c0_226 = arith.constant 0 : index
    %c9_227 = arith.constant 9 : index
    %c0_228 = arith.constant 0 : index
    %c0_229 = arith.constant 0 : index
    %1230 = vector.load %arg9[%c0_226, %c9_227, %c0_228, %c0_229] : memref<1x16x8x8xf32, #tpu.memory_space<vmem>>, vector<1x1x8x8xf32>
    %1231 = vector.shape_cast %1230 : vector<1x1x8x8xf32> to vector<8x8xf32>
    %1232 = vector.shape_cast %1196 : vector<8x8xf32> to vector<1x1x8x8xf32>
    tpu.vector_store %arg9[%c0_226, %c9_227, %c0_228, %c0_229], %1232 {strides = array<i32>} : memref<1x16x8x8xf32, #tpu.memory_space<vmem>>, vector<1x1x8x8xf32>,
    %c0_230 = arith.constant 0 : index
    %c10_231 = arith.constant 10 : index
    %c0_232 = arith.constant 0 : index
    %c0_233 = arith.constant 0 : index
    %1233 = vector.load %arg9[%c0_230, %c10_231, %c0_232, %c0_233] : memref<1x16x8x8xf32, #tpu.memory_space<vmem>>, vector<1x1x8x8xf32>
    %1234 = vector.shape_cast %1233 : vector<1x1x8x8xf32> to vector<8x8xf32>
    %1235 = vector.shape_cast %1197 : vector<8x8xf32> to vector<1x1x8x8xf32>
    tpu.vector_store %arg9[%c0_230, %c10_231, %c0_232, %c0_233], %1235 {strides = array<i32>} : memref<1x16x8x8xf32, #tpu.memory_space<vmem>>, vector<1x1x8x8xf32>,
    %c0_234 = arith.constant 0 : index
    %c11_235 = arith.constant 11 : index
    %c0_236 = arith.constant 0 : index
    %c0_237 = arith.constant 0 : index
    %1236 = vector.load %arg9[%c0_234, %c11_235, %c0_236, %c0_237] : memref<1x16x8x8xf32, #tpu.memory_space<vmem>>, vector<1x1x8x8xf32>
    %1237 = vector.shape_cast %1236 : vector<1x1x8x8xf32> to vector<8x8xf32>
    %1238 = vector.shape_cast %1198 : vector<8x8xf32> to vector<1x1x8x8xf32>
    tpu.vector_store %arg9[%c0_234, %c11_235, %c0_236, %c0_237], %1238 {strides = array<i32>} : memref<1x16x8x8xf32, #tpu.memory_space<vmem>>, vector<1x1x8x8xf32>,
    %c0_238 = arith.constant 0 : index
    %c12_239 = arith.constant 12 : index
    %c0_240 = arith.constant 0 : index
    %c0_241 = arith.constant 0 : index
    %1239 = vector.load %arg9[%c0_238, %c12_239, %c0_240, %c0_241] : memref<1x16x8x8xf32, #tpu.memory_space<vmem>>, vector<1x1x8x8xf32>
    %1240 = vector.shape_cast %1239 : vector<1x1x8x8xf32> to vector<8x8xf32>
    %1241 = vector.shape_cast %1199 : vector<8x8xf32> to vector<1x1x8x8xf32>
    tpu.vector_store %arg9[%c0_238, %c12_239, %c0_240, %c0_241], %1241 {strides = array<i32>} : memref<1x16x8x8xf32, #tpu.memory_space<vmem>>, vector<1x1x8x8xf32>,
    %c0_242 = arith.constant 0 : index
    %c13_243 = arith.constant 13 : index
    %c0_244 = arith.constant 0 : index
    %c0_245 = arith.constant 0 : index
    %1242 = vector.load %arg9[%c0_242, %c13_243, %c0_244, %c0_245] : memref<1x16x8x8xf32, #tpu.memory_space<vmem>>, vector<1x1x8x8xf32>
    %1243 = vector.shape_cast %1242 : vector<1x1x8x8xf32> to vector<8x8xf32>
    %1244 = vector.shape_cast %1200 : vector<8x8xf32> to vector<1x1x8x8xf32>
    tpu.vector_store %arg9[%c0_242, %c13_243, %c0_244, %c0_245], %1244 {strides = array<i32>} : memref<1x16x8x8xf32, #tpu.memory_space<vmem>>, vector<1x1x8x8xf32>,
    %c0_246 = arith.constant 0 : index
    %c14_247 = arith.constant 14 : index
    %c0_248 = arith.constant 0 : index
    %c0_249 = arith.constant 0 : index
    %1245 = vector.load %arg9[%c0_246, %c14_247, %c0_248, %c0_249] : memref<1x16x8x8xf32, #tpu.memory_space<vmem>>, vector<1x1x8x8xf32>
    %1246 = vector.shape_cast %1245 : vector<1x1x8x8xf32> to vector<8x8xf32>
    %1247 = vector.shape_cast %1201 : vector<8x8xf32> to vector<1x1x8x8xf32>
    tpu.vector_store %arg9[%c0_246, %c14_247, %c0_248, %c0_249], %1247 {strides = array<i32>} : memref<1x16x8x8xf32, #tpu.memory_space<vmem>>, vector<1x1x8x8xf32>,
    %c0_250 = arith.constant 0 : index
    %c15_251 = arith.constant 15 : index
    %c0_252 = arith.constant 0 : index
    %c0_253 = arith.constant 0 : index
    %1248 = vector.load %arg9[%c0_250, %c15_251, %c0_252, %c0_253] : memref<1x16x8x8xf32, #tpu.memory_space<vmem>>, vector<1x1x8x8xf32>
    %1249 = vector.shape_cast %1248 : vector<1x1x8x8xf32> to vector<8x8xf32>
    %1250 = vector.shape_cast %1202 : vector<8x8xf32> to vector<1x1x8x8xf32>
    tpu.vector_store %arg9[%c0_250, %c15_251, %c0_252, %c0_253], %1250 {strides = array<i32>} : memref<1x16x8x8xf32, #tpu.memory_space<vmem>>, vector<1x1x8x8xf32>,
    return
  }
  func.func @transform_0(%arg0: i32) -> (i32, i32, i32, i32) {
    %c0_i32 = arith.constant 0 : i32
    %c0_i32_0 = arith.constant 0 : i32
    %c0_i32_1 = arith.constant 0 : i32
    %c0_i32_2 = arith.constant 0 : i32
    return %arg0, %c0_i32, %c0_i32_0, %c0_i32_1 : i32, i32, i32, i32
  }
  func.func @transform_1(%arg0: i32) -> (i32, i32, i32) {
    %c0_i32 = arith.constant 0 : i32
    %c0_i32_0 = arith.constant 0 : i32
    %c0_i32_1 = arith.constant 0 : i32
    return %arg0, %c0_i32, %c0_i32_0 : i32, i32, i32
  }
  func.func @transform_2(%arg0: i32) -> (i32, i32, i32) {
    %c0_i32 = arith.constant 0 : i32
    %c0_i32_0 = arith.constant 0 : i32
    %c0_i32_1 = arith.constant 0 : i32
    %c0_i32_2 = arith.constant 0 : i32
    return %c0_i32, %c0_i32_0, %c0_i32_1 : i32, i32, i32
  }
  func.func @transform_3(%arg0: i32) -> (i32, i32, i32) {
    %c0_i32 = arith.constant 0 : i32
    %c0_i32_0 = arith.constant 0 : i32
    %c0_i32_1 = arith.constant 0 : i32
    %c0_i32_2 = arith.constant 0 : i32
    return %c0_i32, %c0_i32_0, %c0_i32_1 : i32, i32, i32
  }
  func.func @transform_4(%arg0: i32) -> (i32, i32, i32) {
    %c0_i32 = arith.constant 0 : i32
    %c0_i32_0 = arith.constant 0 : i32
    %c0_i32_1 = arith.constant 0 : i32
    %c0_i32_2 = arith.constant 0 : i32
    return %c0_i32, %c0_i32_0, %c0_i32_1 : i32, i32, i32
  }
  func.func @transform_5(%arg0: i32) -> (i32, i32, i32) {
    %c0_i32 = arith.constant 0 : i32
    %c0_i32_0 = arith.constant 0 : i32
    %c0_i32_1 = arith.constant 0 : i32
    %c0_i32_2 = arith.constant 0 : i32
    return %c0_i32, %c0_i32_0, %c0_i32_1 : i32, i32, i32
  }
  func.func @transform_6(%arg0: i32) -> (i32, i32, i32) {
    %c0_i32 = arith.constant 0 : i32
    %c0_i32_0 = arith.constant 0 : i32
    %c0_i32_1 = arith.constant 0 : i32
    %c0_i32_2 = arith.constant 0 : i32
    return %c0_i32, %c0_i32_0, %c0_i32_1 : i32, i32, i32
  }
  func.func @transform_7(%arg0: i32) -> (i32, i32, i32) {
    %c0_i32 = arith.constant 0 : i32
    %c0_i32_0 = arith.constant 0 : i32
    %c0_i32_1 = arith.constant 0 : i32
    %c0_i32_2 = arith.constant 0 : i32
    return %c0_i32, %c0_i32_0, %c0_i32_1 : i32, i32, i32
  }
  func.func @transform_8(%arg0: i32) -> (i32, i32, i32, i32) {
    %c0_i32 = arith.constant 0 : i32
    %c0_i32_0 = arith.constant 0 : i32
    %c0_i32_1 = arith.constant 0 : i32
    %c0_i32_2 = arith.constant 0 : i32
    return %arg0, %c0_i32, %c0_i32_0, %c0_i32_1 : i32, i32, i32, i32
  }
}

</mosaic_0001>

<bundles_post_ra>
// kernel: tpu_custom_call.1
= control target key start
LH: loop header
LB: loop body
LE: loop exit
PB: predicated region body
PF: predicated region fallthrough
CT: control target
= control target key end

     0   :  { %s4232_s27 = smov 0   ;;  %s5867_s0 = inlined_call_operand.vmem [shape: f32[2,16,8,8], index: 0, kind: input, shape index: {}]   ;;  %s5868_s1 = inlined_call_operand.vmem [shape: f32[2,1,1], index: 1, kind: input, shape index: {}]   ;;  %s5869_s2 = inlined_call_operand.vmem [shape: bf16[5,8,8], index: 2, kind: input, shape index: {}]   ;;  %s5870_s3 = inlined_call_operand.vmem [shape: bf16[5,8,8], index: 3, kind: input, shape index: {}]   ;;  %s5871_s4 = inlined_call_operand.vmem [shape: bf16[5,8,8], index: 4, kind: input, shape index: {}]   ;;  %s5872_s5 = inlined_call_operand.vmem [shape: bf16[5,8,16], index: 5, kind: input, shape index: {}]   ;;  %s5873_s6 = inlined_call_operand.vmem [shape: bf16[5,8,8], index: 6, kind: input, shape index: {}]   ;;  %s5874_s7 = inlined_call_operand.vmem [shape: bf16[5,8,8], index: 7, kind: input, shape index: {}]   ;;  %s5875_s8 = inlined_call_operand.vmem [shape: f32[2,16,8,8], index: 8, kind: output, shape index: {}]  }
   0x1 LB: > { %s3476_s28 = sadd.s32 4294967295, %s4152_s27   ;;  %p3480_p0 = scmp.ge.s32.totalorder %s4152_s27, 1  ;;  %s4152_s27 = sphi %s4232_s27, %s18_s27  }
   0x2   : > { %p270_p1 = scmp.lt.s32.totalorder %s4152_s27, 3 }
   0x4   : > { %p271_p2 = pnand %p3480_p0, %p270_p1 }
   0x6   : > { %274 = sbr.rel (%p271_p2) target bundleno = 2917 (0xb65), region = 52 }
   0xb   : > { %p307_p3 = scmp.lt.s32.totalorder %s3476_s28, 1  ;;  %vm368_vm0 = vcmask 64512   ;;  %v393_v24 = vld [vmem:[%s5869_s2] sm:$0xf]  ;;  %vm397_vm1 = vcmask 1043456   ;;  %v5876_v26 = vmov 0.0  }
   0xc   : > { %v3501_v25 = vld [vmem:[%s5869_s2 + $0x4] sm:$0xf]  ;;  %3694 = vmatprep.subr.bf16.mxu0 %v5876_v26  ;;  %v399_v27 = vsel %vm397_vm1, %v393_v24, 0  ;;  %vm4155_vm2 = vmmov 0   ;;  %v3508_v29 = vld [vmem:[%s5869_s2 + $0xc] sm:$0xf] }
   0xd   : > { %s6098_s28 = smov (!%p307_p3, %s3476_s28), 1  ;;  %3946 = vmatprep.subr.msk.bf16.mxu1 %vm397_vm1, %v3501_v25  ;;  %v452_v28 = vsel %vm397_vm1, %v3501_v25, 0  ;;  %3695 = vmatpush3.bf16.msra.mxu0 %v399_v27  ;;  %v3504_v37 = vld [vmem:[%s5869_s2 + $0x8] sm:$0xf]  ;;  %v588_v49 = vsel %vm397_vm1, %v3508_v29, 0  ;;  %s4156_s21 = smov 8  }
   0xe   : > { %s3600_s29 = sshll.u32 %s6098_s28, 7  ;;  %3701 = vmatpush3.bf16.msra.mxu1 %v452_v28  ;;  %3696 = vmatprep.mubr.msk.bf16.mxu0 %vm4155_vm2, %v5876_v26  ;;  %v518_v47 = vsel %vm397_vm1, %v3504_v37, 0  ;;  %v3511_v58 = vld [vmem:[%s5869_s2 + $0x10] sm:$0xf]  ;;  %s4157_s22 = smov 12   ;;  %vm716_vm3 = vcmask 31744  }
   0xf   : > { %s4248_s10 = scalar_lea.vmem %s5867_s0, %s3600_s29  ;;  %3706 = vmatprep.subr.bf16.mxu0 %v5876_v26  ;;  %3947 = vmatprep.subr.msk.bf16.mxu1 %vm397_vm1, %v3508_v29  ;;  %v646_v61 = vsel %vm397_vm1, %v3511_v58, 0  ;;  %s4158_s23 = smov 4   ;;  %vm719_vm4 = vcmask 97280   ;;  %vm723_vm5 = vcmask 162816   ;;  %vm721_vm6 = vcmask 130048  }
  0x10   : > { %v321_v0 = vld [vmem:[%s4248_s10] sm:$0xff]  ;;  %v3486_v1 = vld [vmem:[%s4248_s10 + $0x10] sm:$0xff]  ;;  %v3487_v2 = vld [vmem:[%s4248_s10 + $0x18] sm:$0xff]  ;;  %s4159_s24 = smov 124   ;;  %s4160_s25 = smov 28   ;;  %vm725_vm7 = vcmask 195584  }
  0x11   : > { %v3488_v3 = vld [vmem:[%s4248_s10 + $0x20] sm:$0xff]  ;;  %v353_v4 = vmul.f32 %v321_v0, %v321_v0  ;;  %v354_v5 = vmul.f32 %v3486_v1, %v3486_v1  ;;  %v356_v6 = vmul.f32 %v3487_v2, %v3487_v2  ;;  %v4258_v10 = vld [vmem:[%s4248_s10 + $0x48] sm:$0xff]  ;;  %v4263_v13 = vld [vmem:[%s4248_s10 + $0x50] sm:$0xff]  ;;  %s4161_s26 = smov 16   ;;  %s4162_s30 = smov 20   ;;  %vm727_vm8 = vcmask 228352  }
  0x12   : > { %v4255_v7 = vld [vmem:[%s4248_s10 + $0x40] sm:$0xff]  ;;  %v358_v9 = vmul.f32 %v3488_v3, %v3488_v3  ;;  %v362_v15 = vmul.f32 %v4258_v10, %v4258_v10  ;;  %v3498_v16 = vld [vmem:[%s4248_s10 + $0x70] sm:$0xff]  ;;  %v364_v18 = vmul.f32 %v4263_v13, %v4263_v13  ;;  %v3485_v33 = vld [vmem:[%s4248_s10 + $0x8] sm:$0xff]  ;;  %s4163_s9 = smov 24   ;;  %vm730_vm9 = vcmask 261120   ;;  %s4164_s11 = smov 36  }
  0x13   : > { %v355_v8 = vadd.f32 %v354_v5, %v353_v4  ;;  %v360_v12 = vmul.f32 %v4255_v7, %v4255_v7  ;;  %v366_v20 = vmul.f32 %v3498_v16, %v3498_v16  ;;  %v3495_v34 = vld [vmem:[%s4248_s10 + $0x58] sm:$0xff]  ;;  %v3496_v35 = vld [vmem:[%s4248_s10 + $0x60] sm:$0xff]  ;;  %v3489_v50 = vld [vmem:[%s4248_s10 + $0x28] sm:$0xff]  ;;  %s4165_s12 = smov 44   ;;  %s4166_s13 = smov 52   ;;  %vm847_vm10 = vcmask 293888  }
  0x14   : > { %v3490_v51 = vld [vmem:[%s4248_s10 + $0x30] sm:$0xff]  ;;  %v3497_v53 = vld [vmem:[%s4248_s10 + $0x68] sm:$0xff]  ;;  %v3491_v62 = vld [vmem:[%s4248_s10 + $0x38] sm:$0xff]  ;;  %s4167_s14 = smov 32   ;;  %s4168_s15 = smov 60   ;;  %vm849_vm11 = vcmask 326656  }
  0x15   : > { %v357_v11 = vadd.f32 %v356_v6, %v355_v8  ;;  %v3499_v63 = vld [vmem:[%s4248_s10 + $0x78] sm:$0xff]  ;;  %s4169_s16 = smov 40   ;;  %s4170_s17 = smov 48   ;;  %vm851_vm12 = vcmask 359424   ;;  %vm853_vm13 = vcmask 392192   ;;  %vm855_vm14 = vcmask 424960  }
  0x16   : > { %s4171_s18 = smov 56   ;;  %vm857_vm15 = vcmask 457728   ;;  %s4183_s19 = smov 76  }
  0x17   : > { %v359_v14 = vadd.f32 %v358_v9, %v357_v11  ;;  %s4184_s20 = smov 72  }
  0x19   : > { %v361_v17 = vadd.f32 %v360_v12, %v359_v14 }
  0x1b   : > { %v363_v19 = vadd.f32 %v362_v15, %v361_v17 }
  0x1d   : > { %v365_v21 = vadd.f32 %v364_v18, %v363_v19 }
  0x1f   : > { %v367_v22 = vadd.f32 %v366_v20, %v365_v21 }
  0x21   : > { %v369_v23 = vsel %vm368_vm0, %v367_v22, 0.0 }
  0x22   : > { %370 = vadd.xlane.f32.xlu0 %v369_v23 }
  0xab   : > { %v371_v30 = vpop.xlane.xlu0 %370 }
  0xac   : > { %v373_v31 = vmul.f32 0.125, %v371_v30 }
  0xae   : > { %v374_v32 = vadd.f32 1e-06, %v373_v31 }
  0xb0   : > { %4116 = vrsqrt.f32 %v374_v32 }
  0xbd   : > { %v4117_v36 = vpop.eup %4116 }
  0xbe   : > { %v376_v38 = vmul.f32 %v4117_v36, %v321_v0  ;;  %v377_v39 = vmul.f32 %v4117_v36, %v3485_v33  ;;  %v378_v40 = vmul.f32 %v4117_v36, %v3486_v1  ;;  %v379_v41 = vmul.f32 %v4117_v36, %v3487_v2 }
  0xbf   : > { %v380_v42 = vmul.f32 %v4117_v36, %v3488_v3  ;;  %v387_v43 = vmul.f32 %v4117_v36, %v3495_v34  ;;  %v388_v44 = vmul.f32 %v4117_v36, %v3496_v35  ;;  %v381_v54 = vmul.f32 %v4117_v36, %v3489_v50 }
  0xc0   : > { %v392_v45 = vpack.c.bf16 %v376_v38, %v376_v38  ;;  %v441_v46 = vpack.c.bf16 %v378_v40, %v377_v39  ;;  %v382_v55 = vmul.f32 %v4117_v36, %v3490_v51  ;;  %v389_v56 = vmul.f32 %v4117_v36, %v3497_v53 }
  0xc1   : > { %v442_v48 = vpack.c.bf16 %v380_v42, %v379_v41  ;;  %v577_v52 = vpack.c.bf16 %v388_v44, %v387_v43  ;;  %v390_v57 = vmul.f32 %v4117_v36, %v3498_v16  ;;  %v383_v0 = vmul.f32 %v4117_v36, %v3491_v62 }
  0xc2   : > { %3697 = vmatmul.mubr.msk.bf16.vlgmr.msra.gmra.mxu0 %vm368_vm0, %v392_v45  ;;  %3702 = vmatprep.mubr.msk.bf16.mxu1 %vm368_vm0, %v441_v46  ;;  %v503_v59 = vpack.c.bf16 %v382_v55, %v381_v54  ;;  %v384_v1 = vmul.f32 %v4117_v36, %v4255_v7  ;;  %v391_v2 = vmul.f32 %v4117_v36, %v3499_v63 }
  0xc3   : > { %3703 = vmatmul.mubr.msk.bf16.vlgmr.msra.gmra.mxu1 %vm368_vm0, %v442_v48  ;;  %3707 = vmatpush3.bf16.msra.mxu0 %v518_v47  ;;  %v578_v60 = vpack.c.bf16 %v390_v57, %v389_v56  ;;  %v385_v5 = vmul.f32 %v4117_v36, %v4258_v10  ;;  %v386_v6 = vmul.f32 %v4117_v36, %v4263_v13 }
  0xc4   : > { %3722 = vmatprep.mubr.msk.bf16.mxu1 %vm368_vm0, %v577_v52  ;;  %3721 = vmatpush3.bf16.msra.mxu1 %v588_v49  ;;  %v504_v3 = vpack.c.bf16 %v384_v1, %v383_v0  ;;  %v639_v4 = vpack.c.bf16 %v391_v2, %v391_v2 }
  0xc5   : > { %3708 = vmatprep.mubr.msk.bf16.mxu0 %vm4155_vm2, %v5876_v26  ;;  %3726 = vmatprep.subr.bf16.mxu1 %v5876_v26  ;;  %v505_v7 = vpack.c.bf16 %v386_v6, %v385_v5 }
  0xc6   : > { %3738 = vmatprep.subr.bf16.mxu0 %v5876_v26 }
  0xca   : > { %3709 = vmatmul.mubr.msk.bf16.vlgmr.msra.gmra.mxu0 %vm368_vm0, %v503_v59 }
  0xcb   : > { %3723 = vmatmul.mubr.msk.bf16.vlgmr.msra.gmra.mxu1 %vm368_vm0, %v578_v60  ;;  %3712 = vmatprep.mubr.msk.bf16.mxu0 %vm4155_vm2, %v5876_v26 }
  0xcc   : > { %3727 = vmatpush3.bf16.msra.mxu1 %v646_v61  ;;  %3728 = vmatprep.mubr.msk.bf16.mxu1 %vm4155_vm2, %v5876_v26 }
  0xcd   : > { %3732 = vmatprep.subr.bf16.mxu1 %v5876_v26 }
  0xd2   : > { %3713 = vmatmul.mubr.msk.bf16.gmra.mxu0 %vm368_vm0, %v504_v3 }
  0xd3   : > { %3729 = vmatmul.mubr.msk.bf16.vlgmr.msra.gmra.mxu1 %vm368_vm0, %v639_v4  ;;  %3716 = vmatprep.mubr.msk.bf16.mxu0 %vm4155_vm2, %v5876_v26 }
  0xd4   : > { %3734 = vmatprep.mubr.msk.bf16.mxu1 %vm4155_vm2, %v5876_v26 }
  0xda   : > { %3717 = vmatmul.mubr.msk.bf16.gmra.mxu0 %vm368_vm0, %v505_v7 }
  0xdb   : > { %3740 = vmatprep.mubr.msk.bf16.mxu0 %vm4155_vm2, %v5876_v26 }
 0x182   : > { %v4332_v8 = vpop.f32.mrf.mxu0 }
 0x183   : > { %v4334_v9 = vpop.f32.mrf.mxu1 }
 0x184   : > { %693 = vrot.lane.b32.xlu1 %v4334_v9, %s4156_s21  ;;  %v3698_v10 = vpop.f32.mrf.mxu0 }
 0x185   : > { %v4338_v11 = vpop.f32.mrf.mxu1 }
 0x186   : > { %v438_v12 = vpop.f32.mrf.mxu0 }
 0x187   : > { %v4340_v13 = vpop.f32.mrf.mxu1 }
 0x188   : > { %697 = vrot.lane.b32.xlu1 %v4340_v13, %s4157_s22  ;;  %v3699_v14 = vpop.f32.mrf.mxu0 }
 0x189   : > { %v4344_v15 = vpop.f32.mrf.mxu1 }
 0x18a   : > { %689 = vrot.lane.b32.xlu0 %v4344_v15, %s4158_s23  ;;  %v4348_v16 = vpop.f32.mrf.mxu0 }
 0x18b   : > { %v3999_v17 = vpack.i.bf16 %v4348_v16, %v4340_v13  ;;  %v4352_v18 = vpop.f32.mrf.mxu1 }
 0x18c   : > { %910 = vrot.lane.b32.xlu1 %v4332_v8, %s4159_s24  ;;  %v3710_v19 = vpop.f32.mrf.mxu0 }
 0x18d   : > { %v4356_v20 = vpop.f32.mrf.mxu1 }
 0x18e   : > { %913 = vrot.lane.b32.xlu0 %v4334_v9, %s4158_s23  ;;  %v4360_v21 = vpop.f32.mrf.mxu0 }
 0x18f   : > { %v4004_v22 = vpack.i.bf16 %v4360_v21, %v4348_v16  ;;  %v4364_v23 = vpop.f32.mrf.mxu1 }
 0x190   : > { %713 = vrot.lane.b32.xlu1 %v4364_v23, %s4160_s25  ;;  %v3711_v24 = vpop.f32.mrf.mxu0 }
 0x191   : > { %v4368_v25 = vpop.f32.mrf.mxu1 }
 0x192   : > { %v4370_v27 = vpop.f32.mrf.mxu0 }
 0x193   : > { %v4372_v28 = vpop.f32.mrf.mxu1 }
 0x194   : > { %v3714_v29 = vpop.f32.mrf.mxu0 }
 0x195   : > { %v3730_v30 = vpop.f32.mrf.mxu1 }
 0x196   : > { %v4374_v31 = vpop.f32.mrf.mxu0 }
 0x197   : > { %v685_v32 = vpop.f32.mrf.mxu1  ;;  %919 = vrot.lane.b32.xlu0 %v4374_v31, %s4157_s22  ;;  %701 = vrot.lane.b32.xlu1 %v4374_v31, %s4161_s26 }
 0x198   : > { %v3715_v33 = vpop.f32.mrf.mxu0 }
 0x199   : > { %v3731_v34 = vpop.f32.mrf.mxu1 }
 0x19a   : > { %v4380_v35 = vpop.f32.mrf.mxu0 }
 0x19b   : > { %705 = vrot.lane.b32.xlu1 %v4380_v35, %s4162_s30 }
 0x19c   : > { %v3718_v36 = vpop.f32.mrf.mxu0 }
 0x19e   : > { %v4384_v37 = vpop.f32.mrf.mxu0 }
 0x19f   : > { %925 = vrot.lane.b32.xlu0 %v4384_v37, %s4162_s30  ;;  %709 = vrot.lane.b32.xlu1 %v4384_v37, %s4163_s9 }
 0x1a0   : > { %v3719_v38 = vpop.f32.mrf.mxu0 }
 0x1a3   : > { %916 = vrot.lane.b32.xlu1 %v4340_v13, %s4156_s21 }
 0x1a7   : > { %922 = vrot.lane.b32.xlu1 %v4380_v35, %s4161_s26 }
 0x1ab   : > { %928 = vrot.lane.b32.xlu1 %v4364_v23, %s4163_s9 }
 0x1f6   : > { %v4396_v39 = vpop.permute.xlu1 %693 }
 0x1fa   : > { %v4398_v40 = vpop.permute.xlu1 %697 }
 0x1fc   : > { %v690_v42 = vpop.permute.xlu0 %689 }
 0x1fd   : > { %v717_v46 = vsel %vm716_vm3, %v4332_v8, %v690_v42 }
 0x1fe   : > { %v911_v41 = vpop.permute.xlu1 %910  ;;  %v718_v48 = vsel %vm368_vm0, %v717_v46, %v4396_v39 }
 0x1ff   : > { %v1027_v43 = vsel %vm716_vm3, %v911_v41, %v4338_v11  ;;  %v720_v50 = vsel %vm719_vm4, %v718_v48, %v4398_v40  ;;  %v931_v54 = vsel %vm716_vm3, %v911_v41, %v4344_v15 }
 0x200   : > { %v4403_v44 = vsel %vm368_vm0, %v1027_v43, %v690_v42  ;;  %v914_v55 = vpop.permute.xlu0 %913 }
 0x201   : > { %v932_v59 = vsel %vm368_vm0, %v931_v54, %v914_v55  ;;  %v1029_v42 = vsel %vm719_vm4, %v4403_v44, %v4396_v39 }
 0x202   : > { %v714_v45 = vpop.permute.xlu1 %713 }
 0x209   : > { %v702_v47 = vpop.permute.xlu1 %701  ;;  %v920_v63 = vpop.permute.xlu0 %919 }
 0x20a   : > { %v722_v51 = vsel %vm721_vm6, %v720_v50, %v702_v47  ;;  %v1030_v50 = vsel %vm721_vm6, %v1029_v42, %v4398_v40 }
 0x20d   : > { %v706_v49 = vpop.permute.xlu1 %705 }
 0x20e   : > { %v724_v52 = vsel %vm723_vm5, %v722_v51, %v706_v49 }
 0x211   : > { %v710_v53 = vpop.permute.xlu1 %709  ;;  %v926_v3 = vpop.permute.xlu0 %925 }
 0x212   : > { %v726_v56 = vsel %vm725_vm7, %v724_v52, %v710_v53 }
 0x213   : > { %v728_v57 = vsel %vm727_vm8, %v726_v56, %v714_v45 }
 0x214   : > { %v729_v58 = vpack.c.bf16 %v728_v57, %v728_v57 }
 0x215   : > { %v917_v60 = vpop.permute.xlu1 %916 }
 0x216   : > { %v933_v61 = vsel %vm719_vm4, %v932_v59, %v917_v60  ;;  %v732_v62 = vsel %vm730_vm9, %v729_v58, 0 }
 0x217   : > { %3733 = vmatpush3.bf16.xpose.msra.mxu1 %v732_v62  ;;  %v934_v0 = vsel %vm721_vm6, %v933_v61, %v920_v63 }
 0x218   : > { %3744 = vmatprep.subr.bf16.mxu1 %v5876_v26 }
 0x219   : > { %v923_v1 = vpop.permute.xlu1 %922 }
 0x21a   : > { %v935_v2 = vsel %vm723_vm5, %v934_v0, %v923_v1 }
 0x21b   : > { %v936_v4 = vsel %vm725_vm7, %v935_v2, %v926_v3 }
 0x21d   : > { %v929_v5 = vpop.permute.xlu1 %928 }
 0x21e   : > { %v937_v6 = vsel %vm727_vm8, %v936_v4, %v929_v5  ;;  %3735 = vmatmul.mubr.msk.bf16.vlgmr.msra.gmra.mxu1 %vm730_vm9, %v729_v58 }
 0x21f   : > { %v938_v7 = vpack.c.bf16 %v937_v6, %v937_v6  ;;  %3746 = vmatprep.mubr.msk.bf16.mxu1 %vm4155_vm2, %v5876_v26 }
 0x221   : > { %v940_v10 = vsel %vm730_vm9, %v938_v7, 0 }
 0x222   : > { %3745 = vmatpush3.bf16.xpose.msra.mxu1 %v940_v10 }
 0x223   : > { %3756 = vmatprep.subr.bf16.mxu1 %v5876_v26 }
 0x229   : > { %3747 = vmatmul.mubr.msk.bf16.vlgmr.msra.gmra.mxu1 %vm730_vm9, %v938_v7 }
 0x22a   : > { %3758 = vmatprep.mubr.msk.bf16.mxu1 %vm4155_vm2, %v5876_v26 }
 0x2de   : > { %v768_v12 = vpop.f32.mrf.mxu1 }
 0x2df   : > { %v774_v14 = vmul.f32 0.17677669, %v768_v12 }
 0x2e0   : > { %v3736_v19 = vpop.f32.mrf.mxu1 }
 0x2e1   : > { %v775_v24 = vsel %vm368_vm0, %v774_v14, -inf }
 0x2e2   : > { %776 = vmax.xlane.f32.xlu0 %v775_v24  ;;  %v771_v29 = vpop.f32.mrf.mxu1 }
 0x2e4   : > { %v3737_v30 = vpop.f32.mrf.mxu1 }
 0x2e9   : > { %v976_v32 = vpop.f32.mrf.mxu1 }
 0x2ea   : > { %v982_v33 = vmul.f32 0.17677669, %v976_v32 }
 0x2eb   : > { %v3748_v34 = vpop.f32.mrf.mxu1 }
 0x2ec   : > { %v983_v36 = vsel %vm368_vm0, %v982_v33, -inf }
 0x2ed   : > { %984 = vmax.xlane.f32.xlu1 %v983_v36  ;;  %v979_v38 = vpop.f32.mrf.mxu1 }
 0x2ef   : > { %v3749_v41 = vpop.f32.mrf.mxu1 }
 0x2f8   : > { %790 = vrot.lane.b32.xlu0 %v4344_v15, %s4156_s21  ;;  %v4009_v15 = vpack.i.bf16 %v4370_v27, %v4360_v21  ;;  %s4185_s21 = smov 68  }
 0x2fc   : > { %4005 = vrot.lane.b32.xlu0 %v4004_v22, %s4162_s30  ;;  %s4174_s30 = smov 104  }
 0x2fe   : > { %787 = vrot.lane.b32.xlu1 %v4338_v11, %s4158_s23 }
 0x300   : > { %808 = vrot.lane.b32.xlu0 %v4370_v27, %s4160_s25 }
 0x302   : > { %793 = vrot.lane.b32.xlu1 %v4334_v9, %s4157_s22 }
 0x304   : > { %814 = vrot.lane.b32.xlu0 %v4380_v35, %s4164_s11 }
 0x306   : > { %4000 = vrot.lane.b32.xlu1 %v3999_v17, %s4161_s26  ;;  %s4173_s26 = smov 112  }
 0x308   : > { %821 = vrot.lane.b32.xlu0 %v4356_v20, %s4165_s12 }
 0x30a   : > { %4010 = vrot.lane.b32.xlu1 %v4009_v15, %s4163_s9  ;;  %s4175_s9 = smov 120  }
 0x30c   : > { %829 = vrot.lane.b32.xlu0 %v4352_v18, %s4166_s13 }
 0x30e   : > { %811 = vrot.lane.b32.xlu1 %v4374_v31, %s4167_s14 }
 0x310   : > { %836 = vrot.lane.b32.xlu0 %v4372_v28, %s4168_s15  ;;  %s4179_s15 = smov 92  }
 0x312   : > { %817 = vrot.lane.b32.xlu1 %v4384_v37, %s4169_s16 }
 0x314   : > { %1006 = vrot.lane.b32.xlu0 %v4380_v35, %s4167_s14  ;;  %s4178_s14 = smov 96  }
 0x316   : > { %825 = vrot.lane.b32.xlu1 %v4368_v25, %s4170_s17 }
 0x318   : > { %1012 = vrot.lane.b32.xlu0 %v4356_v20, %s4169_s16  ;;  %s4180_s16 = smov 88  }
 0x31a   : > { %832 = vrot.lane.b32.xlu1 %v4364_v23, %s4171_s18 }
 0x31c   : > { %1018 = vrot.lane.b32.xlu0 %v4352_v18, %s4170_s17  ;;  %s4181_s17 = smov 84  }
 0x31e   : > { %1003 = vrot.lane.b32.xlu1 %v4374_v31, %s4160_s25  ;;  %s4172_s25 = smov 108  }
 0x322   : > { %1009 = vrot.lane.b32.xlu1 %v4384_v37, %s4164_s11 }
 0x326   : > { %1015 = vrot.lane.b32.xlu1 %v4368_v25, %s4165_s12  ;;  %s4176_s12 = smov 116  }
 0x32a   : > { %1021 = vrot.lane.b32.xlu1 %v4364_v23, %s4166_s13  ;;  %s4177_s13 = smov 100  }
 0x36b   : > { %v777_v9 = vpop.xlane.xlu0 %776 }
 0x36c   : > { %v778_v11 = vsub.f32 %v774_v14, %v777_v9 }
 0x36e   : > { %v779_v13 = vmul.f32 1.442695, %v778_v11 }
 0x36f   : > { %v791_v16 = vpop.permute.xlu0 %790 }
 0x370   : > { %4118 = vpow2.f32 %v779_v13 }
 0x373   : > { %v4006_v17 = vpop.permute.xlu0 %4005 }
 0x374   : > { %v4008_v48 = vunpack.i.h.bf16 %v4006_v17  ;;  %v4007_v53 = vunpack.i.l.bf16 %v4006_v17 }
 0x376   : > { %v985_v20 = vpop.xlane.xlu1 %984 }
 0x377   : > { %v986_v21 = vsub.f32 %v982_v33, %v985_v20  ;;  %v809_v27 = vpop.permute.xlu0 %808 }
 0x379   : > { %v987_v22 = vmul.f32 1.442695, %v986_v21 }
 0x37a   : > { %v788_v18 = vpop.permute.xlu1 %787 }
 0x37b   : > { %4120 = vpow2.f32 %v987_v22  ;;  %v815_v37 = vpop.permute.xlu0 %814  ;;  %v839_v23 = vsel %vm716_vm3, %v4332_v8, %v788_v18 }
 0x37c   : > { %v840_v45 = vsel %vm368_vm0, %v839_v23, %v791_v16 }
 0x37d   : > { %v4471_v35 = vpop.eup %4118 }
 0x37e   : > { %v794_v31 = vpop.permute.xlu1 %793  ;;  %v781_v25 = vsel %vm368_vm0, %v4471_v35, 0.0 }
 0x37f   : > { %782 = vadd.xlane.f32.xlu0 %v781_v25  ;;  %v841_v49 = vsel %vm719_vm4, %v840_v45, %v794_v31  ;;  %v822_v51 = vpop.permute.xlu0 %821  ;;  %vm859_vm4 = vcmask 490496  }
 0x382   : > { %v4001_v43 = vpop.permute.xlu1 %4000 }
 0x383   : > { %v4003_v46 = vunpack.i.h.bf16 %v4001_v43  ;;  %v4002_v47 = vunpack.i.l.bf16 %v4001_v43  ;;  %v830_v62 = vpop.permute.xlu0 %829 }
 0x385   : > { %v1031_v52 = vsel %vm723_vm5, %v1030_v50, %v4003_v46  ;;  %v842_v8 = vsel %vm721_vm6, %v841_v49, %v4002_v47  ;;  %v3518_v50 = vld [vmem:[%s5870_s3 + $0x4] sm:$0xf] }
 0x386   : > { %v4011_v54 = vpop.permute.xlu1 %4010  ;;  %v1032_v39 = vsel %vm725_vm7, %v1031_v52, %v4008_v48  ;;  %v843_v57 = vsel %vm723_vm5, %v842_v8, %v4007_v53 }
 0x387   : > { %v4013_v44 = vunpack.i.h.bf16 %v4011_v54  ;;  %v4012_v55 = vunpack.i.l.bf16 %v4011_v54  ;;  %v837_v3 = vpop.permute.xlu0 %836 }
 0x388   : > { %v4121_v56 = vpop.eup %4120 }
 0x389   : > { %v989_v58 = vsel %vm368_vm0, %v4121_v56, 0.0  ;;  %v844_v59 = vsel %vm725_vm7, %v843_v57, %v4012_v55  ;;  %v1033_v40 = vsel %vm727_vm8, %v1032_v39, %v4013_v44  ;;  %v1257_v39 = vsel %vm397_vm1, %v3518_v50, 0  ;;  %v4538_v55 = vld [vmem:[%s5870_s3 + $0xc] sm:$0xf] }
 0x38a   : > { %990 = vadd.xlane.f32.xlu0 %v989_v58  ;;  %v812_v60 = vpop.permute.xlu1 %811  ;;  %v845_v61 = vsel %vm727_vm8, %v844_v59, %v809_v27 }
 0x38b   : > { %v846_v63 = vsel %vm730_vm9, %v845_v61, %v812_v60  ;;  %v1007_v12 = vpop.permute.xlu0 %1006 }
 0x38c   : > { %v848_v1 = vsel %vm847_vm10, %v846_v63, %v815_v37 }
 0x38e   : > { %v818_v0 = vpop.permute.xlu1 %817 }
 0x38f   : > { %v850_v2 = vsel %vm849_vm11, %v848_v1, %v818_v0  ;;  %v1013_v34 = vpop.permute.xlu0 %1012 }
 0x390   : > { %v852_v5 = vsel %vm851_vm12, %v850_v2, %v822_v51 }
 0x392   : > { %v826_v4 = vpop.permute.xlu1 %825 }
 0x393   : > { %v854_v6 = vsel %vm853_vm13, %v852_v5, %v826_v4  ;;  %v1019_v9 = vpop.permute.xlu0 %1018 }
 0x394   : > { %v856_v10 = vsel %vm855_vm14, %v854_v6, %v830_v62 }
 0x396   : > { %v833_v7 = vpop.permute.xlu1 %832 }
 0x397   : > { %v858_v14 = vsel %vm857_vm15, %v856_v10, %v833_v7 }
 0x398   : > { %v860_v19 = vsel %vm859_vm4, %v858_v14, %v837_v3 }
 0x399   : > { %v861_v24 = vpack.c.bf16 %v860_v19, %v860_v19 }
 0x39a   : > { %v1004_v29 = vpop.permute.xlu1 %1003 }
 0x39b   : > { %v1034_v30 = vsel %vm730_vm9, %v1033_v40, %v1004_v29  ;;  %v867_v32 = vsel %vm397_vm1, %v861_v24, 0 }
 0x39c   : > { %3739 = vmatpush3.bf16.msra.mxu0 %v867_v32  ;;  %v1035_v33 = vsel %vm847_vm10, %v1034_v30, %v1007_v12 }
 0x39d   : > { %3750 = vmatprep.subr.bf16.mxu0 %v5876_v26 }
 0x39e   : > { %v1010_v36 = vpop.permute.xlu1 %1009 }
 0x39f   : > { %v1036_v38 = vsel %vm849_vm11, %v1035_v33, %v1010_v36 }
 0x3a0   : > { %1024 = vrot.lane.b32.xlu0 %v4372_v28, %s4171_s18  ;;  %v1037_v41 = vsel %vm851_vm12, %v1036_v38, %v1013_v34  ;;  %s4182_s18 = smov 80  }
 0x3a2   : > { %v1016_v15 = vpop.permute.xlu1 %1015 }
 0x3a3   : > { %v1038_v11 = vsel %vm853_vm13, %v1037_v41, %v1016_v15 }
 0x3a4   : > { %v1039_v13 = vsel %vm855_vm14, %v1038_v11, %v1019_v9 }
 0x3a6   : > { %v1022_v16 = vpop.permute.xlu1 %1021 }
 0x3a7   : > { %v1040_v17 = vsel %vm857_vm15, %v1039_v13, %v1022_v16  ;;  %v1393_v16 = vsel %vm397_vm1, %v4538_v55, 0 }
 0x408   : > { %v783_v20 = vpop.xlane.xlu0 %782 }
 0x409   : > { %4122 = vrcp.f32 %v783_v20 }
 0x413   : > { %v991_v21 = vpop.xlane.xlu0 %990 }
 0x414   : > { %4124 = vrcp.f32 %v991_v21 }
 0x416   : > { %v4123_v22 = vpop.eup %4122 }
 0x417   : > { %v785_v27 = vmul.f32 %v4123_v22, %v4471_v35  ;;  %v1025_v18 = vpop.permute.xlu0 %1024  ;;  %v1199_v35 = vld [vmem:[%s5870_s3] sm:$0xf] }
 0x418   : > { %v1041_v28 = vsel %vm859_vm4, %v1040_v17, %v1025_v18  ;;  %v1204_v45 = vsel %vm397_vm1, %v1199_v35, 0 }
 0x419   : > { %v862_v31 = vpack.c.bf16 %v785_v27, %v785_v27  ;;  %v1042_v25 = vpack.c.bf16 %v1041_v28, %v1041_v28  ;;  %3757 = vmatpush3.bf16.msra.mxu1 %v1204_v45 }
 0x41a   : > { %3768 = vmatprep.subr.bf16.mxu1 %v5876_v26 }
 0x41b   : > { %3741 = vmatmul.mubr.msk.bf16.vlgmr.msra.gmra.mxu0 %vm368_vm0, %v862_v31  ;;  %v1048_v37 = vsel %vm397_vm1, %v1042_v25, 0 }
 0x41c   : > { %3751 = vmatpush3.bf16.msra.mxu0 %v1048_v37  ;;  %3752 = vmatprep.mubr.msk.bf16.mxu0 %vm4155_vm2, %v5876_v26 }
 0x41d   : > { %3948 = vmatprep.subr.msk.bf16.mxu0 %vm397_vm1, %v3518_v50 }
 0x421   : > { %v4125_v23 = vpop.eup %4124 }
 0x422   : > { %v993_v42 = vmul.f32 %v4125_v23, %v4121_v56  ;;  %v3521_v56 = vld [vmem:[%s5870_s3 + $0x8] sm:$0xf] }
 0x423   : > { %v1323_v60 = vsel %vm397_vm1, %v3521_v56, 0 }
 0x424   : > { %v1043_v43 = vpack.c.bf16 %v993_v42, %v993_v42 }
 0x426   : > { %3753 = vmatmul.mubr.msk.bf16.vlgmr.msra.gmra.mxu0 %vm368_vm0, %v1043_v43 }
 0x427   : > { %3763 = vmatpush3.bf16.msra.mxu0 %v1257_v39 }
 0x428   : > { %3949 = vmatprep.subr.msk.bf16.mxu0 %vm397_vm1, %v4538_v55 }
 0x4db   : > { %v903_v46 = vpop.f32.mrf.mxu0 }
 0x4dd   : > { %v3742_v47 = vpop.f32.mrf.mxu0 }
 0x4df   : > { %v906_v48 = vpop.f32.mrf.mxu0 }
 0x4e1   : > { %v3743_v49 = vpop.f32.mrf.mxu0 }
 0x4e6   : > { %v4527_v51 = vpop.f32.mrf.mxu0 }
 0x4e7   : > { %1091 = vrot.lane.b32.xlu1 %v4527_v51, %s4158_s23  ;;  %v4014_v52 = vpack.i.bf16 %v4527_v51, %v903_v46  ;;  %v4019_v53 = vpack.i.bf16 %v903_v46, %v4527_v51 }
 0x4e8   : > { %v3754_v8 = vpop.f32.mrf.mxu0 }
 0x4e9   : > { %4015 = vrot.lane.b32.xlu0 %v4014_v52, %s4172_s25 }
 0x4ea   : > { %v1087_v54 = vpop.f32.mrf.mxu0 }
 0x4eb   : > { %4020 = vrot.lane.b32.xlu1 %v4019_v53, %s4173_s26 }
 0x4ec   : > { %v3755_v44 = vpop.f32.mrf.mxu0 }
 0x4ed   : > { %4025 = vrot.lane.b32.xlu0 %v4014_v52, %s4174_s30  ;;  %v3528_v44 = vld [vmem:[%s5870_s3 + $0x10] sm:$0xf] }
 0x4ef   : > { %4030 = vrot.lane.b32.xlu1 %v4014_v52, %s4159_s24 }
 0x4f1   : > { %4035 = vrot.lane.b32.xlu0 %v4014_v52, %s4175_s9 }
 0x4f3   : > { %4040 = vrot.lane.b32.xlu1 %v4014_v52, %s4176_s12 }
 0x4f5   : > { %4045 = vrot.lane.b32.xlu0 %v4014_v52, %s4177_s13  ;;  %s314_s13 = scalar_lea.vmem %s5868_s1, %s6098_s28 }
 0x4f7   : > { %4050 = vrot.lane.b32.xlu1 %v4014_v52, %s4178_s14 }
 0x4f9   : > { %4055 = vrot.lane.b32.xlu0 %v4014_v52, %s4179_s15 }
 0x4fb   : > { %4060 = vrot.lane.b32.xlu1 %v4014_v52, %s4180_s16 }
 0x4fd   : > { %4065 = vrot.lane.b32.xlu0 %v4014_v52, %s4181_s17  ;;  %s5814_s17 = scalar_lea.vmem %s5875_s8, %s3600_s29 }
 0x4ff   : > { %4070 = vrot.lane.b32.xlu1 %v4014_v52, %s4182_s18 }
 0x501   : > { %4075 = vrot.lane.b32.xlu0 %v4014_v52, %s4183_s19 }
 0x503   : > { %1184 = vrot.lane.b32.xlu1 %v903_v46, %s4184_s20 }
 0x505   : > { %1191 = vrot.lane.b32.xlu0 %v903_v46, %s4185_s21 }
 0x507   : > { %1194 = vrot.lane.b32.xlu1 %v4527_v51, %s4184_s20 }
 0x559   : > { %v1092_v57 = vpop.permute.xlu1 %1091 }
 0x55a   : > { %v1094_v58 = vsel %vm716_vm3, %v903_v46, %v1092_v57 }
 0x55b   : > { %v1198_v59 = vpack.c.bf16 %v1094_v58, %v1094_v58  ;;  %v4016_v40 = vpop.permute.xlu0 %4015 }
 0x55c   : > { %v4018_v0 = vunpack.i.h.bf16 %v4016_v40  ;;  %v4017_v1 = vunpack.i.l.bf16 %v4016_v40 }
 0x55d   : > { %3759 = vmatmul.mubr.msk.bf16.vlgmr.msra.gmra.mxu1 %vm368_vm0, %v1198_v59  ;;  %v4021_v61 = vpop.permute.xlu1 %4020 }
 0x55e   : > { %v4022_v62 = vunpack.i.l.bf16 %v4021_v61  ;;  %3769 = vmatpush3.bf16.msra.mxu1 %v1323_v60  ;;  %3770 = vmatprep.mubr.msk.bf16.mxu1 %vm4155_vm2, %v5876_v26  ;;  %v4023_v19 = vunpack.i.h.bf16 %v4021_v61  ;;  %v1451_v60 = vsel %vm397_vm1, %v3528_v44, 0 }
 0x55f   : > { %v4026_v63 = vpop.permute.xlu0 %4025 }
 0x560   : > { %v4027_v2 = vunpack.i.l.bf16 %v4026_v63  ;;  %v1127_v4 = vsel %vm716_vm3, %v4017_v1, %v4022_v62  ;;  %v4028_v17 = vunpack.i.h.bf16 %v4026_v63  ;;  %v4594_v1 = vld [vmem:[%s5871_s4 + $0x4] sm:$0xf] }
 0x561   : > { %v4031_v3 = vpop.permute.xlu1 %4030  ;;  %3950 = vmatprep.subr.msk.bf16.mxu1 %vm397_vm1, %v4594_v1 }
 0x562   : > { %v1134_v5 = vsel %vm716_vm3, %v4027_v2, %v4018_v0  ;;  %v4032_v6 = vunpack.i.l.bf16 %v4031_v3  ;;  %v4033_v12 = vunpack.i.h.bf16 %v4031_v3 }
 0x563   : > { %v1308_v7 = vpack.c.bf16 %v1134_v5, %v1127_v4  ;;  %v4036_v10 = vpop.permute.xlu0 %4035 }
 0x564   : > { %v4037_v14 = vunpack.i.l.bf16 %v4036_v10  ;;  %v1099_v24 = vsel %vm716_vm3, %v4032_v6, %v4527_v51  ;;  %v4038_v30 = vunpack.i.h.bf16 %v4036_v10 }
 0x565   : > { %v4041_v29 = vpop.permute.xlu1 %4040  ;;  %3771 = vmatmul.mubr.msk.bf16.vlgmr.msra.gmra.mxu1 %vm368_vm0, %v1308_v7 }
 0x566   : > { %v1106_v32 = vsel %vm716_vm3, %v4037_v14, %v4033_v12  ;;  %v4043_v33 = vunpack.i.h.bf16 %v4041_v29  ;;  %v4042_v34 = vunpack.i.l.bf16 %v4041_v29  ;;  %3774 = vmatprep.mubr.msk.bf16.mxu1 %vm4155_vm2, %v5876_v26 }
 0x567   : > { %v1246_v36 = vpack.c.bf16 %v1106_v32, %v1099_v24  ;;  %v4046_v38 = vpop.permute.xlu0 %4045 }
 0x568   : > { %v1113_v41 = vsel %vm716_vm3, %v4042_v34, %v4038_v30  ;;  %v1120_v15 = vsel %vm716_vm3, %v4023_v19, %v4043_v33  ;;  %v4047_v9 = vunpack.i.l.bf16 %v4046_v38  ;;  %v4048_v20 = vunpack.i.h.bf16 %v4046_v38  ;;  %v4130_v30 = vld [vmem:[%s4248_s10] sm:$0xff] }
 0x569   : > { %v1247_v11 = vpack.c.bf16 %v1120_v15, %v1113_v41  ;;  %v4051_v13 = vpop.permute.xlu1 %4050  ;;  %3764 = vmatprep.mubr.msk.bf16.mxu0 %vm368_vm0, %v1246_v36  ;;  %v4131_v36 = vld [vmem:[%s4248_s10 + $0x18] sm:$0xff]  ;;  %v4132_v41 = vld [vmem:[%s4248_s10 + $0x10] sm:$0xff] }
 0x56a   : > { %v4052_v21 = vunpack.i.l.bf16 %v4051_v13  ;;  %v1141_v27 = vsel %vm716_vm3, %v4047_v9, %v4028_v17  ;;  %v4053_v35 = vunpack.i.h.bf16 %v4051_v13  ;;  %v4133_v13 = vld [vmem:[%s4248_s10 + $0x20] sm:$0xff] }
 0x56b   : > { %v4056_v22 = vpop.permute.xlu0 %4055  ;;  %3765 = vmatmul.mubr.msk.bf16.vlgmr.msra.gmra.mxu0 %vm368_vm0, %v1247_v11 }
 0x56c   : > { %v1148_v18 = vsel %vm716_vm3, %v4052_v21, %v4048_v20  ;;  %3783 = vmatpush3.bf16.msra.mxu0 %v1393_v16  ;;  %v4057_v37 = vunpack.i.l.bf16 %v4056_v22  ;;  %v4058_v42 = vunpack.i.h.bf16 %v4056_v22 }
 0x56d   : > { %v1309_v28 = vpack.c.bf16 %v1148_v18, %v1141_v27  ;;  %v4061_v31 = vpop.permute.xlu1 %4060  ;;  %3788 = vmatprep.subr.bf16.mxu0 %v5876_v26  ;;  %v4134_v27 = vld [vmem:[%s4248_s10 + $0x40] sm:$0xff] }
 0x56e   : > { %v4062_v25 = vunpack.i.l.bf16 %v4061_v31  ;;  %v4063_v45 = vunpack.i.h.bf16 %v4061_v31  ;;  %v1155_v50 = vsel %vm716_vm3, %v4057_v37, %v4053_v35  ;;  %v4135_v37 = vld [vmem:[%s4248_s10 + $0x48] sm:$0xff] }
 0x56f   : > { %v4066_v23 = vpop.permute.xlu0 %4065  ;;  %3775 = vmatmul.mubr.msk.bf16.gmra.mxu1 %vm368_vm0, %v1309_v28 }
 0x570   : > { %v4067_v43 = vunpack.i.l.bf16 %v4066_v23  ;;  %3778 = vmatprep.mubr.msk.bf16.mxu1 %vm4155_vm2, %v5876_v26  ;;  %v1162_v47 = vsel %vm716_vm3, %v4062_v25, %v4058_v42  ;;  %v4068_v48 = vunpack.i.h.bf16 %v4066_v23 }
 0x571   : > { %v4071_v46 = vpop.permute.xlu1 %4070  ;;  %v1310_v55 = vpack.c.bf16 %v1162_v47, %v1155_v50  ;;  %v4136_v50 = vld [vmem:[%s4248_s10 + $0x50] sm:$0xff] }
 0x572   : > { %v4072_v49 = vunpack.i.l.bf16 %v4071_v46  ;;  %v1169_v51 = vsel %vm716_vm3, %v4067_v43, %v4063_v45  ;;  %v4073_v8 = vunpack.i.h.bf16 %v4071_v46 }
 0x573   : > { %v4076_v52 = vpop.permute.xlu0 %4075 }
 0x574   : > { %v1176_v53 = vsel %vm716_vm3, %v4072_v49, %v4068_v48  ;;  %v4078_v54 = vunpack.i.h.bf16 %v4076_v52  ;;  %v4077_v39 = vunpack.i.l.bf16 %v4076_v52 }
 0x575   : > { %v1382_v56 = vpack.c.bf16 %v1176_v53, %v1169_v51  ;;  %v1185_v57 = vpop.permute.xlu1 %1184 }
 0x576   : > { %v1183_v58 = vsel %vm716_vm3, %v4077_v39, %v4073_v8  ;;  %v1190_v59 = vsel %vm716_vm3, %v1185_v57, %v4078_v54  ;;  %v4137_v54 = vld [vmem:[%s4248_s10 + $0x70] sm:$0xff] }
 0x577   : > { %v1383_v40 = vpack.c.bf16 %v1190_v59, %v1183_v58  ;;  %3779 = vmatmul.mubr.msk.bf16.gmra.mxu1 %vm368_vm0, %v1310_v55  ;;  %3784 = vmatprep.mubr.msk.bf16.mxu0 %vm368_vm0, %v1382_v56  ;;  %v1192_v62 = vpop.permute.xlu0 %1191 }
 0x579   : > { %v1195_v61 = vpop.permute.xlu1 %1194  ;;  %3785 = vmatmul.mubr.msk.bf16.vlgmr.msra.gmra.mxu0 %vm368_vm0, %v1383_v40 }
 0x57a   : > { %3789 = vmatpush3.bf16.msra.mxu0 %v1451_v60  ;;  %3790 = vmatprep.mubr.msk.bf16.mxu0 %vm4155_vm2, %v5876_v26  ;;  %v1197_v63 = vsel %vm716_vm3, %v1192_v62, %v1195_v61 }
 0x57b   : > { %3794 = vmatprep.subr.bf16.mxu0 %v5876_v26  ;;  %v1444_v0 = vpack.c.bf16 %v1197_v63, %v1197_v63  ;;  %v1605_v63 = vsel %vm397_vm1, %v4594_v1, 0 }
 0x57c   : > { %3801 = vmatpush3.bf16.msra.mxu1 %v1605_v63 }
 0x581   : > { %3791 = vmatmul.mubr.msk.bf16.vlgmr.msra.gmra.mxu0 %vm368_vm0, %v1444_v0  ;;  %v1547_v0 = vld [vmem:[%s5871_s4] sm:$0xf] }
 0x582   : > { %3796 = vmatprep.mubr.msk.bf16.mxu0 %vm4155_vm2, %v5876_v26 }
 0x61d   : > { %v1240_v2 = vpop.f32.mrf.mxu1 }
 0x61e   : > { %v4607_v32 = vadd.f32 %v4130_v30, %v1240_v2  ;;  %v1552_v2 = vsel %vm397_vm1, %v1547_v0, 0  ;;  %v1842_v0 = vld [vmem:[%s5872_s5] sm:$0xf] }
 0x61f   : > { %v3760_v3 = vpop.f32.mrf.mxu1  ;;  %3795 = vmatpush3.bf16.msra.mxu0 %v1552_v2  ;;  %v1847_v2 = vsel %vm397_vm1, %v1842_v0, 0 }
 0x620   : > { %5938 = vst [vmem:[#allocation2_spill] sm:$0xff] %v4607_v32  ;;  %v1509_v11 = vmul.f32 %v4607_v32, %v4607_v32  ;;  %3806 = vmatprep.subr.bf16.mxu0 %v5876_v26  ;;  %v3538_v3 = vld [vmem:[%s5871_s4 + $0xc] sm:$0xf] }
 0x621   : > { %v1243_v4 = vpop.f32.mrf.mxu1  ;;  %3951 = vmatprep.subr.msk.bf16.mxu1 %vm397_vm1, %v3538_v3 }
 0x623   : > { %v3761_v5 = vpop.f32.mrf.mxu1 }
 0x625   : > { %v4598_v6 = vpop.f32.mrf.mxu1 }
 0x627   : > { %v3772_v7 = vpop.f32.mrf.mxu1 }
 0x628   : > { %v4138_v7 = vld [vmem:[%s4248_s10 + $0x8] sm:$0xff] }
 0x629   : > { %v4600_v10 = vpop.f32.mrf.mxu1 }
 0x62b   : > { %v3766_v12 = vpop.f32.mrf.mxu0  ;;  %v3773_v14 = vpop.f32.mrf.mxu1 }
 0x62c   : > { %v4610_v38 = vadd.f32 %v4131_v36, %v3766_v12  ;;  %v3534_v36 = vld [vmem:[%s5871_s4 + $0x8] sm:$0xf] }
 0x62d   : > { %v4602_v19 = vpop.f32.mrf.mxu0 }
 0x62e   : > { %5939 = vst [vmem:[#allocation3_spill] sm:$0xff] %v4610_v38  ;;  %v1512_v21 = vmul.f32 %v4610_v38, %v4610_v38  ;;  %v4664_v12 = vadd.f32 %v4138_v7, %v4602_v19 }
 0x62f   : > { %v3767_v24 = vpop.f32.mrf.mxu0  ;;  %v4604_v29 = vpop.f32.mrf.mxu1 }
 0x630   : > { %v4618_v16 = vadd.f32 %v4133_v13, %v3767_v24  ;;  %5946 = vst [vmem:[#allocation10_spill] sm:$0xff] %v4664_v12  ;;  %v4139_v24 = vld [vmem:[%s4248_s10 + $0x58] sm:$0xff] }
 0x631   : > { %v1296_v33 = vpop.f32.mrf.mxu0  ;;  %v3776_v34 = vpop.f32.mrf.mxu1 }
 0x632   : > { %v4613_v15 = vadd.f32 %v4132_v41, %v1296_v33  ;;  %5941 = vst [vmem:[#allocation5_spill] sm:$0xff] %v4618_v16  ;;  %v1514_v31 = vmul.f32 %v4618_v16, %v4618_v16  ;;  %v4140_v33 = vld [vmem:[%s4248_s10 + $0x60] sm:$0xff] }
 0x633   : > { %v1370_v9 = vpop.f32.mrf.mxu1 }
 0x634   : > { %5940 = vst [vmem:[#allocation4_spill] sm:$0xff] %v4613_v15  ;;  %v1510_v17 = vmul.f32 %v4613_v15, %v4613_v15  ;;  %v4625_v18 = vadd.f32 %v4134_v27, %v1370_v9  ;;  %v1671_v27 = vsel %vm397_vm1, %v3534_v36, 0 }
 0x635   : > { %v3777_v20 = vpop.f32.mrf.mxu1 }
 0x636   : > { %v1511_v22 = vadd.f32 %v1510_v17, %v1509_v11  ;;  %5942 = vst [vmem:[#allocation6_spill] sm:$0xff] %v4625_v18  ;;  %v1516_v45 = vmul.f32 %v4625_v18, %v4625_v18 }
 0x637   : > { %v1375_v28 = vpop.f32.mrf.mxu1 }
 0x638   : > { %v1513_v25 = vadd.f32 %v1512_v21, %v1511_v22  ;;  %v4630_v23 = vadd.f32 %v4135_v37, %v1375_v28 }
 0x639   : > { %v3780_v42 = vpop.f32.mrf.mxu1  ;;  %v4632_v43 = vpop.f32.mrf.mxu0 }
 0x63a   : > { %5943 = vst [vmem:[#allocation7_spill] sm:$0xff] %v4630_v23  ;;  %v1515_v35 = vadd.f32 %v1514_v31, %v1513_v25  ;;  %v1518_v49 = vmul.f32 %v4630_v23, %v4630_v23  ;;  %v1741_v31 = vsel %vm397_vm1, %v3538_v3, 0  ;;  %v4141_v25 = vld [vmem:[%s4248_s10 + $0x28] sm:$0xff]  ;;  %v4142_v42 = vld [vmem:[%s4248_s10 + $0x30] sm:$0xff] }
 0x63b   : > { %v1378_v46 = vpop.f32.mrf.mxu1  ;;  %v1429_v47 = vpop.f32.mrf.mxu0  ;;  %v4695_v37 = vadd.f32 %v4141_v25, %v4598_v6  ;;  %v3544_v6 = vld [vmem:[%s5872_s5 + $0x4] sm:$0xf]  ;;  %v3551_v3 = vld [vmem:[%s5872_s5 + $0xc] sm:$0xf] }
 0x63c   : > { %v1517_v48 = vadd.f32 %v1516_v45, %v1515_v35  ;;  %v4639_v51 = vadd.f32 %v4136_v50, %v1378_v46  ;;  %v4669_v30 = vadd.f32 %v4139_v24, %v1429_v47  ;;  %v4699_v35 = vadd.f32 %v4142_v42, %v4600_v10  ;;  %v4143_v46 = vld [vmem:[%s4248_s10 + $0x68] sm:$0xff]  ;;  %v3541_v50 = vld [vmem:[%s5871_s4 + $0x10] sm:$0xf] }
 0x63d   : > { %v3781_v52 = vpop.f32.mrf.mxu1  ;;  %v3787_v8 = vpop.f32.mrf.mxu0  ;;  %5949 = vst [vmem:[#allocation13_spill] sm:$0xff] %v4695_v37  ;;  %v4705_v47 = vadd.f32 %v4143_v46, %v4632_v43 }
 0x63e   : > { %5944 = vst [vmem:[#allocation8_spill] sm:$0xff] %v4639_v51  ;;  %v1520_v53 = vmul.f32 %v4639_v51, %v4639_v51  ;;  %v4644_v39 = vadd.f32 %v4137_v54, %v3787_v8  ;;  %v1519_v44 = vadd.f32 %v1518_v49, %v1517_v48  ;;  %5947 = vst [vmem:[#allocation11_spill] sm:$0xff] %v4669_v30  ;;  %v4144_v54 = vld [vmem:[%s4248_s10 + $0x38] sm:$0xff] }
 0x63f   : > { %v1432_v55 = vpop.f32.mrf.mxu0  ;;  %5950 = vst [vmem:[#allocation14_spill] sm:$0xff] %v4699_v35  ;;  %5951 = vst [vmem:[#allocation15_spill] sm:$0xff] %v4705_v47 }
 0x640   : > { %5945 = vst [vmem:[#allocation9_spill] sm:$0xff] %v4644_v39  ;;  %v1521_v56 = vadd.f32 %v1520_v53, %v1519_v44  ;;  %v1522_v57 = vmul.f32 %v4644_v39, %v4644_v39  ;;  %v4672_v34 = vadd.f32 %v4140_v33, %v1432_v55  ;;  %v1799_v53 = vsel %vm397_vm1, %v3541_v50, 0 }
 0x641   : > { %v4648_v58 = vpop.f32.mrf.mxu0  ;;  %v4730_v44 = vadd.f32 %v4144_v54, %v4604_v29  ;;  %v1900_v55 = vsel %vm397_vm1, %v3544_v6, 0 }
 0x642   : > { %v1523_v59 = vadd.f32 %v1522_v57, %v1521_v56  ;;  %5948 = vst [vmem:[#allocation12_spill] sm:$0xff] %v4672_v34  ;;  %v4145_v56 = vld [vmem:[%s4248_s10 + $0x78] sm:$0xff] }
 0x643   : > { %v3792_v40 = vpop.f32.mrf.mxu0  ;;  %5952 = vst [vmem:[#allocation16_spill] sm:$0xff] %v4730_v44  ;;  %v4736_v57 = vadd.f32 %v4145_v56, %v4648_v58 }
 0x644   : > { %v1524_v60 = vsel %vm368_vm0, %v1523_v59, 0.0 }
 0x645   : > { %1525 = vadd.xlane.f32.xlu0 %v1524_v60  ;;  %v1490_v61 = vpop.f32.mrf.mxu0  ;;  %5953 = vst [vmem:[#allocation17_spill] sm:$0xff] %v4736_v57 }
 0x647   : > { %v3793_v62 = vpop.f32.mrf.mxu0 }
 0x6ce   : > { %v1526_v4 = vpop.xlane.xlu0 %1525 }
 0x6cf   : > { %v1527_v5 = vmul.f32 0.125, %v1526_v4  ;;  %v3547_v4 = vld [vmem:[%s5872_s5 + $0x8] sm:$0xf] }
 0x6d1   : > { %v1528_v1 = vadd.f32 1e-06, %v1527_v5 }
 0x6d3   : > { %4126 = vrsqrt.f32 %v1528_v1 }
 0x6e0   : > { %v4666_v14 = vpop.eup %4126 }
 0x6e1   : > { %v1530_v41 = vmul.f32 %v4666_v14, %v4607_v32  ;;  %v1531_v19 = vmul.f32 %v4666_v14, %v4664_v12  ;;  %v1532_v9 = vmul.f32 %v4666_v14, %v4613_v15  ;;  %v1533_v11 = vmul.f32 %v4666_v14, %v4610_v38 }
 0x6e2   : > { %v1534_v13 = vmul.f32 %v4666_v14, %v4618_v16  ;;  %v1541_v17 = vmul.f32 %v4666_v14, %v4669_v30  ;;  %v1542_v20 = vmul.f32 %v4666_v14, %v4672_v34  ;;  %v1535_v10 = vmul.f32 %v4666_v14, %v4695_v37 }
 0x6e3   : > { %v1546_v21 = vpack.c.bf16 %v1530_v41, %v1530_v41  ;;  %v1594_v22 = vpack.c.bf16 %v1532_v9, %v1531_v19  ;;  %v1536_v48 = vmul.f32 %v4666_v14, %v4699_v35  ;;  %v1543_v43 = vmul.f32 %v4666_v14, %v4705_v47 }
 0x6e4   : > { %v1595_v28 = vpack.c.bf16 %v1534_v13, %v1533_v11  ;;  %v1730_v45 = vpack.c.bf16 %v1542_v20, %v1541_v17  ;;  %v1544_v49 = vmul.f32 %v4666_v14, %v4644_v39  ;;  %v1537_v59 = vmul.f32 %v4666_v14, %v4730_v44 }
 0x6e5   : > { %3797 = vmatmul.mubr.msk.bf16.vlgmr.msra.gmra.mxu0 %vm368_vm0, %v1546_v21  ;;  %3802 = vmatprep.mubr.msk.bf16.mxu1 %vm368_vm0, %v1594_v22  ;;  %v1656_v52 = vpack.c.bf16 %v1536_v48, %v1535_v10  ;;  %v1538_v29 = vmul.f32 %v4666_v14, %v4625_v18  ;;  %v1545_v40 = vmul.f32 %v4666_v14, %v4736_v57  ;;  %v2036_v21 = vsel %vm397_vm1, %v3551_v3, 0 }
 0x6e6   : > { %3803 = vmatmul.mubr.msk.bf16.vlgmr.msra.gmra.mxu1 %vm368_vm0, %v1595_v28  ;;  %3807 = vmatpush3.bf16.msra.mxu0 %v1671_v27  ;;  %v1731_v8 = vpack.c.bf16 %v1544_v49, %v1543_v43  ;;  %v1539_v61 = vmul.f32 %v4666_v14, %v4630_v23  ;;  %v1540_v62 = vmul.f32 %v4666_v14, %v4639_v51  ;;  %v1966_v14 = vsel %vm397_vm1, %v3547_v4, 0 }
 0x6e7   : > { %3821 = vmatpush3.bf16.msra.mxu1 %v1741_v31  ;;  %3822 = vmatprep.mubr.msk.bf16.mxu1 %vm368_vm0, %v1730_v45  ;;  %v1657_v58 = vpack.c.bf16 %v1538_v29, %v1537_v59  ;;  %v1792_v60 = vpack.c.bf16 %v1545_v40, %v1545_v40  ;;  %v3554_v45 = vld [vmem:[%s5872_s5 + $0x10] sm:$0xf] }
 0x6e8   : > { %3808 = vmatprep.mubr.msk.bf16.mxu0 %vm4155_vm2, %v5876_v26  ;;  %3826 = vmatprep.subr.bf16.mxu1 %v5876_v26  ;;  %v1658_v63 = vpack.c.bf16 %v1540_v62, %v1539_v61  ;;  %v2094_v49 = vsel %vm397_vm1, %v3554_v45, 0  ;;  %v4186_v62 = vmov 0  }
 0x6e9   : > { %3952 = vmatprep.subr.msk.bf16.mxu0 %vm397_vm1, %v3544_v6  ;;  %4079 = vset.pattern.permute.xlu1 %v4186_v62 }
 0x6ea   : > { %4115 = vset.pattern.permute.xlu0 %v4186_v62 }
 0x6ed   : > { %3809 = vmatmul.mubr.msk.bf16.vlgmr.msra.gmra.mxu0 %vm368_vm0, %v1656_v52 }
 0x6ee   : > { %3823 = vmatmul.mubr.msk.bf16.vlgmr.msra.gmra.mxu1 %vm368_vm0, %v1731_v8  ;;  %3812 = vmatprep.mubr.msk.bf16.mxu0 %vm4155_vm2, %v5876_v26 }
 0x6ef   : > { %3827 = vmatpush3.bf16.msra.mxu1 %v1799_v53  ;;  %3828 = vmatprep.mubr.msk.bf16.mxu1 %vm4155_vm2, %v5876_v26 }
 0x6f0   : > { %3839 = vmatpush3.bf16.msra.mxu0 %v1900_v55  ;;  %3832 = vmatprep.subr.bf16.mxu1 %v5876_v26 }
 0x6f1   : > { %3953 = vmatprep.subr.msk.bf16.mxu0 %vm397_vm1, %v3551_v3 }
 0x6f5   : > { %3813 = vmatmul.mubr.msk.bf16.gmra.mxu0 %vm368_vm0, %v1657_v58 }
 0x6f6   : > { %3829 = vmatmul.mubr.msk.bf16.vlgmr.msra.gmra.mxu1 %vm368_vm0, %v1792_v60  ;;  %3816 = vmatprep.mubr.msk.bf16.mxu0 %vm4155_vm2, %v5876_v26 }
 0x6f7   : > { %3834 = vmatprep.mubr.msk.bf16.mxu1 %vm4155_vm2, %v5876_v26  ;;  %3833 = vmatpush3.bf16.msra.mxu1 %v1847_v2 }
 0x6f8   : > { %3844 = vmatprep.subr.bf16.mxu1 %v5876_v26 }
 0x6fd   : > { %3817 = vmatmul.mubr.msk.bf16.gmra.mxu0 %vm368_vm0, %v1658_v63 }
 0x7a5   : > { %v1588_v5 = vpop.f32.mrf.mxu0 }
 0x7a6   : > { %v1841_v1 = vpack.c.bf16 %v1588_v5, %v1588_v5  ;;  %v3804_v7 = vpop.f32.mrf.mxu1 }
 0x7a7   : > { %v3798_v24 = vpop.f32.mrf.mxu0 }
 0x7a8   : > { %v1641_v33 = vpop.f32.mrf.mxu1  ;;  %3835 = vmatmul.mubr.msk.bf16.vlgmr.msra.gmra.mxu1 %vm368_vm0, %v1841_v1 }
 0x7a9   : > { %v1591_v36 = vpop.f32.mrf.mxu0  ;;  %3845 = vmatpush3.bf16.msra.mxu1 %v1966_v14  ;;  %3846 = vmatprep.mubr.msk.bf16.mxu1 %vm4155_vm2, %v5876_v26 }
 0x7aa   : > { %v3805_v41 = vpop.f32.mrf.mxu1 }
 0x7ab   : > { %v3799_v19 = vpop.f32.mrf.mxu0  ;;  %v1890_v17 = vpack.c.bf16 %v3805_v41, %v3804_v7 }
 0x7ac   : > { %v1644_v9 = vpop.f32.mrf.mxu1 }
 0x7ad   : > { %v1889_v11 = vpack.c.bf16 %v1644_v9, %v1641_v33  ;;  %v1707_v13 = vpop.f32.mrf.mxu0 }
 0x7ae   : > { %v3824_v20 = vpop.f32.mrf.mxu1 }
 0x7af   : > { %v3810_v22 = vpop.f32.mrf.mxu0  ;;  %3840 = vmatprep.mubr.msk.bf16.mxu0 %vm368_vm0, %v1889_v11 }
 0x7b0   : > { %v1777_v27 = vpop.f32.mrf.mxu1  ;;  %3841 = vmatmul.mubr.msk.bf16.vlgmr.msra.gmra.mxu0 %vm368_vm0, %v1890_v17 }
 0x7b1   : > { %v1710_v28 = vpop.f32.mrf.mxu0  ;;  %3859 = vmatpush3.bf16.msra.mxu0 %v2036_v21 }
 0x7b2   : > { %v1951_v31 = vpack.c.bf16 %v1710_v28, %v1707_v13  ;;  %v3825_v25 = vpop.f32.mrf.mxu1  ;;  %3864 = vmatprep.subr.bf16.mxu0 %v5876_v26 }
 0x7b3   : > { %v3811_v42 = vpop.f32.mrf.mxu0  ;;  %v2026_v48 = vpack.c.bf16 %v3825_v25, %v3824_v20 }
 0x7b4   : > { %v1780_v46 = vpop.f32.mrf.mxu1  ;;  %3847 = vmatmul.mubr.msk.bf16.vlgmr.msra.gmra.mxu1 %vm368_vm0, %v1951_v31 }
 0x7b5   : > { %v2025_v6 = vpack.c.bf16 %v1780_v46, %v1777_v27  ;;  %v1715_v10 = vpop.f32.mrf.mxu0  ;;  %3850 = vmatprep.mubr.msk.bf16.mxu1 %vm4155_vm2, %v5876_v26 }
 0x7b6   : > { %v1835_v43 = vpop.f32.mrf.mxu1 }
 0x7b7   : > { %v3814_v50 = vpop.f32.mrf.mxu0  ;;  %3860 = vmatprep.mubr.msk.bf16.mxu0 %vm368_vm0, %v2025_v6  ;;  %v2087_v29 = vpack.c.bf16 %v1835_v43, %v1835_v43  ;;  %v3556_v6 = vld [vmem:[%s314_s13] ss:$0 sm:$0xff] }
 0x7b8   : > { %v3830_v52 = vpop.f32.mrf.mxu1  ;;  %3861 = vmatmul.mubr.msk.bf16.vlgmr.msra.gmra.mxu0 %vm368_vm0, %v2026_v48 }
 0x7b9   : > { %v1718_v8 = vpop.f32.mrf.mxu0  ;;  %3865 = vmatpush3.bf16.msra.mxu0 %v2094_v49  ;;  %3866 = vmatprep.mubr.msk.bf16.mxu0 %vm4155_vm2, %v5876_v26 }
 0x7ba   : > { %v1952_v53 = vpack.c.bf16 %v1718_v8, %v1715_v10  ;;  %v1838_v54 = vpop.f32.mrf.mxu1  ;;  %3870 = vmatprep.subr.bf16.mxu0 %v5876_v26  ;;  %v2751_v10 = vld [vmem:[%s5873_s6] sm:$0xf] }
 0x7bb   : > { %v3815_v55 = vpop.f32.mrf.mxu0  ;;  %v2756_v48 = vsel %vm397_vm1, %v2751_v10, 0 }
 0x7bc   : > { %v3831_v56 = vpop.f32.mrf.mxu1  ;;  %3851 = vmatmul.mubr.msk.bf16.gmra.mxu1 %vm368_vm0, %v1952_v53 }
 0x7bd   : > { %v1723_v59 = vpop.f32.mrf.mxu0  ;;  %3854 = vmatprep.mubr.msk.bf16.mxu1 %vm4155_vm2, %v5876_v26 }
 0x7bf   : > { %v3818_v40 = vpop.f32.mrf.mxu0 }
 0x7c0   : > { %3867 = vmatmul.mubr.msk.bf16.vlgmr.msra.gmra.mxu0 %vm368_vm0, %v2087_v29 }
 0x7c1   : > { %v1726_v58 = vpop.f32.mrf.mxu0  ;;  %3872 = vmatprep.mubr.msk.bf16.mxu0 %vm4155_vm2, %v5876_v26  ;;  %3871 = vmatpush3.bf16.msra.mxu0 %v2756_v48 }
 0x7c2   : > { %v1953_v60 = vpack.c.bf16 %v1726_v58, %v1723_v59  ;;  %3882 = vmatprep.subr.bf16.mxu0 %v5876_v26 }
 0x7c3   : > { %v3819_v61 = vpop.f32.mrf.mxu0 }
 0x7c4   : > { %3855 = vmatmul.mubr.msk.bf16.gmra.mxu1 %vm368_vm0, %v1953_v60 }
 0x868   : > { %v4800_v63 = vpop.f32.mrf.mxu1 }
 0x869   : > { %5954 = vst [vmem:[#allocation18_spill] sm:$0xff] %v4800_v63 }
 0x86a   : > { %v3836_v0 = vpop.f32.mrf.mxu1 }
 0x86c   : > { %v1886_v2 = vpop.f32.mrf.mxu1 }
 0x86e   : > { %v3837_v3 = vpop.f32.mrf.mxu1 }
 0x870   : > { %v4802_v4 = vpop.f32.mrf.mxu0 }
 0x871   : > { %5955 = vst [vmem:[#allocation19_spill] sm:$0xff] %v4802_v4 }
 0x872   : > { %v4804_v5 = vpop.f32.mrf.mxu0 }
 0x874   : > { %v4806_v1 = vpop.f32.mrf.mxu0  ;;  %v4808_v7 = vpop.f32.mrf.mxu1 }
 0x875   : > { %5956 = vst [vmem:[#allocation20_spill] sm:$0xff] %v4806_v1 }
 0x876   : > { %v4810_v14 = vpop.f32.mrf.mxu0  ;;  %v3848_v24 = vpop.f32.mrf.mxu1 }
 0x877   : > { %5957 = vst [vmem:[#allocation21_spill] sm:$0xff] %v4810_v14 }
 0x878   : > { %v4812_v33 = vpop.f32.mrf.mxu1  ;;  %v4814_v36 = vpop.f32.mrf.mxu0 }
 0x879   : > { %2202 = vrot.lane.b32.xlu1 %v4814_v36, %s4159_s24 }
 0x87a   : > { %v3849_v41 = vpop.f32.mrf.mxu1  ;;  %v4818_v19 = vpop.f32.mrf.mxu0 }
 0x87c   : > { %v4820_v9 = vpop.f32.mrf.mxu1  ;;  %v4822_v11 = vpop.f32.mrf.mxu0 }
 0x87d   : > { %5958 = vst [vmem:[#allocation22_spill] sm:$0xff] %v4822_v11  ;;  %2172 = vrot.lane.b32.xlu0 %v4820_v9, %s4159_s24  ;;  %2192 = vrot.lane.b32.xlu1 %v4818_v19, %s4159_s24 }
 0x87e   : > { %v3852_v13 = vpop.f32.mrf.mxu1  ;;  %v4828_v17 = vpop.f32.mrf.mxu0 }
 0x880   : > { %v4830_v20 = vpop.f32.mrf.mxu1  ;;  %v4832_v21 = vpop.f32.mrf.mxu0 }
 0x881   : > { %5959 = vst [vmem:[#allocation23_spill] sm:$0xff] %v4830_v20  ;;  %5960 = vst [vmem:[#allocation24_spill] sm:$0xff] %v4832_v21  ;;  %2142 = vrot.lane.b32.xlu0 %v4804_v5, %s4159_s24  ;;  %2207 = vrot.lane.b32.xlu1 %v4822_v11, %s4159_s24 }
 0x882   : > { %v3853_v22 = vpop.f32.mrf.mxu1  ;;  %v3868_v27 = vpop.f32.mrf.mxu0 }
 0x884   : > { %v4838_v28 = vpop.f32.mrf.mxu1  ;;  %v2133_v31 = vpop.f32.mrf.mxu0 }
 0x885   : > { %5961 = vst [vmem:[#allocation25_spill] sm:$0xff] %v4838_v28  ;;  %2137 = vrot.lane.b32.xlu0 %v4800_v63, %s4159_s24  ;;  %2167 = vrot.lane.b32.xlu1 %v4812_v33, %s4159_s24 }
 0x886   : > { %v3856_v25 = vpop.f32.mrf.mxu1  ;;  %v3869_v42 = vpop.f32.mrf.mxu0 }
 0x888   : > { %v4844_v45 = vpop.f32.mrf.mxu1 }
 0x889   : > { %5962 = vst [vmem:[#allocation26_spill] sm:$0xff] %v4844_v45  ;;  %2197 = vrot.lane.b32.xlu1 %v4828_v17, %s4159_s24 }
 0x88a   : > { %v3857_v46 = vpop.f32.mrf.mxu1 }
 0x88d   : > { %2212 = vrot.lane.b32.xlu1 %v4832_v21, %s4159_s24 }
 0x891   : > { %2177 = vrot.lane.b32.xlu1 %v4830_v20, %s4159_s24 }
 0x895   : > { %2182 = vrot.lane.b32.xlu1 %v4838_v28, %s4159_s24 }
 0x899   : > { %2187 = vrot.lane.b32.xlu1 %v4844_v45, %s4159_s24 }
 0x89d   : > { %2162 = vrot.lane.b32.xlu1 %v4808_v7, %s4159_s24 }
 0x8a1   : > { %2157 = vrot.lane.b32.xlu1 %v4806_v1, %s4159_s24 }
 0x8a5   : > { %2152 = vrot.lane.b32.xlu1 %v4802_v4, %s4159_s24 }
 0x8a9   : > { %2147 = vrot.lane.b32.xlu1 %v4810_v14, %s4159_s24 }
 0x8ad   : > { %2651 = vperm.xlu1 %4079, %v3556_v6  }
 0x8eb   : > { %v2203_v43 = vpop.permute.xlu1 %2202 }
 0x8ec   : > { %v4878_v52 = vmul.f32 %v2203_v43, %v4810_v14  ;;  %v4881_v8 = vmul.f32 %v2203_v43, %v4800_v63  ;;  %v4884_v53 = vmul.f32 %v2203_v43, %v4808_v7  ;;  %v4887_v54 = vmul.f32 %v2203_v43, %v4830_v20 }
 0x8ed   : > { %v4890_v55 = vmul.f32 %v2203_v43, %v4838_v28  ;;  %v4893_v56 = vmul.f32 %v2203_v43, %v4818_v19  ;;  %v4896_v59 = vmul.f32 %v2203_v43, %v4844_v45  ;;  %v4899_v29 = vmul.f32 %v2203_v43, %v4832_v21 }
 0x8ee   : > { %v4902_v40 = vmul.f32 %v4802_v4, %v2203_v43  ;;  %v4905_v58 = vmul.f32 %v2203_v43, %v4828_v17  ;;  %v4908_v60 = vmul.f32 %v4806_v1, %v2203_v43  ;;  %v4911_v61 = vmul.f32 %v4822_v11, %v2203_v43 }
 0x8ef   : > { %v4873_v49 = vpop.permute.xlu0 %2172  ;;  %v4875_v50 = vpop.permute.xlu1 %2192  ;;  %5964 = vst [vmem:[#allocation28_spill] sm:$0xff] %v4896_v59  ;;  %5965 = vst [vmem:[#allocation29_spill] sm:$0xff] %v4899_v29 }
 0x8f0   : > { %5963 = vst [vmem:[#allocation27_spill] sm:$0xff] %v4873_v49  ;;  %5966 = vst [vmem:[#allocation30_spill] sm:$0xff] %v4902_v40  ;;  %v4915_v62 = vmul.f32 %v4873_v49, %v4800_v63  ;;  %v4919_v0 = vmul.f32 %v4806_v1, %v4873_v49  ;;  %v4923_v2 = vmul.f32 %v4806_v1, %v4875_v50 }
 0x8f1   : > { %5967 = vst [vmem:[#allocation31_spill] sm:$0xff] %v4905_v58  ;;  %5968 = vst [vmem:[#allocation32_spill] sm:$0xff] %v4908_v60  ;;  %v4927_v3 = vmul.f32 %v4873_v49, %v4830_v20  ;;  %v4933_v13 = vmul.f32 %v4802_v4, %v4873_v49  ;;  %v4937_v22 = vmul.f32 %v4875_v50, %v4838_v28 }
 0x8f2   : > { %5969 = vst [vmem:[#allocation33_spill] sm:$0xff] %v4911_v61  ;;  %5970 = vst [vmem:[#allocation34_spill] sm:$0xff] %v4915_v62  ;;  %v4941_v27 = vmul.f32 %v4875_v50, %v4820_v9  ;;  %v4945_v31 = vmul.f32 %v4873_v49, %v4818_v19  ;;  %v4949_v25 = vmul.f32 %v4875_v50, %v4800_v63 }
 0x8f3   : > { %5971 = vst [vmem:[#allocation35_spill] sm:$0xff] %v4919_v0  ;;  %5972 = vst [vmem:[#allocation36_spill] sm:$0xff] %v4927_v3  ;;  %v2143_v24 = vpop.permute.xlu0 %2142  ;;  %v4929_v41 = vpop.permute.xlu1 %2207  ;;  %v4953_v42 = vmul.f32 %v4873_v49, %v4810_v14  ;;  %v4957_v46 = vmul.f32 %v4875_v50, %v4844_v45  ;;  %v4961_v6 = vmul.f32 %v4822_v11, %v4873_v49 }
 0x8f4   : > { %5973 = vst [vmem:[#allocation37_spill] sm:$0xff] %v4929_v41  ;;  %v4965_v10 = vmul.f32 %v4875_v50, %v4828_v17  ;;  %v4969_v48 = vmul.f32 %v4814_v36, %v4875_v50  ;;  %v4973_v43 = vmul.f32 %v4875_v50, %v4832_v21  ;;  %v4977_v26 = vmul.f32 %v4875_v50, %v4830_v20 }
 0x8f5   : > { %5974 = vst [vmem:[#allocation38_spill] sm:$0xff] %v4961_v6  ;;  %v2145_v51 = vmul.f32 %v2143_v24, %v4800_v63  ;;  %v4981_v23 = vmul.f32 %v2143_v24, %v4810_v14  ;;  %v4984_v18 = vmul.f32 %v4802_v4, %v2143_v24  ;;  %v4987_v44 = vmul.f32 %v4806_v1, %v2143_v24 }
 0x8f6   : > { %5975 = vst [vmem:[#allocation39_spill] sm:$0xff] %v4977_v26  ;;  %v4990_v57 = vmul.f32 %v2143_v24, %v4830_v20  ;;  %v2230_v39 = vmul.f32 %v4929_v41, %v4804_v5  ;;  %v4999_v30 = vmul.f32 %v4822_v11, %v2143_v24  ;;  %v5003_v37 = vmul.f32 %v4929_v41, %v4808_v7 }
 0x8f7   : > { %5976 = vst [vmem:[#allocation40_spill] sm:$0xff] %v4981_v23  ;;  %5977 = vst [vmem:[#allocation41_spill] sm:$0xff] %v4984_v18  ;;  %v4992_v34 = vpop.permute.xlu0 %2137  ;;  %v4994_v35 = vpop.permute.xlu1 %2167  ;;  %v5008_v15 = vmul.f32 %v2143_v24, %v4844_v45  ;;  %v5011_v16 = vmul.f32 %v2143_v24, %v4832_v21  ;;  %v5015_v12 = vmul.f32 %v4929_v41, %v4812_v33 }
 0x8f8   : > { %5978 = vst [vmem:[#allocation42_spill] sm:$0xff] %v4987_v44  ;;  %5979 = vst [vmem:[#allocation43_spill] sm:$0xff] %v4990_v57  ;;  %v2216_v47 = vmul.f32 %v4992_v34, %v4804_v5  ;;  %v5019_v32 = vmul.f32 %v4929_v41, %v4820_v9  ;;  %v5022_v38 = vmul.f32 %v2143_v24, %v4838_v28 }
 0x8f9   : > { %5980 = vst [vmem:[#allocation44_spill] sm:$0xff] %v4992_v34  ;;  %5981 = vst [vmem:[#allocation45_spill] sm:$0xff] %v4994_v35  ;;  %v5026_v61 = vmul.f32 %v4929_v41, %v4832_v21  ;;  %v5030_v60 = vmul.f32 %v4929_v41, %v4818_v19  ;;  %v5034_v18 = vmul.f32 %v4994_v35, %v4800_v63 }
 0x8fa   : > { %5982 = vst [vmem:[#allocation46_spill] sm:$0xff] %v4999_v30  ;;  %5983 = vst [vmem:[#allocation47_spill] sm:$0xff] %v5008_v15  ;;  %v5038_v59 = vmul.f32 %v4994_v35, %v4810_v14  ;;  %v5042_v24 = vmul.f32 %v4802_v4, %v4994_v35  ;;  %v5046_v23 = vmul.f32 %v4822_v11, %v4875_v50 }
 0x8fb   : > { %5984 = vst [vmem:[#allocation48_spill] sm:$0xff] %v5011_v16  ;;  %5985 = vst [vmem:[#allocation49_spill] sm:$0xff] %v5019_v32  ;;  %v5048_v29 = vpop.permute.xlu1 %2197  ;;  %v5052_v44 = vmul.f32 %v4994_v35, %v4838_v28  ;;  %v5060_v58 = vmul.f32 %v4806_v1, %v4994_v35  ;;  %v5064_v40 = vmul.f32 %v4994_v35, %v4828_v17 }
 0x8fc   : > { %5986 = vst [vmem:[#allocation50_spill] sm:$0xff] %v5022_v38  ;;  %5987 = vst [vmem:[#allocation51_spill] sm:$0xff] %v5026_v61  ;;  %v5066_v26 = vadd.f32 %v2216_v47, %v2145_v51  ;;  %v5082_v38 = vmul.f32 %v4873_v49, %v4832_v21  ;;  %v5086_v51 = vmul.f32 %v4875_v50, %v4810_v14 }
 0x8fd   : > { %5988 = vst [vmem:[#allocation52_spill] sm:$0xff] %v5030_v60  ;;  %5989 = vst [vmem:[#allocation53_spill] sm:$0xff] %v5034_v18  ;;  %v5056_v18 = vmul.f32 %v4992_v34, %v4832_v21  ;;  %v5074_v60 = vmul.f32 %v4994_v35, %v4832_v21  ;;  %v5090_v47 = vmul.f32 %v4802_v4, %v4875_v50 }
 0x8fe   : > { %5990 = vst [vmem:[#allocation54_spill] sm:$0xff] %v5042_v24  ;;  %5991 = vst [vmem:[#allocation55_spill] sm:$0xff] %v5046_v23  ;;  %v5070_v23 = vmul.f32 %v4822_v11, %v4994_v35  ;;  %v5094_v35 = vmul.f32 %v4992_v34, %v4808_v7  ;;  %v2288_v57 = vmul.f32 %v4802_v4, %v5048_v29 }
 0x8ff   : > { %5992 = vst [vmem:[#allocation56_spill] sm:$0xff] %v5048_v29  ;;  %5993 = vst [vmem:[#allocation57_spill] sm:$0xff] %v5052_v44  ;;  %v2573_v49 = vmul.f32 %v5048_v29, %v4812_v33  ;;  %v5110_v50 = vmul.f32 %v5048_v29, %v4844_v45  ;;  %v5153_v24 = vmul.f32 %v4814_v36, %v5048_v29 }
 0x900   : > { %5994 = vst [vmem:[#allocation58_spill] sm:$0xff] %v5056_v18  ;;  %5995 = vst [vmem:[#allocation59_spill] sm:$0xff] %v5060_v58  ;;  %v5078_v18 = vmul.f32 %v4992_v34, %v4820_v9  ;;  %v2591_v34 = vmul.f32 %v5048_v29, %v4818_v19 }
 0x901   : > { %5996 = vst [vmem:[#allocation60_spill] sm:$0xff] %v5070_v23  ;;  %5998 = vst [vmem:[#allocation62_spill] sm:$0xff] %v5082_v38  ;;  %v5106_v38 = vpop.permute.xlu1 %2212  ;;  %v5140_v23 = vmul.f32 %v5048_v29, %v4810_v14 }
 0x902   : > { %5997 = vst [vmem:[#allocation61_spill] sm:$0xff] %v5078_v18  ;;  %5999 = vst [vmem:[#allocation63_spill] sm:$0xff] %v5086_v51  ;;  %v5100_v18 = vmul.f32 %v5048_v29, %v4830_v20  ;;  %v2200_v51 = vmul.f32 %v5048_v29, %v4800_v63  ;;  %v2215_v30 = vmul.f32 %v5106_v38, %v4800_v63 }
 0x903   : > { %6000 = vst [vmem:[#allocation64_spill] sm:$0xff] %v5090_v47  ;;  %6001 = vst [vmem:[#allocation65_spill] sm:$0xff] %v5094_v35  ;;  %v2639_v35 = vmul.f32 %v5048_v29, %v4832_v21  ;;  %v5118_v47 = vmul.f32 %v5048_v29, %v4838_v28  ;;  %v5124_v62 = vmul.f32 %v5106_v38, %v4810_v14 }
 0x904   : > { %v2568_v15 = vmul.f32 %v5106_v38, %v4804_v5  ;;  %v2294_v20 = vmul.f32 %v4802_v4, %v5106_v38  ;;  %v5132_v6 = vmul.f32 %v4806_v1, %v5106_v38  ;;  %v2572_v28 = vmul.f32 %v5106_v38, %v4808_v7  ;;  %6003 = vst [vmem:[#allocation67_spill] sm:$0xff] %v5140_v23 }
 0x905   : > { %6002 = vst [vmem:[#allocation66_spill] sm:$0xff] %v5118_v47  ;;  %v2576_v47 = vmul.f32 %v5106_v38, %v4812_v33  ;;  %v2231_v16 = vadd.f32 %v2230_v39, %v2215_v30  ;;  %v2571_v0 = vadd.f32 %v5003_v37, %v5124_v62  ;;  %v5146_v58 = vpop.permute.xlu1 %2177  ;;  %v5157_v39 = vmul.f32 %v4806_v1, %v5048_v29 }
 0x906   : > { %v2570_v21 = vadd.f32 %v4884_v53, %v2568_v15  ;;  %v2575_v44 = vadd.f32 %v5015_v12, %v2294_v20  ;;  %v2579_v45 = vadd.f32 %v5019_v32, %v5132_v6  ;;  %v5160_v53 = vadd.f32 %v2591_v34, %v2572_v28 }
 0x907   : > { %v2594_v3 = vadd.f32 %v4893_v56, %v2576_v47  ;;  %6004 = vst [vmem:[#allocation68_spill] sm:$0xff] %v5157_v39  ;;  %v2259_v15 = vsub.f32 %v2231_v16, %v4878_v52  ;;  %v5164_v23 = vmul.f32 %v4929_v41, %v4828_v17  ;;  %v2581_v32 = vsub.f32 %v2571_v0, %v5100_v18 }
 0x908   : > { %v2574_v30 = vsub.f32 %v2570_v21, %v2573_v49  ;;  %v2224_v56 = vmul.f32 %v5146_v58, %v4804_v5  ;;  %v2582_v47 = vsub.f32 %v2575_v44, %v4887_v54  ;;  %v2596_v29 = vmul.f32 %v5106_v38, %v4818_v19 }
 0x909   : > { %6005 = vst [vmem:[#allocation69_spill] sm:$0xff] %v5164_v23  ;;  %v2289_v39 = vadd.f32 %v2288_v57, %v2259_v15  ;;  %v2584_v34 = vsub.f32 %v2579_v45, %v4890_v55  ;;  %v2606_v21 = vmul.f32 %v5106_v38, %v4828_v17  ;;  %v5176_v28 = vpop.permute.xlu1 %2182  ;;  %v2368_v49 = vmul.f32 %v5146_v58, %v4820_v9 }
 0x90a   : > { %v2578_v16 = vadd.f32 %v4941_v27, %v2574_v30  ;;  %v5182_v52 = vmul.f32 %v5146_v58, %v4828_v17  ;;  %v2225_v44 = vadd.f32 %v2224_v56, %v4949_v25  ;;  %v2612_v57 = vsub.f32 %v2594_v3, %v4969_v48 }
 0x90b   : > { %v5188_v0 = vmul.f32 %v5176_v28, %v4818_v19  ;;  %v5193_v27 = vmul.f32 %v4814_v36, %v5146_v58  ;;  %v2319_v30 = vsub.f32 %v2289_v39, %v4923_v2  ;;  %v2583_v23 = vadd.f32 %v2581_v32, %v4937_v22 }
 0x90c   : > { %v2588_v45 = vadd.f32 %v4945_v31, %v2578_v16  ;;  %v2226_v3 = vmul.f32 %v5176_v28, %v4804_v5  ;;  %v2585_v25 = vadd.f32 %v2582_v47, %v4957_v46  ;;  %v2354_v48 = vmul.f32 %v5176_v28, %v4812_v33 }
 0x90d   : > { %6006 = vst [vmem:[#allocation70_spill] sm:$0xff] %v5193_v27  ;;  %v2245_v31 = vsub.f32 %v2225_v44, %v5038_v59  ;;  %v5207_v56 = vmul.f32 %v4814_v36, %v5176_v28  ;;  %v2586_v16 = vadd.f32 %v2584_v34, %v5110_v50  ;;  %v5210_v15 = vpop.permute.xlu1 %2187  ;;  %v2589_v32 = vadd.f32 %v2583_v23, %v5188_v0 }
 0x90e   : > { %v2598_v2 = vsub.f32 %v2588_v45, %v5064_v40  ;;  %v2227_v39 = vadd.f32 %v2226_v3, %v2200_v51  ;;  %v5215_v47 = vadd.f32 %v5074_v60, %v2612_v57  ;;  %v2340_v41 = vmul.f32 %v5210_v15, %v4808_v7 }
 0x90f   : > { %6007 = vst [vmem:[#allocation71_spill] sm:$0xff] %v5207_v56  ;;  %v2228_v59 = vmul.f32 %v5210_v15, %v4804_v5  ;;  %v5223_v44 = vmul.f32 %v5210_v15, %v4818_v19  ;;  %v5226_v34 = vadd.f32 %v4973_v43, %v2596_v29  ;;  %v5231_v40 = vmul.f32 %v5210_v15, %v4828_v17 }
 0x910   : > { %v2247_v23 = vsub.f32 %v2227_v39, %v4953_v42  ;;  %v5233_v60 = vadd.f32 %v2639_v35, %v2606_v21  ;;  %v5237_v51 = vmul.f32 %v4822_v11, %v5106_v38  ;;  %v2341_v57 = vadd.f32 %v2340_v41, %v2319_v30 }
 0x911   : > { %6008 = vst [vmem:[#allocation72_spill] sm:$0xff] %v5231_v40  ;;  %v2229_v45 = vadd.f32 %v2228_v59, %v4881_v8  ;;  %v5242_v3 = vmul.f32 %v5146_v58, %v4818_v19  ;;  %v5246_v29 = vmul.f32 %v5176_v28, %v4828_v17  ;;  %v5248_v42 = vpop.permute.xlu1 %2162  ;;  %v2599_v35 = vsub.f32 %v2589_v32, %v5182_v52 }
 0x912   : > { %6009 = vst [vmem:[#allocation73_spill] sm:$0xff] %v5237_v51  ;;  %v2295_v43 = vadd.f32 %v2294_v20, %v2247_v23  ;;  %v2590_v21 = vadd.f32 %v2585_v25, %v5223_v44  ;;  %v5254_v41 = vmul.f32 %v4814_v36, %v5210_v15  ;;  %v2242_v8 = vmul.f32 %v5248_v42, %v4810_v14 }
 0x913   : > { %6010 = vst [vmem:[#allocation74_spill] sm:$0xff] %v5246_v29  ;;  %v2355_v30 = vsub.f32 %v2341_v57, %v2354_v48  ;;  %v2600_v39 = vadd.f32 %v2586_v16, %v5231_v40  ;;  %v5261_v59 = vmul.f32 %v4814_v36, %v5106_v38  ;;  %v2263_v29 = vsub.f32 %v2229_v45, %v5124_v62 }
 0x914   : > { %6011 = vst [vmem:[#allocation75_spill] sm:$0xff] %v5254_v41  ;;  %v2607_v20 = vmul.f32 %v4814_v36, %v5248_v42  ;;  %v2274_v25 = vmul.f32 %v4802_v4, %v5248_v42  ;;  %v5270_v32 = vadd.f32 %v5026_v61, %v5237_v51  ;;  %v2243_v48 = vsub.f32 %v5066_v26, %v2242_v8  ;;  %v6016_v61 = vld [vmem:[#allocation26_spill] sm:$0xff] }
 0x915   : > { %v2369_v23 = vadd.f32 %v2368_v49, %v2355_v30  ;;  %v5275_v16 = vmul.f32 %v4822_v11, %v5248_v42  ;;  %v2306_v62 = vmul.f32 %v4806_v1, %v5248_v42  ;;  %v5281_v57 = vmul.f32 %v5248_v42, %v4800_v63  ;;  %v5283_v45 = vpop.permute.xlu1 %2157  ;;  %v6014_v49 = vld [vmem:[#allocation54_spill] sm:$0xff]  ;;  %v6015_v30 = vld [vmem:[#allocation36_spill] sm:$0xff]  ;;  %v6017_v63 = vld [vmem:[#allocation59_spill] sm:$0xff] }
 0x916   : > { %6012 = vst [vmem:[#allocation76_spill] sm:$0xff] %v5270_v32  ;;  %v2279_v4 = vsub.f32 %v2263_v29, %v4933_v13  ;;  %v2275_v14 = vadd.f32 %v2274_v25, %v2245_v31  ;;  %v5288_v26 = vmul.f32 %v5176_v28, %v4808_v7  ;;  %v2277_v8 = vsub.f32 %v2243_v48, %v6014_v49  ;;  %v6018_v31 = vld [vmem:[#allocation57_spill] sm:$0xff] }
 0x917   : > { %6013 = vst [vmem:[#allocation77_spill] sm:$0xff] %v5275_v16  ;;  %v2391_v40 = vadd.f32 %v6015_v30, %v2369_v23  ;;  %v2450_v1 = vmul.f32 %v5248_v42, %v6016_v61  ;;  %v2609_v11 = vsub.f32 %v2590_v21, %v5193_v27  ;;  %v2608_v41 = vadd.f32 %v2607_v20, %v2598_v2  ;;  %v6021_v30 = vld [vmem:[#allocation48_spill] sm:$0xff] }
 0x918   : > { %v2309_v51 = vadd.f32 %v6017_v63, %v2279_v4  ;;  %v2307_v32 = vadd.f32 %v2306_v62, %v2295_v43  ;;  %v2327_v13 = vsub.f32 %v2275_v14, %v5132_v6  ;;  %v2478_v25 = vmul.f32 %v5283_v45, %v4818_v19  ;;  %v6019_v14 = vld [vmem:[#allocation35_spill] sm:$0xff]  ;;  %v6020_v43 = vld [vmem:[#allocation24_spill] sm:$0xff] }
 0x919   : > { %v2421_v29 = vsub.f32 %v2391_v40, %v6018_v31  ;;  %v2617_v48 = vadd.f32 %v2599_v35, %v5275_v16  ;;  %v2334_v23 = vmul.f32 %v5283_v45, %v4808_v7  ;;  %v5303_v49 = vpop.permute.xlu1 %2152  ;;  %v2350_v63 = vmul.f32 %v5283_v45, %v4812_v33 }
 0x91a   : > { %v2343_v21 = vadd.f32 %v5003_v37, %v2309_v51  ;;  %v2610_v4 = vsub.f32 %v2600_v39, %v5207_v56  ;;  %v2311_v6 = vsub.f32 %v2277_v8, %v6019_v14  ;;  %v2364_v40 = vmul.f32 %v5303_v49, %v4820_v9 }
 0x91b   : > { %v2451_v2 = vadd.f32 %v2450_v1, %v2421_v29  ;;  %v2332_v35 = vmul.f32 %v5303_v49, %v4808_v7  ;;  %v2628_v20 = vmul.f32 %v5248_v42, %v6020_v43  ;;  %v5317_v37 = vadd.f32 %v6021_v30, %v2608_v41  ;;  %v6024_v29 = vld [vmem:[#allocation60_spill] sm:$0xff] }
 0x91c   : > { %v2351_v62 = vadd.f32 %v2350_v63, %v2343_v21  ;;  %v2335_v51 = vadd.f32 %v2334_v23, %v2307_v32  ;;  %v5321_v39 = vmul.f32 %v5283_v45, %v6020_v43  ;;  %v2492_v1 = vmul.f32 %v5303_v49, %v4828_v17  ;;  %v6025_v23 = vld [vmem:[#allocation38_spill] sm:$0xff] }
 0x91d   : > { %v2479_v8 = vadd.f32 %v2478_v25, %v2451_v2  ;;  %v5327_v31 = vmul.f32 %v5303_v49, %v6020_v43  ;;  %v2618_v14 = vadd.f32 %v2609_v11, %v6024_v29  ;;  %v5330_v16 = vpop.permute.xlu1 %2147  ;;  %v2333_v41 = vadd.f32 %v2332_v35, %v2327_v13 }
 0x91e   : > { %6022 = vst [vmem:[#allocation54_spill] sm:$0xff] %v5321_v39  ;;  %v2365_v21 = vsub.f32 %v2351_v62, %v2364_v40  ;;  %v2359_v32 = vsub.f32 %v2335_v51, %v5015_v12  ;;  %v2619_v63 = vadd.f32 %v2610_v4, %v6025_v23  ;;  %v2506_v25 = vmul.f32 %v4814_v36, %v5330_v16  ;;  %v6027_v51 = vld [vmem:[#allocation49_spill] sm:$0xff] }
 0x91f   : > { %6023 = vst [vmem:[#allocation36_spill] sm:$0xff] %v5327_v31  ;;  %v2493_v30 = vsub.f32 %v2479_v8, %v2492_v1  ;;  %v2346_v2 = vmul.f32 %v5330_v16, %v4812_v33  ;;  %v6026_v56 = vsub.f32 %v5160_v53, %v4965_v10  ;;  %v2362_v13 = vmul.f32 %v5330_v16, %v4820_v9 }
 0x920   : > { %v2401_v11 = vsub.f32 %v2365_v21, %v5100_v18  ;;  %v2330_v12 = vmul.f32 %v5330_v16, %v4808_v7  ;;  %v2348_v4 = vmul.f32 %v5303_v49, %v4812_v33  ;;  %v5350_v35 = vmul.f32 %v5330_v16, %v6020_v43 }
 0x921   : > { %v2629_v27 = vadd.f32 %v2628_v20, %v6026_v56  ;;  %v2507_v40 = vadd.f32 %v2506_v25, %v2493_v30  ;;  %v2347_v62 = vsub.f32 %v2333_v41, %v2346_v2  ;;  %v2626_v10 = vadd.f32 %v2618_v14, %v5327_v31  ;;  %v6028_v30 = vld [vmem:[#allocation23_spill] sm:$0xff]  ;;  %v6033_v31 = vld [vmem:[#allocation50_spill] sm:$0xff] }
 0x922   : > { %v2431_v53 = vadd.f32 %v4937_v22, %v2401_v11  ;;  %v2363_v18 = vsub.f32 %v2359_v32, %v2362_v13  ;;  %v2331_v56 = vadd.f32 %v2330_v12, %v2311_v6  ;;  %v2222_v20 = vmul.f32 %v5283_v45, %v4804_v5  ;;  %v6029_v41 = vld [vmem:[#allocation47_spill] sm:$0xff]  ;;  %v6030_v6 = vld [vmem:[#allocation34_spill] sm:$0xff] }
 0x923   : > { %v2375_v8 = vadd.f32 %v6027_v51, %v2347_v62  ;;  %v2627_v1 = vadd.f32 %v2619_v63, %v5321_v39  ;;  %v2366_v21 = vmul.f32 %v5283_v45, %v4820_v9  ;;  %v5362_v25 = vmul.f32 %v5106_v38, %v6028_v30  ;;  %v6031_v11 = vld [vmem:[#allocation46_spill] sm:$0xff]  ;;  %v6032_v62 = vld [vmem:[#allocation43_spill] sm:$0xff] }
 0x924   : > { %v2443_v14 = vadd.f32 %v6029_v41, %v2431_v53  ;;  %v2403_v22 = vadd.f32 %v4887_v54, %v2363_v18  ;;  %v2349_v32 = vadd.f32 %v2348_v4, %v2331_v56  ;;  %v2223_v2 = vadd.f32 %v2222_v20, %v6030_v6  ;;  %v6034_v41 = vld [vmem:[#allocation67_spill] sm:$0xff] }
 0x925   : > { %v2523_v13 = vsub.f32 %v2507_v40, %v6031_v11  ;;  %v2625_v12 = vadd.f32 %v2617_v48, %v5350_v35  ;;  %v2379_v63 = vadd.f32 %v6032_v62, %v2375_v8  ;;  %v5372_v51 = vmul.f32 %v5146_v58, %v6020_v43  ;;  %v6035_v48 = vld [vmem:[#allocation52_spill] sm:$0xff]  ;;  %v6041_v62 = vld [vmem:[#allocation66_spill] sm:$0xff] }
 0x926   : > { %v2483_v39 = vsub.f32 %v2443_v14, %v5188_v0  ;;  %v2411_v23 = vadd.f32 %v6033_v31, %v2403_v22  ;;  %v2367_v53 = vadd.f32 %v2366_v21, %v2349_v32  ;;  %v2257_v54 = vsub.f32 %v2223_v2, %v6034_v41  ;;  %v6036_v31 = vld [vmem:[#allocation39_spill] sm:$0xff]  ;;  %v6037_v21 = vld [vmem:[#allocation30_spill] sm:$0xff] }
 0x927   : > { %v2435_v4 = vsub.f32 %v2379_v63, %v4890_v55  ;;  %v2580_v40 = vmul.f32 %v5106_v38, %v4820_v9  ;;  %v2595_v18 = vadd.f32 %v6035_v48, %v5362_v25  ;;  %v2218_v56 = vmul.f32 %v5330_v16, %v4804_v5  ;;  %v5393_v55 = vld [vmem:[%s5873_s6 + $0x4] sm:$0xf]  ;;  %v6038_v32 = vld [vmem:[#allocation31_spill] sm:$0xff] }
 0x928   : > { %v5385_v20 = vadd.f32 %v5182_v52, %v2483_v39  ;;  %v2463_v0 = vsub.f32 %v2411_v23, %v4957_v46  ;;  %v2399_v8 = vsub.f32 %v2367_v53, %v6036_v31  ;;  %v2291_v14 = vsub.f32 %v2257_v54, %v6037_v21  ;;  %v6039_v2 = vld [vmem:[#allocation55_spill] sm:$0xff]  ;;  %3954 = vmatprep.subr.msk.bf16.mxu1 %vm397_vm1, %v5393_v55  ;;  %v6040_v46 = vld [vmem:[#allocation58_spill] sm:$0xff]  ;;  %v5411_v41 = vpop.permute.xlu1 %2651  ;;  %v6043_v54 = vld [vmem:[#allocation29_spill] sm:$0xff] }
 0x929   : > { %v5396_v22 = vadd.f32 %v5110_v50, %v2435_v4  ;;  %v2604_v6 = vadd.f32 %v6038_v32, %v2580_v40  ;;  %v2620_v11 = vsub.f32 %v2595_v18, %v6039_v2  ;;  %v2219_v52 = vadd.f32 %v2218_v56, %v5281_v57  ;;  %v6042_v53 = vld [vmem:[#allocation42_spill] sm:$0xff]  ;;  %v6044_v18 = vld [vmem:[#allocation40_spill] sm:$0xff] }
 0x92a   : > { %v5404_v39 = vadd.f32 %v6040_v46, %v2523_v13  ;;  %v5407_v23 = vadd.f32 %v5223_v44, %v2463_v0  ;;  %v2433_v63 = vsub.f32 %v2399_v8, %v6041_v62  ;;  %v2299_v50 = vsub.f32 %v2291_v14, %v6042_v53  ;;  %v6047_v62 = vld [vmem:[#allocation76_spill] sm:$0xff]  ;;  %v6048_v53 = vld [vmem:[#allocation62_spill] sm:$0xff] }
 0x92b   : > { %v2642_v4 = vadd.f32 %v6043_v54, %v5261_v59  ;;  %v2356_v57 = vmul.f32 %v5210_v15, %v4812_v33  ;;  %v2614_v40 = vsub.f32 %v2604_v6, %v5153_v24  ;;  %v2235_v13 = vsub.f32 %v2219_v52, %v6044_v18  ;;  %v6045_v59 = vld [vmem:[#allocation25_spill] sm:$0xff] }
 0x92c   : > { %v2654_v44 = vmul.f32 %v5411_v41, %v5404_v39  ;;  %v2660_v56 = vmul.f32 %v5411_v41, %v5317_v37  ;;  %v2666_v0 = vmul.f32 %v5411_v41, %v2625_v12  ;;  %v2672_v31 = vmul.f32 %v5411_v41, %v2626_v10  ;;  %v6046_v12 = vld [vmem:[#allocation28_spill] sm:$0xff]  ;;  %v6049_v18 = vld [vmem:[#allocation53_spill] sm:$0xff] }
 0x92d   : > { %v2678_v8 = vmul.f32 %v5411_v41, %v2627_v1  ;;  %v2418_v21 = vmul.f32 %v5248_v42, %v6045_v59  ;;  %v2634_v14 = vadd.f32 %v2620_v11, %v5372_v51  ;;  %v2220_v24 = vmul.f32 %v5303_v49, %v4804_v5 }
 0x92e   : > { %2656 = vrot.lane.b32.xlu1 %v2654_v44, %s4159_s24  ;;  %v4080_v32 = vpack.i.bf16 %v2666_v0, %v2660_v56  ;;  %v2684_v6 = vmul.f32 %v5411_v41, %v2629_v27  ;;  %v2690_v37 = vmul.f32 %v5411_v41, %v5215_v47  ;;  %v2467_v10 = vsub.f32 %v2433_v63, %v6046_v12  ;;  %v6050_v44 = vld [vmem:[#allocation64_spill] sm:$0xff] }
 0x92f   : > { %v2720_v1 = vmul.f32 %v5411_v41, %v5226_v34  ;;  %v2726_v52 = vmul.f32 %v5411_v41, %v5233_v60  ;;  %v2732_v11 = vmul.f32 %v5411_v41, %v2642_v4  ;;  %v2339_v5 = vadd.f32 %v5288_v26, %v2299_v50  ;;  %v6051_v50 = vld [vmem:[#allocation74_spill] sm:$0xff] }
 0x930   : > { %4081 = vrot.lane.b32.xlu0 %v4080_v32, %s4159_s24  ;;  %v4085_v46 = vpack.i.bf16 %v2678_v8, %v2672_v31  ;;  %v2481_v27 = vsub.f32 %v2467_v10, %v5242_v3  ;;  %v2738_v47 = vmul.f32 %v5411_v41, %v6047_v62  ;;  %v2633_v63 = vadd.f32 %v6048_v53, %v2614_v40  ;;  %v6052_v8 = vld [vmem:[#allocation61_spill] sm:$0xff] }
 0x931   : > { %v2357_v54 = vadd.f32 %v2356_v57, %v2339_v5  ;;  %v2221_v34 = vadd.f32 %v2220_v24, %v6049_v18  ;;  %v2287_v56 = vadd.f32 %v6050_v44, %v2235_v13  ;;  %v2336_v60 = vmul.f32 %v5146_v58, %v4808_v7  ;;  %v6053_v57 = vld [vmem:[#allocation63_spill] sm:$0xff]  ;;  %v6054_v24 = vld [vmem:[#allocation68_spill] sm:$0xff]  ;;  %v6057_v5 = vld [vmem:[#allocation65_spill] sm:$0xff] }
 0x932   : > { %4086 = vrot.lane.b32.xlu1 %v4085_v46, %s4159_s24  ;;  %v4090_v26 = vpack.i.bf16 %v2690_v37, %v2684_v6  ;;  %v2499_v4 = vsub.f32 %v2481_v27, %v6051_v50  ;;  %v2696_v3 = vmul.f32 %v5411_v41, %v2633_v63  ;;  %v2702_v0 = vmul.f32 %v5411_v41, %v2634_v14  ;;  %v6055_v13 = vld [vmem:[#allocation75_spill] sm:$0xff]  ;;  %v6058_v62 = vld [vmem:[#allocation73_spill] sm:$0xff]  ;;  %v6060_v18 = vld [vmem:[#allocation32_spill] sm:$0xff] }
 0x933   : > { %v4095_v31 = vpack.i.bf16 %v2726_v52, %v2720_v1  ;;  %v2361_v40 = vadd.f32 %v6052_v8, %v2357_v54  ;;  %v2255_v32 = vsub.f32 %v2221_v34, %v6053_v57  ;;  %v2321_v12 = vadd.f32 %v6054_v24, %v2287_v56  ;;  %v6056_v1 = vld [vmem:[#allocation41_spill] sm:$0xff]  ;;  %v6061_v56 = vld [vmem:[#allocation56_spill] sm:$0xff] }
 0x934   : > { %4091 = vrot.lane.b32.xlu0 %v4090_v26, %s4159_s24  ;;  %v2517_v7 = vsub.f32 %v2499_v4, %v6055_v13  ;;  %v4100_v10 = vpack.i.bf16 %v2738_v47, %v2732_v11  ;;  %v2352_v6 = vmul.f32 %v5146_v58, %v4812_v33  ;;  %v2438_v37 = vmul.f32 %v5106_v38, %v6045_v59  ;;  %v6059_v63 = vld [vmem:[#allocation37_spill] sm:$0xff]  ;;  %v6062_v26 = vld [vmem:[#allocation22_spill] sm:$0xff] }
 0x935   : > { %v2407_v14 = vsub.f32 %v2361_v40, %v5362_v25  ;;  %v2267_v52 = vsub.f32 %v2255_v32, %v6056_v1  ;;  %v2329_v46 = vadd.f32 %v6057_v5, %v2321_v12  ;;  %v2470_v27 = vmul.f32 %v5106_v38, %v6016_v61  ;;  %v6064_v40 = vld [vmem:[#allocation44_spill] sm:$0xff]  ;;  %v6065_v24 = vld [vmem:[#allocation45_spill] sm:$0xff] }
 0x936   : > { %4096 = vrot.lane.b32.xlu1 %v4095_v31, %s4159_s24  ;;  %v5471_v53 = vadd.f32 %v6058_v62, %v2517_v7  ;;  %v4105_v11 = vpack.i.bf16 %v2702_v0, %v2696_v3  ;;  %v2370_v47 = vmul.f32 %v5176_v28, %v4820_v9  ;;  %v2518_v54 = vmul.f32 %v4814_v36, %v6059_v63  ;;  %v6063_v0 = vld [vmem:[#allocation69_spill] sm:$0xff] }
 0x937   : > { %v5477_v25 = vsub.f32 %v2407_v14, %v2418_v21  ;;  %v2323_v34 = vadd.f32 %v6060_v18, %v2267_v52  ;;  %v2353_v44 = vsub.f32 %v2329_v46, %v2352_v6  ;;  %v2544_v50 = vmul.f32 %v6062_v26, %v6061_v56  ;;  %v6066_v7 = vld [vmem:[#allocation33_spill] sm:$0xff]  ;;  %v6067_v52 = vld [vmem:[#allocation27_spill] sm:$0xff] }
 0x938   : > { %4101 = vrot.lane.b32.xlu0 %v4100_v10, %s4159_s24  ;;  %v2562_v4 = vmul.f32 %v5176_v28, %v6020_v43  ;;  %v5487_v3 = vmul.f32 %v5210_v15, %v6020_v43  ;;  %v2605_v31 = vadd.f32 %v6063_v0, %v2438_v37  ;;  %v2615_v8 = vadd.f32 %v2518_v54, %v2470_v27 }
 0x939   : > { %v2337_v21 = vadd.f32 %v2336_v60, %v2323_v34  ;;  %v2344_v57 = vmul.f32 %v6064_v40, %v4812_v33  ;;  %v2371_v32 = vsub.f32 %v2353_v44, %v2370_v47  ;;  %v2388_v12 = vmul.f32 %v6065_v24, %v6028_v30 }
 0x93a   : > { %4106 = vrot.lane.b32.xlu1 %v4105_v11, %s4159_s24  ;;  %v2621_v13 = vsub.f32 %v2605_v31, %v2544_v50  ;;  %v2622_v10 = vsub.f32 %v2615_v8, %v6066_v7  ;;  %v2644_v6 = vmul.f32 %v5106_v38, %v6020_v43  ;;  %v2372_v1 = vmul.f32 %v5210_v15, %v4820_v9 }
 0x93b   : > { %v2345_v14 = vadd.f32 %v2344_v57, %v2337_v21  ;;  %v2389_v60 = vadd.f32 %v2388_v12, %v2371_v32  ;;  %v2422_v33 = vmul.f32 %v6067_v52, %v6045_v59  ;;  %v2386_v47 = vmul.f32 %v5248_v42, %v6028_v30  ;;  %v6068_v21 = vld [vmem:[#allocation51_spill] sm:$0xff] }
 0x93c   : > { %v2635_v5 = vadd.f32 %v2621_v13, %v2562_v4  ;;  %v2636_v46 = vadd.f32 %v2622_v10, %v5487_v3  ;;  %v2744_v62 = vmul.f32 %v5411_v41, %v2644_v6  ;;  %v2454_v31 = vmul.f32 %v6067_v52, %v6016_v61  ;;  %v5526_v10 = vld [vmem:[%s5873_s6 + $0xc] sm:$0xf] }
 0x93d   : > { %v2373_v11 = vsub.f32 %v2345_v14, %v2372_v1  ;;  %v2423_v18 = vadd.f32 %v2422_v33, %v2389_v60  ;;  %v2474_v42 = vmul.f32 %v5330_v16, %v4818_v19  ;;  %v2567_v57 = vsub.f32 %v5471_v53, %v6068_v21 }
 0x93e   : > { %v2708_v38 = vmul.f32 %v5411_v41, %v2635_v5  ;;  %v2714_v43 = vmul.f32 %v5411_v41, %v2636_v46  ;;  %2746 = vrot.lane.b32.xlu1 %v2744_v62, %s4159_s24  ;;  %v2476_v41 = vmul.f32 %v5303_v49, %v4818_v19  ;;  %v2510_v13 = vmul.f32 %v4814_v36, %v5283_v45  ;;  %v6069_v62 = vld [vmem:[#allocation72_spill] sm:$0xff] }
 0x93f   : > { %v2387_v9 = vsub.f32 %v2373_v11, %v2386_v47  ;;  %v2471_v34 = vsub.f32 %v2423_v18, %v2470_v27  ;;  %v2809_v6 = vsel %vm397_vm1, %v5393_v55, 0  ;;  %v2472_v14 = vmul.f32 %v6064_v40, %v4818_v19  ;;  %v6070_v47 = vld [vmem:[#allocation70_spill] sm:$0xff] }
 0x940   : > { %v4110_v44 = vpack.i.bf16 %v2714_v43, %v2708_v38  ;;  %3877 = vmatpush3.bf16.msra.mxu1 %v2809_v6  ;;  %v2488_v60 = vmul.f32 %v6064_v40, %v4828_v17  ;;  %v6071_v38 = vld [vmem:[#allocation71_spill] sm:$0xff]  ;;  %v6077_v6 = vld [vmem:[#allocation18_spill] sm:$0xff] }
 0x941   : > { %v2439_v56 = vadd.f32 %v2438_v37, %v2387_v9  ;;  %v2477_v12 = vadd.f32 %v2476_v41, %v2471_v34  ;;  %v2494_v37 = vmul.f32 %v5283_v45, %v4828_v17  ;;  %v2473_v52 = vadd.f32 %v2472_v14, %v5396_v22  ;;  %3955 = vmatprep.subr.msk.bf16.mxu1 %vm397_vm1, %v5526_v10 }
 0x942   : > { %4111 = vrot.lane.b32.xlu0 %v4110_v44, %s4159_s24  ;;  %v2489_v46 = vadd.f32 %v2488_v60, %v5407_v23  ;;  %v6073_v23 = vld [vmem:[#allocation36_spill] sm:$0xff] }
 0x943   : > { %v2455_v8 = vadd.f32 %v2454_v31, %v2439_v56  ;;  %v2495_v1 = vadd.f32 %v2494_v37, %v2477_v12  ;;  %v2501_v55 = vsub.f32 %v2473_v52, %v6069_v62  ;;  %v2452_v31 = vmul.f32 %v6065_v24, %v6016_v61 }
 0x944   : > { %v2513_v18 = vsub.f32 %v2489_v46, %v6070_v47  ;;  %v2508_v37 = vmul.f32 %v4814_v36, %v5303_v49  ;;  %v6079_v46 = vld [vmem:[#allocation20_spill] sm:$0xff] }
 0x945   : > { %v2475_v32 = vsub.f32 %v2455_v8, %v2474_v42  ;;  %v2519_v33 = vsub.f32 %v2495_v1, %v2518_v54  ;;  %v2515_v43 = vadd.f32 %v6071_v38, %v2501_v55  ;;  %v6072_v54 = vld [vmem:[#allocation38_spill] sm:$0xff]  ;;  %v6075_v8 = vld [vmem:[#allocation77_spill] sm:$0xff]  ;;  %v6078_v1 = vld [vmem:[#allocation19_spill] sm:$0xff]  ;;  %v2304_v62 = vmul.f32 %v6079_v46, %v5283_v45 }
 0x946   : > { %v5549_v9 = vadd.f32 %v6024_v29, %v2513_v18  ;;  %v2453_v29 = vsub.f32 %v5477_v25, %v2452_v31  ;;  %v6076_v25 = vld [vmem:[#allocation21_spill] sm:$0xff]  ;;  %v2280_v55 = vmul.f32 %v6078_v1, %v5146_v58 }
 0x947   : > { %v2503_v27 = vadd.f32 %v6063_v0, %v2475_v32  ;;  %v5540_v11 = vadd.f32 %v6066_v7, %v2519_v33  ;;  %v2504_v7 = vmul.f32 %v4814_v36, %v6064_v40  ;;  %v2270_v36 = vmul.f32 %v6078_v1, %v5303_v49 }
 0x948   : > { %v2557_v34 = vsub.f32 %v5549_v9, %v6073_v23  ;;  %v2487_v41 = vsub.f32 %v2453_v29, %v6035_v48  ;;  %v2140_v48 = vmul.f32 %v6064_v40, %v6077_v6  ;;  %v2155_v33 = vmul.f32 %v5303_v49, %v6077_v6 }
 0x949   : > { %v2511_v0 = vadd.f32 %v2510_v13, %v2503_v27  ;;  %v2565_v22 = vsub.f32 %v5540_v11, %v5487_v3  ;;  %v2505_v56 = vadd.f32 %v2504_v7, %v5385_v20  ;;  %v2490_v27 = vmul.f32 %v5330_v16, %v4828_v17 }
 0x94a   : > { %v2150_v17 = vmul.f32 %v5330_v16, %v6077_v6  ;;  %v2248_v47 = vmul.f32 %v5146_v58, %v6076_v25  ;;  %v2392_v7 = vmul.f32 %v5146_v58, %v6028_v30 }
 0x94b   : > { %v2545_v5 = vsub.f32 %v2511_v0, %v2544_v50  ;;  %v2535_v50 = vsub.f32 %v2515_v43, %v6072_v54  ;;  %v2531_v42 = vsub.f32 %v2505_v56, %v6075_v8  ;;  %v2491_v12 = vsub.f32 %v2487_v41, %v2490_v27 }
 0x94c   : > { %v2160_v0 = vmul.f32 %v5283_v45, %v6077_v6  ;;  %v2249_v54 = vadd.f32 %v2248_v47, %v2155_v33  ;;  %v2264_v56 = vmul.f32 %v6078_v1, %v6064_v40  ;;  %v2252_v8 = vmul.f32 %v5210_v15, %v6076_v25 }
 0x94d   : > { %v5542_v19 = vadd.f32 %v2562_v4, %v2545_v5  ;;  %v6074_v4 = vld [vmem:[#allocation54_spill] sm:$0xff]  ;;  %v5565_v32 = vadd.f32 %v5350_v35, %v2531_v42  ;;  %v2509_v20 = vsub.f32 %v2491_v12, %v2508_v37  ;;  %v2236_v35 = vmul.f32 %v5330_v16, %v6076_v25 }
 0x94e   : > { %v5557_v44 = vadd.f32 %v6074_v4, %v2535_v50  ;;  %v2250_v5 = vmul.f32 %v5176_v28, %v6076_v25  ;;  %v2284_v50 = vmul.f32 %v6078_v1, %v5210_v15  ;;  %v2314_v4 = vmul.f32 %v6079_v46, %v5176_v28 }
 0x94f   : > { %v5573_v13 = vadd.f32 %v6039_v2, %v2509_v20  ;;  %v2237_v14 = vadd.f32 %v2236_v35, %v2140_v48  ;;  %v2232_v2 = vmul.f32 %v6064_v40, %v6076_v25  ;;  %v2265_v41 = vadd.f32 %v2264_v56, %v2249_v54 }
 0x950   : > { %v2251_v18 = vadd.f32 %v2250_v5, %v2160_v0  ;;  %v2296_v27 = vmul.f32 %v6079_v46, %v6064_v40  ;;  %v2210_v12 = vmul.f32 %v6059_v63, %v6077_v6  ;;  %v2426_v37 = vmul.f32 %v5176_v28, %v6045_v59 }
 0x951   : > { %v2561_v24 = vsub.f32 %v5573_v13, %v5372_v51  ;;  %v2271_v60 = vadd.f32 %v2270_v36, %v2237_v14  ;;  %v2233_v52 = vadd.f32 %v2232_v2, %v2150_v17  ;;  %v2238_v20 = vmul.f32 %v5303_v49, %v6076_v25 }
 0x952   : > { %v2285_v31 = vadd.f32 %v2284_v50, %v2251_v18  ;;  %v2382_v35 = vmul.f32 %v5303_v49, %v6028_v30  ;;  %v2316_v14 = vmul.f32 %v6079_v46, %v5210_v15  ;;  %v2253_v17 = vadd.f32 %v2252_v8, %v2210_v12 }
 0x953   : > { %v2305_v38 = vadd.f32 %v2304_v62, %v2271_v60  ;;  %v2281_v43 = vsub.f32 %v2233_v52, %v2280_v55  ;;  %v2180_v2 = vmul.f32 %v5146_v58, %v6077_v6  ;;  %v2268_v0 = vmul.f32 %v6078_v1, %v5330_v16 }
 0x954   : > { %v2297_v48 = vadd.f32 %v2296_v27, %v2285_v31  ;;  %v2317_v52 = vsub.f32 %v2265_v41, %v2316_v14  ;;  %v2404_v33 = vmul.f32 %v6059_v63, %v6028_v30  ;;  %v2282_v5 = vmul.f32 %v6078_v1, %v5176_v28 }
 0x955   : > { %v2393_v42 = vsub.f32 %v2305_v38, %v2392_v7  ;;  %v2315_v29 = vsub.f32 %v2281_v43, %v2314_v4  ;;  %v2460_v62 = vmul.f32 %v5210_v15, %v6016_v61  ;;  %v2416_v55 = vmul.f32 %v5283_v45, %v6045_v59 }
 0x956   : > { %v2239_v47 = vadd.f32 %v2238_v20, %v2180_v2  ;;  %v2380_v18 = vmul.f32 %v5330_v16, %v6028_v30  ;;  %v2405_v38 = vsub.f32 %v2297_v48, %v2404_v33  ;;  %v2412_v43 = vmul.f32 %v5330_v16, %v6045_v59 }
 0x957   : > { %v2427_v36 = vsub.f32 %v2393_v42, %v2426_v37  ;;  %v2383_v60 = vadd.f32 %v2382_v35, %v2315_v29  ;;  %v2283_v54 = vsub.f32 %v2253_v17, %v2282_v5  ;;  %v2312_v31 = vmul.f32 %v6079_v46, %v5146_v58 }
 0x958   : > { %v2269_v7 = vsub.f32 %v2239_v47, %v2268_v0  ;;  %v2381_v56 = vsub.f32 %v2317_v52, %v2380_v18  ;;  %v2384_v8 = vmul.f32 %v5283_v45, %v6028_v30  ;;  %v2548_v42 = vmul.f32 %v6062_v26, %v6059_v63 }
 0x959   : > { %v2461_v50 = vsub.f32 %v2427_v36, %v2460_v62  ;;  %v2417_v4 = vadd.f32 %v2416_v55, %v2383_v60  ;;  %v2468_v29 = vmul.f32 %v6059_v63, %v6016_v61  ;;  %v2540_v41 = vmul.f32 %v6062_v26, %v5210_v15 }
 0x95a   : > { %v2324_v27 = vmul.f32 %v6079_v46, %v6059_v63  ;;  %v2413_v12 = vsub.f32 %v2405_v38, %v2412_v43  ;;  %v2436_v37 = vmul.f32 %v6059_v63, %v6045_v59  ;;  %v2313_v20 = vadd.f32 %v2312_v31, %v2283_v54  ;;  %v3561_v54 = vld [vmem:[%s5873_s6 + $0x8] sm:$0xf] }
 0x95b   : > { %v2414_v35 = vmul.f32 %v5303_v49, %v6045_v59  ;;  %v2549_v48 = vsub.f32 %v2461_v50, %v2548_v42  ;;  %v2446_v14 = vmul.f32 %v5303_v49, %v6016_v61  ;;  %v2240_v36 = vmul.f32 %v5283_v45, %v6076_v25 }
 0x95c   : > { %v2325_v17 = vadd.f32 %v2324_v27, %v2269_v7  ;;  %v2469_v2 = vsub.f32 %v2417_v4, %v2468_v29  ;;  %v2437_v0 = vadd.f32 %v2436_v37, %v2381_v56  ;;  %v2385_v60 = vadd.f32 %v2384_v8, %v2313_v20 }
 0x95d   : > { %v2444_v52 = vmul.f32 %v5330_v16, %v6016_v61  ;;  %v2448_v33 = vmul.f32 %v5283_v45, %v6016_v61  ;;  %v2376_v5 = vmul.f32 %v6064_v40, %v6028_v30  ;;  %v2185_v62 = vmul.f32 %v5176_v28, %v6077_v6 }
 0x95e   : > { %v2190_v55 = vmul.f32 %v5210_v15, %v6077_v6  ;;  %v2447_v47 = vsub.f32 %v2413_v12, %v2446_v14  ;;  %v2536_v18 = vmul.f32 %v6062_v26, %v5146_v58  ;;  %v2538_v38 = vmul.f32 %v6062_v26, %v5176_v28 }
 0x95f   : > { %v2415_v43 = vsub.f32 %v2385_v60, %v2414_v35  ;;  %v2377_v50 = vadd.f32 %v2376_v5, %v2325_v17  ;;  %v2241_v7 = vadd.f32 %v2240_v36, %v2185_v62  ;;  %v2260_v4 = vmul.f32 %v6059_v63, %v6076_v25 }
 0x960   : > { %v2272_v6 = vmul.f32 %v6078_v1, %v5283_v45  ;;  %v2541_v56 = vsub.f32 %v2469_v2, %v2540_v41  ;;  %v2449_v31 = vadd.f32 %v2448_v33, %v2437_v0  ;;  %v2428_v42 = vmul.f32 %v5210_v15, %v6045_v59 }
 0x961   : > { %v2445_v8 = vadd.f32 %v2444_v52, %v2415_v43  ;;  %v2261_v27 = vadd.f32 %v2260_v4, %v2190_v55  ;;  %v2292_v12 = vmul.f32 %v6078_v1, %v6059_v63  ;;  %v2300_v37 = vmul.f32 %v6079_v46, %v5330_v16 }
 0x962   : > { %v2302_v25 = vmul.f32 %v6079_v46, %v5303_v49  ;;  %v2537_v35 = vsub.f32 %v2447_v47, %v2536_v18  ;;  %v2875_v41 = vsel %vm397_vm1, %v3561_v54, 0  ;;  %v2520_v14 = vmul.f32 %v6062_v26, %v6064_v40 }
 0x963   : > { %v2429_v2 = vsub.f32 %v2377_v50, %v2428_v42  ;;  %v2273_v0 = vadd.f32 %v2272_v6, %v2261_v27  ;;  %v2293_v60 = vsub.f32 %v2241_v7, %v2292_v12  ;;  %v2539_v52 = vadd.f32 %v2538_v38, %v2449_v31 }
 0x964   : > { %v2458_v33 = vmul.f32 %v5176_v28, %v6016_v61  ;;  %v2528_v5 = vmul.f32 %v6062_v26, %v5283_v45  ;;  %v6080_v54 = vmov 0.0   ;;  %v2394_v45 = vmul.f32 %v5176_v28, %v6028_v30 }
 0x965   : > { %v2301_v62 = vsub.f32 %v2293_v60, %v2300_v37  ;;  %v2303_v55 = vsub.f32 %v2273_v0, %v2302_v25  ;;  %v2396_v6 = vmul.f32 %v5210_v15, %v6028_v30  ;;  %v2945_v27 = vsel %vm397_vm1, %v5526_v10, 0 }
 0x966   : > { %v2459_v4 = vadd.f32 %v2458_v33, %v2429_v2  ;;  %v2424_v10 = vmul.f32 %v5146_v58, %v6045_v59  ;;  %v2440_v2 = vmul.f32 %v6064_v40, %v6016_v61  ;;  %v2456_v60 = vmul.f32 %v5146_v58, %v6016_v61 }
 0x967   : > { %v2395_v42 = vsub.f32 %v2303_v55, %v2394_v45  ;;  %v2526_v51 = vmul.f32 %v6062_v26, %v5303_v49 }
 0x9a0   : > { %v2657_v29 = vpop.permute.xlu1 %2656 }
 0x9a1   : > { %v2659_v20 = vsel %vm716_vm3, %v2549_v48, %v2657_v29  ;;  %v2521_v48 = vadd.f32 %v2520_v14, %v2445_v8  ;;  %v2397_v29 = vadd.f32 %v2396_v6, %v2301_v62 }
 0x9a2   : > { %v2750_v17 = vpack.c.bf16 %v2659_v20, %v2659_v20  ;;  %v4082_v36 = vpop.permute.xlu0 %4081  ;;  %v2529_v20 = vadd.f32 %v2528_v5, %v2459_v4 }
 0x9a3   : > { %v4084_v63 = vunpack.i.h.bf16 %v4082_v36  ;;  %v4083_v1 = vunpack.i.l.bf16 %v4082_v36  ;;  %v2425_v36 = vadd.f32 %v2424_v10, %v2395_v42 }
 0x9a4   : > { %3873 = vmatmul.mubr.msk.bf16.vlgmr.msra.gmra.mxu0 %vm368_vm0, %v2750_v17  ;;  %v4087_v46 = vpop.permute.xlu1 %4086 }
 0x9a5   : > { %v2671_v47 = vsel %vm716_vm3, %v2541_v56, %v4084_v63  ;;  %v2665_v18 = vsel %vm716_vm3, %v2567_v57, %v4083_v1  ;;  %v4089_v38 = vunpack.i.h.bf16 %v4087_v46  ;;  %v4088_v43 = vunpack.i.l.bf16 %v4087_v46  ;;  %3883 = vmatpush3.bf16.msra.mxu0 %v2875_v41  ;;  %3884 = vmatprep.mubr.msk.bf16.mxu0 %vm4155_vm2, %v6080_v54 }
 0x9a6   : > { %v2798_v50 = vpack.c.bf16 %v2671_v47, %v2665_v18  ;;  %v4092_v7 = vpop.permute.xlu0 %4091  ;;  %v2441_v1 = vadd.f32 %v2440_v2, %v2425_v36  ;;  %v3071_v18 = vld [vmem:[%s5874_s7] sm:$0xf] }
 0x9a7   : > { %v2683_v56 = vsel %vm716_vm3, %v2537_v35, %v4089_v38  ;;  %v2677_v53 = vsel %vm716_vm3, %v2539_v52, %v4088_v43  ;;  %v4094_v21 = vunpack.i.h.bf16 %v4092_v7  ;;  %v4093_v57 = vunpack.i.l.bf16 %v4092_v7  ;;  %v3578_v43 = vld [vmem:[%s5874_s7 + $0xc] sm:$0xf] }
 0x9a8   : > { %v2799_v31 = vpack.c.bf16 %v2683_v56, %v2677_v53  ;;  %3878 = vmatprep.mubr.msk.bf16.mxu1 %vm368_vm0, %v2798_v50  ;;  %v4097_v8 = vpop.permute.xlu1 %4096  ;;  %v2408_v35 = vmul.f32 %v6064_v40, %v6045_v59  ;;  %v2524_v40 = vmul.f32 %v6062_v26, %v5330_v16  ;;  %v3076_v38 = vsel %vm397_vm1, %v3071_v18, 0 }
 0x9a9   : > { %v2695_v28 = vsel %vm716_vm3, %v5542_v19, %v4094_v21  ;;  %v2689_v15 = vsel %vm716_vm3, %v2565_v22, %v4093_v57  ;;  %v4099_v30 = vunpack.i.h.bf16 %v4097_v8  ;;  %v4098_v12 = vunpack.i.l.bf16 %v4097_v8 }
 0x9aa   : > { %v2860_v37 = vpack.c.bf16 %v2695_v28, %v2689_v15  ;;  %v4102_v25 = vpop.permute.xlu0 %4101  ;;  %3879 = vmatmul.mubr.msk.bf16.vlgmr.msra.gmra.mxu1 %vm368_vm0, %v2799_v31  ;;  %v2409_v17 = vadd.f32 %v2408_v35, %v2397_v29  ;;  %v2525_v58 = vadd.f32 %v2524_v40, %v2441_v1 }
 0x9ab   : > { %v2731_v3 = vsel %vm716_vm3, %v2557_v34, %v4099_v30  ;;  %v2725_v11 = vsel %vm716_vm3, %v5557_v44, %v4098_v12  ;;  %v4104_v19 = vunpack.i.h.bf16 %v4102_v25  ;;  %v4103_v22 = vunpack.i.l.bf16 %v4102_v25  ;;  %3897 = vmatpush3.bf16.msra.mxu1 %v2945_v27  ;;  %v3568_v44 = vld [vmem:[%s5873_s6 + $0x10] sm:$0xf] }
 0x9ac   : > { %v2934_v41 = vpack.c.bf16 %v2731_v3, %v2725_v11  ;;  %3885 = vmatmul.mubr.msk.bf16.vlgmr.msra.gmra.mxu0 %vm368_vm0, %v2860_v37  ;;  %v4107_v14 = vpop.permute.xlu1 %4106  ;;  %3902 = vmatprep.subr.bf16.mxu1 %v6080_v54  ;;  %v3003_v52 = vsel %vm397_vm1, %v3568_v44, 0  ;;  %v2457_v33 = vsub.f32 %v2409_v17, %v2456_v60 }
 0x9ad   : > { %v2743_v59 = vsel %vm716_vm3, %v2521_v48, %v4104_v19  ;;  %v2737_v9 = vsel %vm716_vm3, %v5565_v32, %v4103_v22  ;;  %v4109_v23 = vunpack.i.h.bf16 %v4107_v14  ;;  %v4108_v34 = vunpack.i.l.bf16 %v4107_v14  ;;  %3888 = vmatprep.mubr.msk.bf16.mxu0 %vm4155_vm2, %v6080_v54 }
 0x9ae   : > { %3898 = vmatprep.mubr.msk.bf16.mxu1 %vm368_vm0, %v2934_v41  ;;  %v2935_v63 = vpack.c.bf16 %v2743_v59, %v2737_v9  ;;  %v2527_v13 = vsub.f32 %v2457_v33, %v2526_v51  ;;  %v3574_v33 = vld [vmem:[%s5874_s7 + $0x8] sm:$0xf] }
 0x9af   : > { %v2707_v0 = vsel %vm716_vm3, %v2529_v20, %v4109_v23  ;;  %v2701_v32 = vsel %vm716_vm3, %v2561_v24, %v4108_v34 }
 0x9b0   : > { %v2861_v46 = vpack.c.bf16 %v2707_v0, %v2701_v32  ;;  %v2747_v48 = vpop.permute.xlu1 %2746 }
 0x9b1   : > { %v2749_v16 = vsel %vm716_vm3, %v5404_v39, %v2747_v48  ;;  %v3571_v39 = vld [vmem:[%s5874_s7 + $0x4] sm:$0xf] }
 0x9b2   : > { %3899 = vmatmul.mubr.msk.bf16.vlgmr.msra.gmra.mxu1 %vm368_vm0, %v2935_v63  ;;  %v2996_v62 = vpack.c.bf16 %v2749_v16, %v2749_v16  ;;  %3956 = vmatprep.subr.msk.bf16.mxu0 %vm397_vm1, %v3571_v39  ;;  %v3129_v47 = vsel %vm397_vm1, %v3571_v39, 0 }
 0x9b3   : > { %3903 = vmatpush3.bf16.msra.mxu1 %v3003_v52  ;;  %3904 = vmatprep.mubr.msk.bf16.mxu1 %vm4155_vm2, %v6080_v54 }
 0x9b4   : > { %v4112_v61 = vpop.permute.xlu0 %4111  ;;  %3889 = vmatmul.mubr.msk.bf16.gmra.mxu0 %vm368_vm0, %v2861_v46  ;;  %3908 = vmatprep.subr.bf16.mxu1 %v6080_v54 }
 0x9b5   : > { %v4114_v24 = vunpack.i.h.bf16 %v4112_v61  ;;  %v4113_v5 = vunpack.i.l.bf16 %v4112_v61  ;;  %3892 = vmatprep.mubr.msk.bf16.mxu0 %vm4155_vm2, %v6080_v54  ;;  %3915 = vmatpush3.bf16.msra.mxu0 %v3129_v47  ;;  %v3195_v61 = vsel %vm397_vm1, %v3574_v33, 0  ;;  %v6092_v33 = vld [vmem:[#allocation17_spill] sm:$0xff] }
 0x9b6   : > { %3957 = vmatprep.subr.msk.bf16.mxu0 %vm397_vm1, %v3578_v43 }
 0x9b7   : > { %v2719_v49 = vsel %vm716_vm3, %v2525_v58, %v4114_v24  ;;  %v2713_v26 = vsel %vm716_vm3, %v2527_v13, %v4113_v5  ;;  %v3265_v13 = vsel %vm397_vm1, %v3578_v43, 0 }
 0x9b8   : > { %v2862_v55 = vpack.c.bf16 %v2719_v49, %v2713_v26  ;;  %v3581_v26 = vld [vmem:[%s5874_s7 + $0x10] sm:$0xf] }
 0x9ba   : > { %3905 = vmatmul.mubr.msk.bf16.vlgmr.msra.gmra.mxu1 %vm368_vm0, %v2996_v62 }
 0x9bb   : > { %3910 = vmatprep.mubr.msk.bf16.mxu1 %vm4155_vm2, %v6080_v54  ;;  %3909 = vmatpush3.bf16.msra.mxu1 %v3076_v38 }
 0x9bc   : > { %3893 = vmatmul.mubr.msk.bf16.gmra.mxu0 %vm368_vm0, %v2862_v55  ;;  %3920 = vmatprep.subr.bf16.mxu1 %v6080_v54  ;;  %v3323_v55 = vsel %vm397_vm1, %v3581_v26, 0 }
 0xa64   : > { %v2792_v50 = vpop.f32.mrf.mxu0 }
 0xa65   : > { %v3046_v7 = vmul.f32 0.044715, %v2792_v50  ;;  %v3045_v17 = vmul.f32 0.5, %v2792_v50 }
 0xa66   : > { %v3874_v4 = vpop.f32.mrf.mxu0 }
 0xa67   : > { %v3047_v45 = vmul.f32 %v3046_v7, %v2792_v50 }
 0xa68   : > { %v2795_v6 = vpop.f32.mrf.mxu0 }
 0xa69   : > { %v3048_v56 = vmul.f32 %v3047_v45, %v2792_v50 }
 0xa6a   : > { %v3875_v53 = vpop.f32.mrf.mxu0  ;;  %v3880_v21 = vpop.f32.mrf.mxu1 }
 0xa6b   : > { %v3049_v57 = vadd.f32 %v3048_v56, %v2792_v50  ;;  %v6081_v53 = vld [vmem:[#allocation3_spill] sm:$0xff] }
 0xa6c   : > { %v2845_v31 = vpop.f32.mrf.mxu1  ;;  %v2911_v8 = vpop.f32.mrf.mxu0 }
 0xa6d   : > { %v3050_v42 = vmul.f32 0.7978846, %v3049_v57 }
 0xa6e   : > { %v3881_v29 = vpop.f32.mrf.mxu1  ;;  %v3886_v27 = vpop.f32.mrf.mxu0 }
 0xa6f   : > { %4128 = vtanh.f32 %v3050_v42  ;;  %v6083_v42 = vld [vmem:[#allocation10_spill] sm:$0xff] }
 0xa70   : > { %v2848_v28 = vpop.f32.mrf.mxu1  ;;  %v2914_v15 = vpop.f32.mrf.mxu0 }
 0xa72   : > { %v3887_v30 = vpop.f32.mrf.mxu0  ;;  %v3900_v12 = vpop.f32.mrf.mxu1 }
 0xa74   : > { %v2919_v37 = vpop.f32.mrf.mxu0  ;;  %v2981_v25 = vpop.f32.mrf.mxu1 }
 0xa76   : > { %v3890_v20 = vpop.f32.mrf.mxu0  ;;  %v3901_v35 = vpop.f32.mrf.mxu1 }
 0xa78   : > { %v2922_v10 = vpop.f32.mrf.mxu0  ;;  %v2984_v3 = vpop.f32.mrf.mxu1 }
 0xa7a   : > { %v3891_v11 = vpop.f32.mrf.mxu0  ;;  %v3039_v19 = vpop.f32.mrf.mxu1 }
 0xa7c   : > { %v4129_v22 = vpop.eup %4128  ;;  %v2927_v41 = vpop.f32.mrf.mxu0 }
 0xa7d   : > { %v3906_v14 = vpop.f32.mrf.mxu1  ;;  %v3052_v36 = vadd.f32 1.0, %v4129_v22 }
 0xa7e   : > { %v3894_v59 = vpop.f32.mrf.mxu0 }
 0xa7f   : > { %v3042_v9 = vpop.f32.mrf.mxu1  ;;  %v3053_v23 = vmul.f32 %v3052_v36, %v3045_v17  ;;  %v6088_v17 = vld [vmem:[#allocation11_spill] sm:$0xff] }
 0xa80   : > { %v2930_v34 = vpop.f32.mrf.mxu0 }
 0xa81   : > { %v3907_v44 = vpop.f32.mrf.mxu1  ;;  %v3057_v2 = vmul.f32 %v3880_v21, %v3053_v23  ;;  %v3055_v0 = vmul.f32 %v3053_v23, %v2845_v31  ;;  %v3054_v32 = vmul.f32 %v3053_v23, %v2792_v50  ;;  %v3058_v60 = vmul.f32 %v3881_v29, %v3053_v23 }
 0xa82   : > { %v3056_v63 = vmul.f32 %v3053_v23, %v2848_v28  ;;  %v3895_v1 = vpop.f32.mrf.mxu0  ;;  %v3065_v52 = vmul.f32 %v3053_v23, %v2981_v25  ;;  %v3066_v48 = vmul.f32 %v3053_v23, %v2984_v3  ;;  %v3067_v24 = vmul.f32 %v3900_v12, %v3053_v23  ;;  %v6085_v25 = vld [vmem:[#allocation4_spill] sm:$0xff]  ;;  %v6086_v3 = vld [vmem:[#allocation15_spill] sm:$0xff]  ;;  %v6090_v44 = vld [vmem:[#allocation14_spill] sm:$0xff] }
 0xa83   : > { %v3119_v46 = vpack.c.bf16 %v3058_v60, %v3057_v2  ;;  %v3070_v58 = vpack.c.bf16 %v3054_v32, %v3054_v32  ;;  %v3068_v5 = vmul.f32 %v3901_v35, %v3053_v23  ;;  %v3059_v16 = vmul.f32 %v3053_v23, %v2911_v8  ;;  %v6091_v60 = vld [vmem:[#allocation12_spill] sm:$0xff] }
 0xa84   : > { %v3118_v40 = vpack.c.bf16 %v3056_v63, %v3055_v0  ;;  %v3254_v51 = vpack.c.bf16 %v3066_v48, %v3065_v52  ;;  %v3060_v49 = vmul.f32 %v3053_v23, %v2914_v15  ;;  %v3069_v47 = vmul.f32 %v3053_v23, %v3039_v19  ;;  %v6084_v15 = vld [vmem:[#allocation5_spill] sm:$0xff] }
 0xa85   : > { %3911 = vmatmul.mubr.msk.bf16.vlgmr.msra.gmra.mxu1 %vm368_vm0, %v3070_v58  ;;  %v3255_v62 = vpack.c.bf16 %v3068_v5, %v3067_v24  ;;  %v3061_v18 = vmul.f32 %v3053_v23, %v2919_v37  ;;  %v3062_v38 = vmul.f32 %v3053_v23, %v2922_v10  ;;  %v3063_v7 = vmul.f32 %v3053_v23, %v2927_v41  ;;  %v6087_v19 = vld [vmem:[#allocation13_spill] sm:$0xff]  ;;  %v6094_v24 = vld [vmem:[#allocation6_spill] sm:$0xff] }
 0xa86   : > { %3916 = vmatprep.mubr.msk.bf16.mxu0 %vm368_vm0, %v3118_v40  ;;  %3921 = vmatpush3.bf16.msra.mxu1 %v3195_v61  ;;  %v3180_v39 = vpack.c.bf16 %v3060_v49, %v3059_v16  ;;  %v3316_v43 = vpack.c.bf16 %v3069_v47, %v3069_v47  ;;  %v3064_v4 = vmul.f32 %v3053_v23, %v2930_v34  ;;  %v6089_v23 = vld [vmem:[#allocation9_spill] sm:$0xff]  ;;  %v6093_v40 = vld [vmem:[#allocation16_spill] sm:$0xff] }
 0xa87   : > { %3917 = vmatmul.mubr.msk.bf16.vlgmr.msra.gmra.mxu0 %vm368_vm0, %v3119_v46  ;;  %3922 = vmatprep.mubr.msk.bf16.mxu1 %vm4155_vm2, %v6080_v54  ;;  %v3181_v50 = vpack.c.bf16 %v3062_v38, %v3061_v18  ;;  %v6096_v18 = vld [vmem:[#allocation8_spill] sm:$0xff] }
 0xa88   : > { %3936 = vmatprep.mubr.msk.bf16.mxu0 %vm368_vm0, %v3254_v51  ;;  %3935 = vmatpush3.bf16.msra.mxu0 %v3265_v13  ;;  %v3182_v45 = vpack.c.bf16 %v3064_v4, %v3063_v7 }
 0xa89   : > { %3940 = vmatprep.subr.bf16.mxu0 %v6080_v54 }
 0xa8d   : > { %3923 = vmatmul.mubr.msk.bf16.vlgmr.msra.gmra.mxu1 %vm368_vm0, %v3180_v39 }
 0xa8e   : > { %3926 = vmatprep.mubr.msk.bf16.mxu1 %vm4155_vm2, %v6080_v54 }
 0xa8f   : > { %3937 = vmatmul.mubr.msk.bf16.vlgmr.msra.gmra.mxu0 %vm368_vm0, %v3255_v62  ;;  %v6095_v62 = vld [vmem:[#allocation7_spill] sm:$0xff] }
 0xa90   : > { %3941 = vmatpush3.bf16.msra.mxu0 %v3323_v55  ;;  %3942 = vmatprep.mubr.msk.bf16.mxu0 %vm4155_vm2, %v6080_v54 }
 0xa95   : > { %3927 = vmatmul.mubr.msk.bf16.gmra.mxu1 %vm368_vm0, %v3181_v50 }
 0xa96   : > { %3930 = vmatprep.mubr.msk.bf16.mxu1 %vm4155_vm2, %v6080_v54  ;;  %v6082_v54 = vld [vmem:[#allocation2_spill] sm:$0xff] }
 0xa97   : > { %3943 = vmatmul.mubr.msk.bf16.vlgmr.msra.gmra.mxu0 %vm368_vm0, %v3316_v43 }
 0xa9d   : > { %3931 = vmatmul.mubr.msk.bf16.gmra.mxu1 %vm368_vm0, %v3182_v45 }
 0xb45   : > { %v3112_v56 = vpop.f32.mrf.mxu1 }
 0xb46   : > { %v3365_v57 = vadd.f32 %v3112_v56, %v6082_v54 }
 0xb47   : > { %v3918_v6 = vpop.f32.mrf.mxu0  ;;  %v3912_v8 = vpop.f32.mrf.mxu1 }
 0xb48   : > { %v3368_v21 = vadd.f32 %v3918_v6, %v6081_v53  ;;  %3381 = vst.msk [vmem:[%s5814_s17] sm:$0xff] %vm368_vm0, %v3365_v57 }
 0xb49   : > { %v3165_v31 = vpop.f32.mrf.mxu0  ;;  %v3115_v28 = vpop.f32.mrf.mxu1 }
 0xb4a   : > { %3585 = vst.msk [vmem:[%s5814_s17 + $0x18] sm:$0xff] %vm368_vm0, %v3368_v21  ;;  %v3366_v29 = vadd.f32 %v3165_v31, %v6083_v42 }
 0xb4b   : > { %v3919_v27 = vpop.f32.mrf.mxu0  ;;  %v3913_v37 = vpop.f32.mrf.mxu1 }
 0xb4c   : > { %3583 = vst.msk [vmem:[%s5814_s17 + $0x8] sm:$0xff] %vm368_vm0, %v3366_v29  ;;  %v3369_v30 = vadd.f32 %v3919_v27, %v6084_v15 }
 0xb4d   : > { %v3168_v12 = vpop.f32.mrf.mxu0  ;;  %v3231_v10 = vpop.f32.mrf.mxu1 }
 0xb4e   : > { %3586 = vst.msk [vmem:[%s5814_s17 + $0x20] sm:$0xff] %vm368_vm0, %v3369_v30  ;;  %v3367_v20 = vadd.f32 %v3168_v12, %v6085_v25  ;;  %v3370_v22 = vadd.f32 %v3231_v10, %v6087_v19 }
 0xb4f   : > { %v3938_v35 = vpop.f32.mrf.mxu0  ;;  %v3924_v14 = vpop.f32.mrf.mxu1 }
 0xb50   : > { %3584 = vst.msk [vmem:[%s5814_s17 + $0x10] sm:$0xff] %vm368_vm0, %v3367_v20  ;;  %v3378_v11 = vadd.f32 %v3938_v35, %v6086_v3  ;;  %3587 = vst.msk [vmem:[%s5814_s17 + $0x28] sm:$0xff] %vm368_vm0, %v3370_v22 }
 0xb51   : > { %v3301_v41 = vpop.f32.mrf.mxu0  ;;  %v3234_v9 = vpop.f32.mrf.mxu1 }
 0xb52   : > { %3595 = vst.msk [vmem:[%s5814_s17 + $0x68] sm:$0xff] %vm368_vm0, %v3378_v11  ;;  %v3376_v36 = vadd.f32 %v3301_v41, %v6088_v17  ;;  %v3371_v2 = vadd.f32 %v3234_v9, %v6090_v44 }
 0xb53   : > { %v3939_v59 = vpop.f32.mrf.mxu0  ;;  %v3925_v32 = vpop.f32.mrf.mxu1 }
 0xb54   : > { %3593 = vst.msk [vmem:[%s5814_s17 + $0x58] sm:$0xff] %vm368_vm0, %v3376_v36  ;;  %v3379_v34 = vadd.f32 %v3939_v59, %v6089_v23  ;;  %3588 = vst.msk [vmem:[%s5814_s17 + $0x30] sm:$0xff] %vm368_vm0, %v3371_v2 }
 0xb55   : > { %v3304_v0 = vpop.f32.mrf.mxu0  ;;  %v3239_v52 = vpop.f32.mrf.mxu1 }
 0xb56   : > { %3596 = vst.msk [vmem:[%s5814_s17 + $0x70] sm:$0xff] %vm368_vm0, %v3379_v34  ;;  %v3377_v63 = vadd.f32 %v3304_v0, %v6091_v60  ;;  %v3372_v48 = vadd.f32 %v3239_v52, %v6093_v40 }
 0xb57   : > { %v3359_v1 = vpop.f32.mrf.mxu0  ;;  %v3928_v58 = vpop.f32.mrf.mxu1 }
 0xb58   : > { %3594 = vst.msk [vmem:[%s5814_s17 + $0x60] sm:$0xff] %vm368_vm0, %v3377_v63  ;;  %v3380_v46 = vadd.f32 %v3359_v1, %v6092_v33  ;;  %3589 = vst.msk [vmem:[%s5814_s17 + $0x38] sm:$0xff] %vm368_vm0, %v3372_v48 }
 0xb59   : > { %v3944_v51 = vpop.f32.mrf.mxu0  ;;  %v3242_v13 = vpop.f32.mrf.mxu1 }
 0xb5a   : > { %3597 = vst.msk [vmem:[%s5814_s17 + $0x78] sm:$0xff] %vm368_vm0, %v3380_v46  ;;  %v3373_v5 = vadd.f32 %v3242_v13, %v6094_v24 }
 0xb5b   : > { %v3362_v61 = vpop.f32.mrf.mxu0  ;;  %v3929_v49 = vpop.f32.mrf.mxu1 }
 0xb5c   : > { %3590 = vst.msk [vmem:[%s5814_s17 + $0x40] sm:$0xff] %vm368_vm0, %v3373_v5 }
 0xb5d   : > { %v3945_v16 = vpop.f32.mrf.mxu0  ;;  %v3247_v26 = vpop.f32.mrf.mxu1 }
 0xb5e   : > { %v3374_v55 = vadd.f32 %v3247_v26, %v6095_v62 }
 0xb5f   : > { %v3932_v39 = vpop.f32.mrf.mxu1 }
 0xb60   : > { %3591 = vst.msk [vmem:[%s5814_s17 + $0x48] sm:$0xff] %vm368_vm0, %v3374_v55 }
 0xb61   : > { %v3250_v47 = vpop.f32.mrf.mxu1 }
 0xb62   : > { %v3375_v38 = vadd.f32 %v3250_v47, %v6096_v18 }
 0xb63   : > { %v3933_v43 = vpop.f32.mrf.mxu1 }
 0xb64   : > { %3592 = vst.msk [vmem:[%s5814_s17 + $0x50] sm:$0xff] %vm368_vm0, %v3375_v38 }
 0xb65 PF: > { %s18_s27 = sadd.s32 1, %s4152_s27  }
 0xb66   : > { %p15_p4 = scmp.ge.s32.totalorder %s18_s27, 4  }
 0xb68   :  { %17 = sbr.rel (!%p15_p4) target bundleno = 1 (0x1), region = 139 }

</bundles_post_ra>
